<compile_context>
chip_gen: v6e
topology: v6e:2x2x1
jax: 0.10.0
libtpu: 0.0.40
codegen_flags: <defaults>
</compile_context>

<pallas_src>
import jax
import jax.numpy as jnp
from jax.experimental import pallas as pl
from jax.experimental.pallas import tpu as pltpu

IN_DIM = 3 * 32 * 32                                         # 3072
DIMS = [(IN_DIM, 320), (320, 120), (120, 84), (84, 10)]      # logical widths
PAD = [(IN_DIM, 384), (384, 128), (128, 128), (128, 128)]    # padded widths
OUT_PAD = 128
MAX_TM = 1024                                                # v7x VMEM cap


def _round_up(a, m):
    return ((a + m - 1) // m) * m


def _mlp_kernel(x_ref, w1_ref, b1_ref, w2_ref, b2_ref,
                w3_ref, b3_ref, w4_ref, b4_ref, o_ref):
    # x tile -> bf16 for the MXU (no-op if the producer already supplied
    # bf16); all accumulation, bias adds and sigmoids stay f32.
    x = x_ref[...].astype(jnp.bfloat16)
    h1 = jax.nn.sigmoid(
        jnp.dot(x, w1_ref[...], preferred_element_type=jnp.float32) + b1_ref[...])
    h2 = jax.nn.sigmoid(
        jnp.dot(h1.astype(jnp.bfloat16), w2_ref[...],
                preferred_element_type=jnp.float32) + b2_ref[...])
    h3 = jax.nn.sigmoid(
        jnp.dot(h2.astype(jnp.bfloat16), w3_ref[...],
                preferred_element_type=jnp.float32) + b3_ref[...])
    o_ref[...] = (jnp.dot(h3.astype(jnp.bfloat16), w4_ref[...],
                          preferred_element_type=jnp.float32) + b4_ref[...])


def _pad_params(params):
    """Zero-pad weights/biases to 128-lane multiples; weights cast to bf16."""
    padded = []
    for (w, b), (in_pad, out_pad) in zip(params, PAD):
        in_orig, out_orig = w.shape
        w_p = jnp.zeros((in_pad, out_pad), jnp.float32)
        w_p = w_p.at[:in_orig, :out_orig].set(w)
        b_p = jnp.zeros((1, out_pad), jnp.float32)
        b_p = b_p.at[:, :out_orig].set(b.reshape(1, -1))
        padded.append((w_p.astype(jnp.bfloat16), b_p))
    return padded


def _resident_spec(shape):
    # Block == full array, fixed block index -> stays VMEM-resident across
    # grid steps.  Shape rank captured via default arg (no late-binding bug).
    return pl.BlockSpec(shape, lambda i, _nd=len(shape): (0,) * _nd)


def linear_net_forward(x_nchw, params, *, tm=MAX_TM):
    """x_nchw: [N, 3, 32, 32] (float32 or bfloat16) -> logits [N, 10] float32.

    Supplying x in bf16 halves the dominant HBM traffic; numerics are
    unchanged since the kernel feeds the MXU bf16 either way.
    """
    n = x_nchw.shape[0]
    # Same element order as torch's x.view(-1, 3072).  Keep producer dtype —
    # do NOT insert a wrapper-side cast (it would be an extra HBM pass).
    x_flat = x_nchw.reshape(n, IN_DIM)

    # Batch tile: multiple of 8 sublanes, capped at MAX_TM (v7x 64 MiB/TC
    # VMEM budget) and capped so the grid has >= 2 steps where N allows
    # (so both v7x TensorCores get work on the "parallel" batch axis).
    tm = _round_up(max(min(tm, MAX_TM), 8), 8)
    tm = min(tm, _round_up(pl.cdiv(n, 2), 8))
    grid_m = pl.cdiv(n, tm)   # ragged last block handled/masked by Pallas

    (w1, b1), (w2, b2), (w3, b3), (w4, b4) = _pad_params(params)
    operands = (x_flat, w1, b1, w2, b2, w3, b3, w4, b4)

    in_specs = [pl.BlockSpec((tm, IN_DIM), lambda i: (i, 0))]
    in_specs += [_resident_spec(op.shape) for op in operands[1:]]

    flops = 2 * n * sum(i * o for i, o in PAD)
    transcendentals = n * (384 + 128 + 128)
    bytes_accessed = (
        x_flat.size * x_flat.dtype.itemsize
        + sum(w.size * 2 + b.size * 4
              for (w, b) in ((w1, b1), (w2, b2), (w3, b3), (w4, b4)))
        + n * OUT_PAD * 4)

    out = pl.pallas_call(
        _mlp_kernel,
        out_shape=jax.ShapeDtypeStruct((n, OUT_PAD), jnp.float32),
        grid=(grid_m,),
        in_specs=in_specs,
        out_specs=pl.BlockSpec((tm, OUT_PAD), lambda i: (i, 0)),
        compiler_params=pltpu.CompilerParams(
            dimension_semantics=("parallel",),
            # TM=1024, f32 x: 2x12 MiB (x) + ~5 MiB (weights, 2x) + 1 MiB
            # (out, 2x) ~= 30 MiB -> 48 MiB limit leaves headroom everywhere.
            vmem_limit_bytes=48 << 20),
        cost_estimate=pl.CostEstimate(
            flops=flops,
            transcendentals=transcendentals,
            bytes_accessed=bytes_accessed),
    )(*operands)

    return out[:n, :10]


def init_params(key):
    """Deterministic init mirroring nn.Linear shapes; weights stored as [in, out]."""
    params = []
    for (fan_in, fan_out) in DIMS:
        key, kw, kb = jax.random.split(key, 3)
        bound = 1.0 / jnp.sqrt(fan_in)
        # PyTorch nn.Linear default: U(-1/sqrt(fan_in), 1/sqrt(fan_in)).
        w = jax.random.uniform(kw, (fan_in, fan_out), jnp.float32, -bound, bound)
        b = jax.random.uniform(kb, (1, fan_out), jnp.float32, -bound, bound)
        params.append((w, b))
    return params


def _reference_forward(x_nchw, params):
    """Pure-f32 JAX reference (matches the PyTorch module)."""
    x = x_nchw.astype(jnp.float32).reshape(x_nchw.shape[0], -1)
    (w1, b1), (w2, b2), (w3, b3), (w4, b4) = params
    h = jax.nn.sigmoid(x @ w1 + b1)
    h = jax.nn.sigmoid(h @ w2 + b2)
    h = jax.nn.sigmoid(h @ w3 + b3)
    return h @ w4 + b4


if __name__ == "__main__":
    key = jax.random.PRNGKey(0)
    key, kx = jax.random.split(key)

    # Small batch; input shape implied by the module (N, 3, 32, 32).
    x = jax.random.normal(kx, (2, 3, 32, 32), jnp.float32)
    params = init_params(key)
    ref = _reference_forward(x, params)

    # f32 input path (ragged N < TM: single partial block, masked).
    out = jax.block_until_ready(linear_net_forward(x, params))
    assert out.shape == (2, 10), out.shape
    # bf16 matmul inputs with f32 accumulation -> loosened tolerance vs f32 ref.
    assert jnp.allclose(out, ref, atol=2e-2, rtol=2e-2), "f32-input mismatch"

    # bf16 input path (halves dominant HBM traffic; kernel cast is a no-op).
    # The cast here only exists to exercise the path in the demo.
    out_bf = jax.block_until_ready(
        linear_net_forward(x.astype(jnp.bfloat16), params))
    assert out_bf.shape == (2, 10), out_bf.shape
    assert jnp.allclose(out_bf, ref, atol=2e-2, rtol=2e-2), "bf16-input mismatch"

    print("KERNEL_OK")
</pallas_src>

<mosaic_0001>
module attributes {stable_mosaic.version = 11 : i64} {
  func.func @_mlp_kernel(%arg0: i32, %arg1: memref<8x3072xf32, #tpu.memory_space<vmem>>, %arg2: memref<3072x384xbf16, #tpu.memory_space<vmem>>, %arg3: memref<1x384xf32, #tpu.memory_space<vmem>>, %arg4: memref<384x128xbf16, #tpu.memory_space<vmem>>, %arg5: memref<1x128xf32, #tpu.memory_space<vmem>>, %arg6: memref<128x128xbf16, #tpu.memory_space<vmem>>, %arg7: memref<1x128xf32, #tpu.memory_space<vmem>>, %arg8: memref<128x128xbf16, #tpu.memory_space<vmem>>, %arg9: memref<1x128xf32, #tpu.memory_space<vmem>>, %arg10: memref<8x128xf32, #tpu.memory_space<vmem>>) attributes {dimension_semantics = [#tpu.dimension_semantics<parallel>], iteration_bounds = array<i64: 1>, scalar_prefetch = 0 : i64, scratch_operands = 0 : i64, tpu.core_type = #tpu.core_type<tc>, window_params = [{transform_indices = @transform_0, window_bounds = array<i64: 8, 3072>}, {pipeline_mode = #tpu.pipeline_mode<synchronous>, transform_indices = @transform_1, window_bounds = array<i64: 3072, 384>}, {pipeline_mode = #tpu.pipeline_mode<synchronous>, transform_indices = @transform_2, window_bounds = array<i64: 1, 384>}, {pipeline_mode = #tpu.pipeline_mode<synchronous>, transform_indices = @transform_3, window_bounds = array<i64: 384, 128>}, {pipeline_mode = #tpu.pipeline_mode<synchronous>, transform_indices = @transform_4, window_bounds = array<i64: 1, 128>}, {pipeline_mode = #tpu.pipeline_mode<synchronous>, transform_indices = @transform_5, window_bounds = array<i64: 128, 128>}, {pipeline_mode = #tpu.pipeline_mode<synchronous>, transform_indices = @transform_6, window_bounds = array<i64: 1, 128>}, {pipeline_mode = #tpu.pipeline_mode<synchronous>, transform_indices = @transform_7, window_bounds = array<i64: 128, 128>}, {pipeline_mode = #tpu.pipeline_mode<synchronous>, transform_indices = @transform_8, window_bounds = array<i64: 1, 128>}, {transform_indices = @transform_9, window_bounds = array<i64: 8, 128>}]} {
    %c0 = arith.constant 0 : index
    %c0_0 = arith.constant 0 : index
    %0 = vector.load %arg1[%c0, %c0_0] : memref<8x3072xf32, #tpu.memory_space<vmem>>, vector<8x3072xf32>
    %1 = arith.truncf %0 : vector<8x3072xf32> to vector<8x3072xbf16>
    %c0_1 = arith.constant 0 : index
    %c0_2 = arith.constant 0 : index
    %2 = vector.load %arg2[%c0_1, %c0_2] : memref<3072x384xbf16, #tpu.memory_space<vmem>>, vector<3072x384xbf16>
    %cst = arith.constant dense<0.000000e+00> : vector<8x384xf32>
    %3 = tpu.matmul %1, %2, %cst {dimension_numbers = #tpu.dot_dimension_numbers<[1], [0], [0], [1], [0, 0, 1, 1], [], []>} : vector<8x3072xbf16>, vector<3072x384xbf16>, vector<8x384xf32> -> vector<8x384xf32>
    %c0_3 = arith.constant 0 : index
    %c0_4 = arith.constant 0 : index
    %4 = vector.load %arg3[%c0_3, %c0_4] : memref<1x384xf32, #tpu.memory_space<vmem>>, vector<1x384xf32>
    %5 = vector.broadcast %4 : vector<1x384xf32> to vector<8x384xf32>
    %6 = arith.addf %3, %5 : vector<8x384xf32>
    %7 = arith.negf %6 : vector<8x384xf32>
    %8 = math.exp %7 : vector<8x384xf32>
    %cst_5 = arith.constant 1.000000e+00 : f32
    %9 = vector.broadcast %cst_5 : f32 to vector<8x384xf32>
    %10 = arith.addf %9, %8 : vector<8x384xf32>
    %11 = arith.divf %9, %10 : vector<8x384xf32>
    %12 = arith.truncf %11 : vector<8x384xf32> to vector<8x384xbf16>
    %c0_6 = arith.constant 0 : index
    %c0_7 = arith.constant 0 : index
    %13 = vector.load %arg4[%c0_6, %c0_7] : memref<384x128xbf16, #tpu.memory_space<vmem>>, vector<384x128xbf16>
    %cst_8 = arith.constant dense<0.000000e+00> : vector<8x128xf32>
    %14 = tpu.matmul %12, %13, %cst_8 {dimension_numbers = #tpu.dot_dimension_numbers<[1], [0], [0], [1], [0, 0, 1, 1], [], []>} : vector<8x384xbf16>, vector<384x128xbf16>, vector<8x128xf32> -> vector<8x128xf32>
    %c0_9 = arith.constant 0 : index
    %c0_10 = arith.constant 0 : index
    %15 = vector.load %arg5[%c0_9, %c0_10] : memref<1x128xf32, #tpu.memory_space<vmem>>, vector<1x128xf32>
    %16 = vector.broadcast %15 : vector<1x128xf32> to vector<8x128xf32>
    %17 = arith.addf %14, %16 : vector<8x128xf32>
    %18 = arith.negf %17 : vector<8x128xf32>
    %19 = math.exp %18 : vector<8x128xf32>
    %cst_11 = arith.constant 1.000000e+00 : f32
    %20 = vector.broadcast %cst_11 : f32 to vector<8x128xf32>
    %21 = arith.addf %20, %19 : vector<8x128xf32>
    %22 = arith.divf %20, %21 : vector<8x128xf32>
    %23 = arith.truncf %22 : vector<8x128xf32> to vector<8x128xbf16>
    %c0_12 = arith.constant 0 : index
    %c0_13 = arith.constant 0 : index
    %24 = vector.load %arg6[%c0_12, %c0_13] : memref<128x128xbf16, #tpu.memory_space<vmem>>, vector<128x128xbf16>
    %cst_14 = arith.constant dense<0.000000e+00> : vector<8x128xf32>
    %25 = tpu.matmul %23, %24, %cst_14 {dimension_numbers = #tpu.dot_dimension_numbers<[1], [0], [0], [1], [0, 0, 1, 1], [], []>} : vector<8x128xbf16>, vector<128x128xbf16>, vector<8x128xf32> -> vector<8x128xf32>
    %c0_15 = arith.constant 0 : index
    %c0_16 = arith.constant 0 : index
    %26 = vector.load %arg7[%c0_15, %c0_16] : memref<1x128xf32, #tpu.memory_space<vmem>>, vector<1x128xf32>
    %27 = vector.broadcast %26 : vector<1x128xf32> to vector<8x128xf32>
    %28 = arith.addf %25, %27 : vector<8x128xf32>
    %29 = arith.negf %28 : vector<8x128xf32>
    %30 = math.exp %29 : vector<8x128xf32>
    %cst_17 = arith.constant 1.000000e+00 : f32
    %31 = vector.broadcast %cst_17 : f32 to vector<8x128xf32>
    %32 = arith.addf %31, %30 : vector<8x128xf32>
    %33 = arith.divf %31, %32 : vector<8x128xf32>
    %34 = arith.truncf %33 : vector<8x128xf32> to vector<8x128xbf16>
    %c0_18 = arith.constant 0 : index
    %c0_19 = arith.constant 0 : index
    %35 = vector.load %arg8[%c0_18, %c0_19] : memref<128x128xbf16, #tpu.memory_space<vmem>>, vector<128x128xbf16>
    %cst_20 = arith.constant dense<0.000000e+00> : vector<8x128xf32>
    %36 = tpu.matmul %34, %35, %cst_20 {dimension_numbers = #tpu.dot_dimension_numbers<[1], [0], [0], [1], [0, 0, 1, 1], [], []>} : vector<8x128xbf16>, vector<128x128xbf16>, vector<8x128xf32> -> vector<8x128xf32>
    %c0_21 = arith.constant 0 : index
    %c0_22 = arith.constant 0 : index
    %37 = vector.load %arg9[%c0_21, %c0_22] : memref<1x128xf32, #tpu.memory_space<vmem>>, vector<1x128xf32>
    %38 = vector.broadcast %37 : vector<1x128xf32> to vector<8x128xf32>
    %39 = arith.addf %36, %38 : vector<8x128xf32>
    %c0_23 = arith.constant 0 : index
    %c0_24 = arith.constant 0 : index
    %40 = vector.load %arg10[%c0_23, %c0_24] : memref<8x128xf32, #tpu.memory_space<vmem>>, vector<8x128xf32>
    tpu.vector_store %arg10[%c0_23, %c0_24], %39 {strides = array<i32>} : memref<8x128xf32, #tpu.memory_space<vmem>>, vector<8x128xf32>,
    return
  }
  func.func @transform_0(%arg0: i32) -> (i32, i32) {
    %c0_i32 = arith.constant 0 : i32
    %c0_i32_0 = arith.constant 0 : i32
    return %arg0, %c0_i32 : i32, i32
  }
  func.func @transform_1(%arg0: i32) -> (i32, i32) {
    %c0_i32 = arith.constant 0 : i32
    %c0_i32_0 = arith.constant 0 : i32
    %c0_i32_1 = arith.constant 0 : i32
    return %c0_i32, %c0_i32_0 : i32, i32
  }
  func.func @transform_2(%arg0: i32) -> (i32, i32) {
    %c0_i32 = arith.constant 0 : i32
    %c0_i32_0 = arith.constant 0 : i32
    %c0_i32_1 = arith.constant 0 : i32
    return %c0_i32, %c0_i32_0 : i32, i32
  }
  func.func @transform_3(%arg0: i32) -> (i32, i32) {
    %c0_i32 = arith.constant 0 : i32
    %c0_i32_0 = arith.constant 0 : i32
    %c0_i32_1 = arith.constant 0 : i32
    return %c0_i32, %c0_i32_0 : i32, i32
  }
  func.func @transform_4(%arg0: i32) -> (i32, i32) {
    %c0_i32 = arith.constant 0 : i32
    %c0_i32_0 = arith.constant 0 : i32
    %c0_i32_1 = arith.constant 0 : i32
    return %c0_i32, %c0_i32_0 : i32, i32
  }
  func.func @transform_5(%arg0: i32) -> (i32, i32) {
    %c0_i32 = arith.constant 0 : i32
    %c0_i32_0 = arith.constant 0 : i32
    %c0_i32_1 = arith.constant 0 : i32
    return %c0_i32, %c0_i32_0 : i32, i32
  }
  func.func @transform_6(%arg0: i32) -> (i32, i32) {
    %c0_i32 = arith.constant 0 : i32
    %c0_i32_0 = arith.constant 0 : i32
    %c0_i32_1 = arith.constant 0 : i32
    return %c0_i32, %c0_i32_0 : i32, i32
  }
  func.func @transform_7(%arg0: i32) -> (i32, i32) {
    %c0_i32 = arith.constant 0 : i32
    %c0_i32_0 = arith.constant 0 : i32
    %c0_i32_1 = arith.constant 0 : i32
    return %c0_i32, %c0_i32_0 : i32, i32
  }
  func.func @transform_8(%arg0: i32) -> (i32, i32) {
    %c0_i32 = arith.constant 0 : i32
    %c0_i32_0 = arith.constant 0 : i32
    %c0_i32_1 = arith.constant 0 : i32
    return %c0_i32, %c0_i32_0 : i32, i32
  }
  func.func @transform_9(%arg0: i32) -> (i32, i32) {
    %c0_i32 = arith.constant 0 : i32
    %c0_i32_0 = arith.constant 0 : i32
    return %arg0, %c0_i32 : i32, i32
  }
}

</mosaic_0001>

<bundles_post_ra>
// kernel: tpu_custom_call.1
= control target key start
LH: loop header
LB: loop body
LE: loop exit
PB: predicated region body
PF: predicated region fallthrough
CT: control target
= control target key end

     0   :  { %14 = vsyncpa [#allocation3], 0  ;;  %s8314_s0 = inlined_call_operand.hbm [shape: f32[2,3072], index: 0, kind: input, shape index: {}]   ;;  %s8315_s1 = inlined_call_operand.hbm [shape: bf16[3072,384], index: 1, kind: input, shape index: {}]   ;;  %s8316_s2 = inlined_call_operand.hbm [shape: f32[1,384], index: 2, kind: input, shape index: {}]   ;;  %s8317_s3 = inlined_call_operand.hbm [shape: bf16[384,128], index: 3, kind: input, shape index: {}]   ;;  %s8318_s4 = inlined_call_operand.hbm [shape: f32[1,128], index: 4, kind: input, shape index: {}]   ;;  %s8319_s5 = inlined_call_operand.hbm [shape: bf16[128,128], index: 5, kind: input, shape index: {}]   ;;  %s8320_s6 = inlined_call_operand.hbm [shape: f32[1,128], index: 6, kind: input, shape index: {}]   ;;  %s8321_s7 = inlined_call_operand.hbm [shape: bf16[128,128], index: 7, kind: input, shape index: {}]   ;;  %s8322_s8 = inlined_call_operand.hbm [shape: f32[1,128], index: 8, kind: input, shape index: {}]   ;;  %s8323_s9 = inlined_call_operand.hbm [shape: f32[2,128], index: 9, kind: output, shape index: {}]  }
   0x1   :  { %15 = vsyncpa [#allocation6], 0 }
   0x2   :  { %16 = vsyncpa [#allocation9], 0 }
   0x3   :  { %17 = vsyncpa [#allocation12], 0 }
   0x4   :  { %18 = vsyncpa [#allocation15], 0 }
   0x5   :  { %19 = vsyncpa [#allocation4], 0 }
   0x6   :  { %24 = vsyncadd [#allocation3], 2304  ;;  %s7942_s30 = smov [#allocation5]  }
   0x7   :  { %s37_s10 = sshll.u32 %s7942_s30, 4  ;;  %s38_s10 = int_to_ptr.vmem [resolvable:$true] %s37_s10 }
   0x8   :  { %s7738_s11 = scalar_lea.vmem %s38_s10, 73728  ;;  %p7743_p1 = scmp.lt.s32.totalorder %s38_s10, %s38_s10 }
   0x9   :  { %p7739_p0 = scmp.ne.s32.totalorder %s38_s10, %s7738_s11  ;;  %p7744_p2 = scmp.lt.s32.totalorder %s7738_s11, %s7738_s11 }
   0xb   :  { %p7745_p3 = por %p7744_p2, %p7743_p1 }
   0xd   :  { %p7746_p4 = pnand %p7745_p3, %p7739_p0 }
   0xf   :  { %7749 = shalt.err (!%p7746_p4)
}
  0x10   :  { %s7943_s12 = smov 192   ;;  %s7944_s13 = smov 12  }
  0x11   :  { %43 = dma.hbm_to_vmem [thread:$0]  %s8315_s1, 73728, %s38_s10, [#allocation6], %s7943_s12, %s7943_s12, %s7944_s13  }
  0x12   :  { %s7945_s16 = smov [#allocation8]  }
  0x13   :  { %s59_s17 = sshll.u32 %s7945_s16, 4  ;;  %s60_s17 = int_to_ptr.vmem [resolvable:$true] %s59_s17 }
  0x14   :  { %s7758_s18 = scalar_lea.vmem %s60_s17, 3072  ;;  %p7763_p6 = scmp.lt.s32.totalorder %s60_s17, %s60_s17 }
  0x15   :  { %p7759_p5 = scmp.ne.s32.totalorder %s60_s17, %s7758_s18  ;;  %p7764_p7 = scmp.lt.s32.totalorder %s7758_s18, %s7758_s18 }
  0x17   :  { %p7765_p8 = por %p7764_p7, %p7763_p6 }
  0x19   :  { %p7766_p9 = pnand %p7765_p8, %p7759_p5 }
  0x1b   :  { %7769 = shalt.err (!%p7766_p9)
}
  0x1c   :  { %s7946_s19 = smov 64   ;;  %s7947_s20 = smov 4  }
  0x1d   :  { %65 = dma.hbm_to_vmem [thread:$0]  %s8317_s3, 3072, %s60_s17, [#allocation9], %s7946_s19, %s7946_s19, %s7947_s20  }
  0x1e   :  { %s7948_s23 = smov [#allocation11]   ;;  %s7949_s25 = smov [#allocation14]  }
  0x1f   :  { %s81_s24 = sshll.u32 %s7948_s23, 4  ;;  %s103_s1 = sshll.u32 %s7949_s25, 4  ;;  %s82_s24 = int_to_ptr.vmem [resolvable:$true] %s81_s24  ;;  %s104_s1 = int_to_ptr.vmem [resolvable:$true] %s103_s1 }
  0x20   :  { %s7778_s26 = scalar_lea.vmem %s82_s24, 1024  ;;  %p7783_p11 = scmp.lt.s32.totalorder %s82_s24, %s82_s24 }
  0x21   :  { %p7779_p10 = scmp.ne.s32.totalorder %s82_s24, %s7778_s26  ;;  %p7784_p12 = scmp.lt.s32.totalorder %s7778_s26, %s7778_s26 }
  0x23   :  { %p7785_p13 = por %p7784_p12, %p7783_p11 }
  0x25   :  { %p7786_p0 = pnand %p7785_p13, %p7779_p10 }
  0x27   :  { %7789 = shalt.err (!%p7786_p0)
}
  0x28   :  { %87 = dma.hbm_to_vmem [thread:$0]  %s8319_s5, 1024, %s82_s24, [#allocation12], %s7946_s19, %s7946_s19, %s7947_s20  }
  0x29   :  { %s7798_s29 = scalar_lea.vmem %s104_s1, 1024  ;;  %p7803_p2 = scmp.lt.s32.totalorder %s104_s1, %s104_s1 }
  0x2a   :  { %p7799_p1 = scmp.ne.s32.totalorder %s104_s1, %s7798_s29  ;;  %p7804_p3 = scmp.lt.s32.totalorder %s7798_s29, %s7798_s29 }
  0x2c   :  { %p7805_p4 = por %p7804_p3, %p7803_p2 }
  0x2e   :  { %p7806_p5 = pnand %p7805_p4, %p7799_p1 }
  0x30   :  { %7809 = shalt.err (!%p7806_p5)
}
  0x31   :  { %109 = dma.hbm_to_vmem [thread:$0]  %s8321_s7, 1024, %s104_s1, [#allocation15], %s7946_s19, %s7946_s19, %s7947_s20  }
  0x32   :  { %s7950_s10 = smov [#allocation2]  }
  0x33   :  { %s25_s11 = sshll.u32 %s7950_s10, 4  ;;  %s26_s11 = int_to_ptr.vmem [resolvable:$true] %s25_s11 }
  0x34   :  { %s7818_s12 = scalar_lea.vmem %s26_s11, 768  ;;  %s7822_s13 = scalar_lea.vmem %s26_s11, 3072 }
  0x35   :  { %p7819_p6 = scmp.ne.s32.totalorder %s26_s11, %s7818_s12  ;;  %p7823_p7 = scmp.lt.s32.totalorder %s26_s11, %s26_s11 }
  0x36   :  { %p7824_p8 = scmp.lt.s32.totalorder %s7822_s13, %s7818_s12 }
  0x38   :  { %p7825_p9 = por %p7824_p8, %p7823_p7 }
  0x3a   :  { %p7826_p10 = pnand %p7825_p9, %p7819_p6 }
  0x3c   :  { %7829 = shalt.err (!%p7826_p10)
}
  0x3d   :  { %s7951_s5 = smov 768   ;;  %s7952_s14 = smov 48  }
  0x3e   :  { %31 = dma.hbm_to_vmem [thread:$0]  %s8314_s0, 768, %s26_s11, [#allocation3], %s7951_s5, %s7951_s5, %s7952_s14  }
  0x3f   :  { %s7953_s17 = smov [#allocation7]   ;;  %s7954_s7 = smov [#allocation10]  }
  0x40   :  { %s50_s18 = sshll.u32 %s7953_s17, 4  ;;  %s72_s19 = sshll.u32 %s7954_s7, 4  ;;  %s51_s18 = int_to_ptr.vmem [resolvable:$true] %s50_s18  ;;  %s73_s19 = int_to_ptr.vmem [resolvable:$true] %s72_s19 }
  0x41   :  { %s7838_s20 = scalar_lea.vmem %s51_s18, 48  ;;  %s7842_s21 = scalar_lea.vmem %s51_s18, 64 }
  0x42   :  { %p7839_p11 = scmp.ne.s32.totalorder %s51_s18, %s7838_s20  ;;  %p7843_p12 = scmp.lt.s32.totalorder %s51_s18, %s51_s18 }
  0x43   :  { %p7844_p13 = scmp.lt.s32.totalorder %s7842_s21, %s7838_s20 }
  0x45   :  { %p7845_p0 = por %p7844_p13, %p7843_p12 }
  0x47   :  { %p7846_p1 = pnand %p7845_p0, %p7839_p11 }
  0x49   :  { %7849 = shalt.err (!%p7846_p1)
}
  0x4a   :  { %53 = dma.hbm_to_vmem [thread:$0]  %s8316_s2, 48, %s51_s18, [#allocation6]  }
  0x4b   :  { %s7858_s24 = scalar_lea.vmem %s73_s19, 16  ;;  %s7862_s0 = scalar_lea.vmem %s73_s19, 32 }
  0x4c   :  { %p7859_p2 = scmp.ne.s32.totalorder %s73_s19, %s7858_s24  ;;  %p7863_p3 = scmp.lt.s32.totalorder %s73_s19, %s73_s19 }
  0x4d   :  { %p7864_p4 = scmp.lt.s32.totalorder %s7862_s0, %s7858_s24 }
  0x4f   :  { %p7865_p5 = por %p7864_p4, %p7863_p3 }
  0x51   :  { %p7866_p6 = pnand %p7865_p5, %p7859_p2 }
  0x53   :  { %7869 = shalt.err (!%p7866_p6)
}
  0x54   :  { %75 = dma.hbm_to_vmem [thread:$0]  %s8318_s4, 16, %s73_s19, [#allocation9]  }
  0x55   :  { %s7955_s26 = smov [#allocation13]   ;;  %s7956_s28 = smov [#allocation16]  }
  0x56   :  { %s94_s27 = sshll.u32 %s7955_s26, 4  ;;  %s116_s29 = sshll.u32 %s7956_s28, 4  ;;  %s95_s27 = int_to_ptr.vmem [resolvable:$true] %s94_s27  ;;  %s117_s29 = int_to_ptr.vmem [resolvable:$true] %s116_s29 }
  0x57   :  { %s7878_s3 = scalar_lea.vmem %s95_s27, 16  ;;  %s7882_s2 = scalar_lea.vmem %s95_s27, 32 }
  0x58   :  { %p7879_p7 = scmp.ne.s32.totalorder %s95_s27, %s7878_s3  ;;  %p7883_p8 = scmp.lt.s32.totalorder %s95_s27, %s95_s27 }
  0x59   :  { %p7884_p9 = scmp.lt.s32.totalorder %s7882_s2, %s7878_s3 }
  0x5b   :  { %p7885_p10 = por %p7884_p9, %p7883_p8 }
  0x5d   :  { %p7886_p11 = pnand %p7885_p10, %p7879_p7 }
  0x5f   :  { %7889 = shalt.err (!%p7886_p11)
}
  0x60   :  { %97 = dma.hbm_to_vmem [thread:$0]  %s8320_s6, 16, %s95_s27, [#allocation12]  }
  0x61   :  { %s7898_s11 = scalar_lea.vmem %s117_s29, 16  ;;  %s7902_s4 = scalar_lea.vmem %s117_s29, 32 }
  0x62   :  { %p7899_p12 = scmp.ne.s32.totalorder %s117_s29, %s7898_s11  ;;  %p7903_p13 = scmp.lt.s32.totalorder %s117_s29, %s117_s29 }
  0x63   :  { %p7904_p0 = scmp.lt.s32.totalorder %s7902_s4, %s7898_s11 }
  0x65   :  { %p7905_p1 = por %p7904_p0, %p7903_p13 }
  0x67   :  { %p7906_p2 = pnand %p7905_p1, %p7899_p12 }
  0x69   :  { %7909 = shalt.err (!%p7906_p2)
}
  0x6a   :  { %119 = dma.hbm_to_vmem [thread:$0]  %s8322_s8, 16, %s117_s29, [#allocation15]  }
  0x6b   :  { %7930 = dma.done.wait [#allocation3], 3072  }
  0x6c   :  { %7931 = vsyncadd [#allocation3], 4294964224 }
  0x6d   :  { %7932 = dma.done.wait [#allocation6], 73776  }
  0x6e   :  { %7933 = vsyncadd [#allocation6], 4294893520 }
  0x6f   :  { %7934 = dma.done.wait [#allocation9], 3088  }
  0x70   :  { %7935 = vsyncadd [#allocation9], 4294964208 }
  0x71   :  { %7936 = dma.done.wait [#allocation12], 1040  }
  0x72   :  { %7937 = vsyncadd [#allocation12], 4294966256 }
  0x73   :  { %7938 = dma.done.wait [#allocation15], 1040  }
  0x74   :  { %7939 = vsyncadd [#allocation15], 4294966256  ;;  %v6865_v0 = vld [vmem:[#allocation5 + $0xac] ss:$12 sps:$4 sm:$0xff]   ;;  %v6869_v2 = vld [vmem:[#allocation5 + $0xa8] ss:$12 sps:$4 sm:$0xff]   ;;  %v203_v40 = vlaneseq }
  0x75   :  { %v6867_v1 = vld [vmem:[#allocation5 + $0x22c] ss:$12 sps:$4 sm:$0xff]   ;;  %4317 = vmatprep.subr.bf16.mxu0 %v6865_v0  ;;  %v6870_v3 = vld [vmem:[#allocation5 + $0x228] ss:$12 sps:$4 sm:$0xff]   ;;  %v6875_v6 = vld [vmem:[#allocation5 + $0x90] ss:$12 sps:$4 sm:$0xff]  }
  0x76   :  { %4358 = vmatprep.subr.bf16.mxu1 %v6867_v1  ;;  %v6871_v4 = vld [vmem:[#allocation5 + $0x94] ss:$12 sps:$4 sm:$0xff]   ;;  %4318 = vmatpush1.bf16.msra.mxu0 %v6869_v2  ;;  %v6876_v7 = vld [vmem:[#allocation5 + $0x210] ss:$12 sps:$4 sm:$0xff]   ;;  %v6881_v10 = vld [vmem:[#allocation5 + $0x78] ss:$12 sps:$4 sm:$0xff]  }
  0x77   :  { %4359 = vmatpush1.bf16.msra.mxu1 %v6870_v3  ;;  %v6873_v5 = vld [vmem:[#allocation5 + $0x214] ss:$12 sps:$4 sm:$0xff]   ;;  %4319 = vmatprep.subr.bf16.mxu0 %v6871_v4  ;;  %v6877_v8 = vld [vmem:[#allocation5 + $0x7c] ss:$12 sps:$4 sm:$0xff]   ;;  %v6882_v11 = vld [vmem:[#allocation5 + $0x1f8] ss:$12 sps:$4 sm:$0xff]  }
  0x78   :  { %4360 = vmatprep.subr.bf16.mxu1 %v6873_v5  ;;  %v6879_v9 = vld [vmem:[#allocation5 + $0x1fc] ss:$12 sps:$4 sm:$0xff]   ;;  %v6883_v12 = vld [vmem:[#allocation5 + $0x64] ss:$12 sps:$4 sm:$0xff]   ;;  %v6887_v14 = vld [vmem:[#allocation5 + $0x60] ss:$12 sps:$4 sm:$0xff]  }
  0x79   :  { %v6885_v13 = vld [vmem:[#allocation5 + $0x1e4] ss:$12 sps:$4 sm:$0xff]   ;;  %v6888_v15 = vld [vmem:[#allocation5 + $0x1e0] ss:$12 sps:$4 sm:$0xff]   ;;  %v6893_v18 = vld [vmem:[#allocation5 + $0x48] ss:$12 sps:$4 sm:$0xff]  }
  0x7a   :  { %4320 = vmatpush1.bf16.msra.mxu0 %v6875_v6  ;;  %v6889_v16 = vld [vmem:[#allocation5 + $0x4c] ss:$12 sps:$4 sm:$0xff]   ;;  %v6894_v19 = vld [vmem:[#allocation5 + $0x1c8] ss:$12 sps:$4 sm:$0xff]   ;;  %v6899_v22 = vld [vmem:[#allocation5 + $0x30] ss:$12 sps:$4 sm:$0xff]  }
  0x7b   :  { %4361 = vmatpush1.bf16.msra.mxu1 %v6876_v7  ;;  %4321 = vmatprep.subr.bf16.mxu0 %v6877_v8  ;;  %v6891_v17 = vld [vmem:[#allocation5 + $0x1cc] ss:$12 sps:$4 sm:$0xff]   ;;  %v6895_v20 = vld [vmem:[#allocation5 + $0x34] ss:$12 sps:$4 sm:$0xff]   ;;  %v6900_v23 = vld [vmem:[#allocation5 + $0x1b0] ss:$12 sps:$4 sm:$0xff]  }
  0x7c   :  { %4362 = vmatprep.subr.bf16.mxu1 %v6879_v9  ;;  %v6897_v21 = vld [vmem:[#allocation5 + $0x1b4] ss:$12 sps:$4 sm:$0xff]   ;;  %v6901_v24 = vld [vmem:[#allocation5 + $0x1c] ss:$12 sps:$4 sm:$0xff]   ;;  %v6905_v26 = vld [vmem:[#allocation5 + $0x18] ss:$12 sps:$4 sm:$0xff]  }
  0x7d   :  { %v6903_v25 = vld [vmem:[#allocation5 + $0x19c] ss:$12 sps:$4 sm:$0xff]   ;;  %v6906_v27 = vld [vmem:[#allocation5 + $0x198] ss:$12 sps:$4 sm:$0xff]   ;;  %v6911_v30 = vld [vmem:[#allocation5] ss:$12 sps:$4 sm:$0xff]  }
  0x7e   :  { %4322 = vmatpush1.bf16.msra.mxu0 %v6881_v10  ;;  %v6907_v28 = vld [vmem:[#allocation5 + $0x4] ss:$12 sps:$4 sm:$0xff]   ;;  %v6912_v31 = vld [vmem:[#allocation5 + $0x180] ss:$12 sps:$4 sm:$0xff]   ;;  %v6917_v34 = vld [vmem:[#allocation5 + $0x168] ss:$12 sps:$4 sm:$0xff]  }
  0x7f   :  { %4363 = vmatpush1.bf16.msra.mxu1 %v6882_v11  ;;  %4323 = vmatprep.subr.bf16.mxu0 %v6883_v12  ;;  %v6909_v29 = vld [vmem:[#allocation5 + $0x184] ss:$12 sps:$4 sm:$0xff]   ;;  %v6913_v32 = vld [vmem:[#allocation5 + $0x16c] ss:$12 sps:$4 sm:$0xff]   ;;  %v6918_v35 = vld [vmem:[#allocation5 + $0x2e8] ss:$12 sps:$4 sm:$0xff]  }
  0x80   :  { %4364 = vmatprep.subr.bf16.mxu1 %v6885_v13  ;;  %v6915_v33 = vld [vmem:[#allocation5 + $0x2ec] ss:$12 sps:$4 sm:$0xff]   ;;  %v6919_v36 = vld [vmem:[#allocation5 + $0x154] ss:$12 sps:$4 sm:$0xff]   ;;  %v7957_v38 = vmov 1983009808  }
  0x81   :  { %v6921_v37 = vld [vmem:[#allocation5 + $0x2d4] ss:$12 sps:$4 sm:$0xff]   ;;  %v201_v39 = vunpack.c.l.s4 %v7957_v38  ;;  %v6923_v41 = vld [vmem:[#allocation5 + $0x150] ss:$12 sps:$4 sm:$0xff]   ;;  %v8040_v46 = vshrl.u32 %v203_v40, 7  ;;  %vm7959_vm0 = vmmov 0  }
  0x82   :  { %4324 = vmatpush1.bf16.msra.mxu0 %v6887_v14  ;;  %v6924_v42 = vld [vmem:[#allocation5 + $0x2d0] ss:$12 sps:$4 sm:$0xff]   ;;  %v6929_v47 = vld [vmem:[#allocation5 + $0x138] ss:$12 sps:$4 sm:$0xff]   ;;  %v6935_v51 = vld [vmem:[#allocation5 + $0x120] ss:$12 sps:$4 sm:$0xff]  }
  0x83   :  { %4365 = vmatpush1.bf16.msra.mxu1 %v6888_v15  ;;  %4325 = vmatprep.subr.bf16.mxu0 %v6889_v16  ;;  %v6925_v43 = vld [vmem:[#allocation5 + $0x13c] ss:$12 sps:$4 sm:$0xff]   ;;  %v202_v45 = vunpack.c.0.s8 %v201_v39  ;;  %v6930_v48 = vld [vmem:[#allocation5 + $0x2b8] ss:$12 sps:$4 sm:$0xff]   ;;  %v6936_v52 = vld [vmem:[#allocation5 + $0x2a0] ss:$12 sps:$4 sm:$0xff]  }
  0x84   :  { %4366 = vmatprep.subr.bf16.mxu1 %v6891_v17  ;;  %v6927_v44 = vld [vmem:[#allocation5 + $0x2bc] ss:$12 sps:$4 sm:$0xff]   ;;  %v6931_v49 = vld [vmem:[#allocation5 + $0x124] ss:$12 sps:$4 sm:$0xff]   ;;  %v6937_v54 = vld [vmem:[#allocation5 + $0x10c] ss:$12 sps:$4 sm:$0xff]  }
  0x85   :  { %v6933_v50 = vld [vmem:[#allocation5 + $0x2a4] ss:$12 sps:$4 sm:$0xff]   ;;  %v8043_v53 = vsub.s32 %v202_v45, %v8040_v46  ;;  %v6939_v55 = vld [vmem:[#allocation5 + $0x28c] ss:$12 sps:$4 sm:$0xff]   ;;  %v6941_v63 = vld [vmem:[#allocation5 + $0x108] ss:$12 sps:$4 sm:$0xff]  }
  0x86   :  { %4326 = vmatpush1.bf16.msra.mxu0 %v6893_v18  ;;  %v6961_v56 = vld [vmem:[#allocation2] ss:$48 sps:$4 sm:$0xff]   ;;  %v6965_v58 = vld [vmem:[#allocation2 + $0x4] ss:$48 sps:$4 sm:$0xff]   ;;  %v6949_v10 = vld [vmem:[#allocation5 + $0xdc] ss:$12 sps:$4 sm:$0xff]  }
  0x87   :  { %4367 = vmatpush1.bf16.msra.mxu1 %v6894_v19  ;;  %4327 = vmatprep.subr.bf16.mxu0 %v6895_v20  ;;  %v6963_v57 = vld [vmem:[#allocation2 + $0x60] ss:$48 sps:$4 sm:$0xff]   ;;  %v6966_v59 = vld [vmem:[#allocation2 + $0x64] ss:$48 sps:$4 sm:$0xff]   ;;  %v206_v60 = vrot.slane %v6961_v56, %v8043_v53  ;;  %v213_v62 = vrot.slane %v6965_v58, %v8043_v53  ;;  %v6951_v11 = vld [vmem:[#allocation5 + $0x25c] ss:$12 sps:$4 sm:$0xff]  }
  0x88   :  { %4368 = vmatprep.subr.bf16.mxu1 %v6897_v21  ;;  %v220_v61 = vrot.slane %v6963_v57, %v8043_v53  ;;  %v6942_v0 = vld [vmem:[#allocation5 + $0x288] ss:$12 sps:$4 sm:$0xff]   ;;  %v227_v1 = vrot.slane %v6966_v59, %v8043_v53  ;;  %v6947_v7 = vld [vmem:[#allocation5 + $0xf0] ss:$12 sps:$4 sm:$0xff]   ;;  %v6953_v12 = vld [vmem:[#allocation5 + $0xd8] ss:$12 sps:$4 sm:$0xff]  }
  0x89   :  { %v6943_v2 = vld [vmem:[#allocation5 + $0xf4] ss:$12 sps:$4 sm:$0xff]   ;;  %v6948_v8 = vld [vmem:[#allocation5 + $0x270] ss:$12 sps:$4 sm:$0xff]   ;;  %v6954_v13 = vld [vmem:[#allocation5 + $0x258] ss:$12 sps:$4 sm:$0xff]  }
  0x8a   :  { %4328 = vmatpush1.bf16.msra.mxu0 %v6899_v22  ;;  %v229_v3 = vcombine.high %v206_v60, %v220_v61  ;;  %v6945_v4 = vld [vmem:[#allocation5 + $0x274] ss:$12 sps:$4 sm:$0xff]   ;;  %v231_v5 = vcombine.high %v213_v62, %v227_v1  ;;  %v6955_v14 = vld [vmem:[#allocation5 + $0xc4] ss:$12 sps:$4 sm:$0xff]   ;;  %v228_v18 = vcombine.low %v206_v60, %v220_v61  ;;  %v230_v19 = vcombine.low %v213_v62, %v227_v1  ;;  %v6969_v20 = vld [vmem:[#allocation5 + $0x3ac] ss:$12 sps:$4 sm:$0xff]  }
  0x8b   :  { %4369 = vmatpush1.bf16.msra.mxu1 %v6900_v23  ;;  %4329 = vmatprep.subr.bf16.mxu0 %v6901_v24  ;;  %v6957_v15 = vld [vmem:[#allocation5 + $0x244] ss:$12 sps:$4 sm:$0xff]   ;;  %v6959_v16 = vld [vmem:[#allocation5 + $0xc0] ss:$12 sps:$4 sm:$0xff]   ;;  %v6967_v24 = vld [vmem:[#allocation5 + $0x3a8] ss:$12 sps:$4 sm:$0xff]  }
  0x8c   :  { %4370 = vmatprep.subr.bf16.mxu1 %v6903_v25  ;;  %v8049_v6 = vpack.c.bf16 %v229_v3, %v229_v3  ;;  %v8051_v9 = vpack.c.bf16 %v231_v5, %v231_v5  ;;  %v6960_v17 = vld [vmem:[#allocation5 + $0x240] ss:$12 sps:$4 sm:$0xff]   ;;  %v8055_v22 = vpack.c.bf16 %v228_v18, %v228_v18  ;;  %v8057_v23 = vpack.c.bf16 %v230_v19, %v230_v19  ;;  %v6970_v25 = vld [vmem:[#allocation5 + $0x528] ss:$12 sps:$4 sm:$0xff]   ;;  %v7000_v45 = vld [vmem:[#allocation5 + $0x4b0] ss:$12 sps:$4 sm:$0xff]  }
  0x8d   :  { %v6972_v21 = vld [vmem:[#allocation5 + $0x52c] ss:$12 sps:$4 sm:$0xff]   ;;  %v6991_v40 = vld [vmem:[#allocation5 + $0x348] ss:$12 sps:$4 sm:$0xff]   ;;  %v7035_v18 = vld [vmem:[#allocation5 + $0x424] ss:$12 sps:$4 sm:$0xff]  }
  0x8e   :  { %4330 = vmatpush1.bf16.msra.mxu0 %v6905_v26  ;;  %4349 = vmatprep.mubr.bf16.mxu0 %v8049_v6  ;;  %v6975_v26 = vld [vmem:[#allocation5 + $0x394] ss:$12 sps:$4 sm:$0xff]   ;;  %v6993_v38 = vld [vmem:[#allocation5 + $0x34c] ss:$12 sps:$4 sm:$0xff]   ;;  %v7038_v19 = vld [vmem:[#allocation5 + $0x5a4] ss:$12 sps:$4 sm:$0xff]  }
  0x8f   :  { %4371 = vmatpush1.bf16.msra.mxu1 %v6906_v27  ;;  %4331 = vmatprep.subr.bf16.mxu0 %v6907_v28  ;;  %v6978_v27 = vld [vmem:[#allocation5 + $0x514] ss:$12 sps:$4 sm:$0xff]   ;;  %v6973_v28 = vld [vmem:[#allocation5 + $0x390] ss:$12 sps:$4 sm:$0xff]   ;;  %v6996_v39 = vld [vmem:[#allocation5 + $0x4cc] ss:$12 sps:$4 sm:$0xff]  }
  0x90   :  { %4372 = vmatprep.subr.bf16.mxu1 %v6909_v29  ;;  %4390 = vmatprep.mubr.bf16.mxu1 %v8051_v9  ;;  %v6976_v29 = vld [vmem:[#allocation5 + $0x510] ss:$12 sps:$4 sm:$0xff]   ;;  %v7009_v58 = vld [vmem:[#allocation5 + $0x300] ss:$12 sps:$4 sm:$0xff]   ;;  %v7018_v5 = vld [vmem:[#allocation5 + $0x5e8] ss:$12 sps:$4 sm:$0xff]  }
  0x91   :  { %v7067_v56 = vld [vmem:[#allocation2 + $0xc] ss:$48 sps:$4 sm:$0xff]  }
  0x92   :  { %4332 = vmatpush1.bf16.msra.mxu0 %v6911_v30  ;;  %v6981_v30 = vld [vmem:[#allocation5 + $0x37c] ss:$12 sps:$4 sm:$0xff]   ;;  %v7012_v59 = vld [vmem:[#allocation5 + $0x480] ss:$12 sps:$4 sm:$0xff]  }
  0x93   :  { %4373 = vmatpush1.bf16.msra.mxu1 %v6912_v31  ;;  %4333 = vmatprep.subr.bf16.mxu0 %v6913_v32  ;;  %v6984_v31 = vld [vmem:[#allocation5 + $0x4fc] ss:$12 sps:$4 sm:$0xff]   ;;  %v6979_v32 = vld [vmem:[#allocation5 + $0x378] ss:$12 sps:$4 sm:$0xff]  }
  0x94   :  { %4374 = vmatprep.subr.bf16.mxu1 %v6915_v33  ;;  %v6982_v33 = vld [vmem:[#allocation5 + $0x4f8] ss:$12 sps:$4 sm:$0xff]   ;;  %v7068_v57 = vld [vmem:[#allocation2 + $0x6c] ss:$48 sps:$4 sm:$0xff]  }
  0x95   :  { %v7017_v62 = vld [vmem:[#allocation5 + $0x46c] ss:$12 sps:$4 sm:$0xff]  }
  0x96   :  { %4334 = vmatpush2.bf16.msra.mxu0 %v6917_v34  ;;  %v6987_v34 = vld [vmem:[#allocation5 + $0x364] ss:$12 sps:$4 sm:$0xff]   ;;  %v7020_v1 = vld [vmem:[#allocation5 + $0x5ec] ss:$12 sps:$4 sm:$0xff]  }
  0x97   :  { %4375 = vmatpush2.bf16.msra.mxu1 %v6918_v35  ;;  %4335 = vmatprep.subr.bf16.mxu0 %v6919_v36  ;;  %v6990_v35 = vld [vmem:[#allocation5 + $0x4e4] ss:$12 sps:$4 sm:$0xff]   ;;  %v6985_v36 = vld [vmem:[#allocation5 + $0x360] ss:$12 sps:$4 sm:$0xff]  }
  0x98   :  { %4376 = vmatprep.subr.bf16.mxu1 %v6921_v37  ;;  %v6988_v37 = vld [vmem:[#allocation5 + $0x4e0] ss:$12 sps:$4 sm:$0xff]  }
  0x9a   :  { %4336 = vmatpush2.bf16.msra.mxu0 %v6923_v41  ;;  %v6994_v41 = vld [vmem:[#allocation5 + $0x4c8] ss:$12 sps:$4 sm:$0xff]  }
  0x9b   :  { %4377 = vmatpush2.bf16.msra.mxu1 %v6924_v42  ;;  %4337 = vmatprep.subr.bf16.mxu0 %v6925_v43  ;;  %v6999_v42 = vld [vmem:[#allocation5 + $0x334] ss:$12 sps:$4 sm:$0xff]  }
  0x9c   :  { %4378 = vmatprep.subr.bf16.mxu1 %v6927_v44  ;;  %v7002_v43 = vld [vmem:[#allocation5 + $0x4b4] ss:$12 sps:$4 sm:$0xff]   ;;  %v6997_v44 = vld [vmem:[#allocation5 + $0x330] ss:$12 sps:$4 sm:$0xff]  }
  0x9e   :  { %4338 = vmatpush2.bf16.msra.mxu0 %v6929_v47  ;;  %v7005_v47 = vld [vmem:[#allocation5 + $0x31c] ss:$12 sps:$4 sm:$0xff]  }
  0x9f   :  { %4379 = vmatpush2.bf16.msra.mxu1 %v6930_v48  ;;  %4339 = vmatprep.subr.bf16.mxu0 %v6931_v49  ;;  %v7008_v48 = vld [vmem:[#allocation5 + $0x49c] ss:$12 sps:$4 sm:$0xff]   ;;  %v7003_v49 = vld [vmem:[#allocation5 + $0x318] ss:$12 sps:$4 sm:$0xff]  }
  0xa0   :  { %4380 = vmatprep.subr.bf16.mxu1 %v6933_v50  ;;  %v7006_v50 = vld [vmem:[#allocation5 + $0x498] ss:$12 sps:$4 sm:$0xff]  }
  0xa2   :  { %4340 = vmatpush2.bf16.msra.mxu0 %v6935_v51  ;;  %v7011_v51 = vld [vmem:[#allocation5 + $0x304] ss:$12 sps:$4 sm:$0xff]  }
  0xa3   :  { %4381 = vmatpush2.bf16.msra.mxu1 %v6936_v52  ;;  %4341 = vmatprep.subr.bf16.mxu0 %v6937_v54  ;;  %v7014_v52 = vld [vmem:[#allocation5 + $0x484] ss:$12 sps:$4 sm:$0xff]   ;;  %v7063_v54 = vld [vmem:[#allocation2 + $0x8] ss:$48 sps:$4 sm:$0xff]  }
  0xa4   :  { %4382 = vmatprep.subr.bf16.mxu1 %v6939_v55  ;;  %v7065_v55 = vld [vmem:[#allocation2 + $0x68] ss:$48 sps:$4 sm:$0xff]   ;;  %v8062_v60 = vrot.slane %v7063_v54, %v8043_v53 }
  0xa5   :  { %v8065_v61 = vrot.slane %v7065_v55, %v8043_v53  ;;  %v7083_v54 = vld [vmem:[#allocation5 + $0x67c] ss:$12 sps:$4 sm:$0xff]  }
  0xa6   :  { %4342 = vmatpush2.bf16.msra.mxu0 %v6941_v63  ;;  %v8068_v63 = vrot.slane %v7067_v56, %v8043_v53  ;;  %v7086_v55 = vld [vmem:[#allocation5 + $0x7fc] ss:$12 sps:$4 sm:$0xff]   ;;  %v7081_v56 = vld [vmem:[#allocation5 + $0x678] ss:$12 sps:$4 sm:$0xff]  }
  0xa7   :  { %4383 = vmatpush2.bf16.msra.mxu1 %v6942_v0  ;;  %4343 = vmatprep.subr.bf16.mxu0 %v6943_v2  ;;  %v8071_v0 = vrot.slane %v7068_v57, %v8043_v53  ;;  %v265_v2 = vcombine.high %v8062_v60, %v8065_v61  ;;  %v7084_v57 = vld [vmem:[#allocation5 + $0x7f8] ss:$12 sps:$4 sm:$0xff]  }
  0xa8   :  { %4384 = vmatprep.subr.bf16.mxu1 %v6945_v4  ;;  %v7015_v4 = vld [vmem:[#allocation5 + $0x468] ss:$12 sps:$4 sm:$0xff]  }
  0xa9   :  { %v267_v3 = vcombine.high %v8068_v63, %v8071_v0 }
  0xaa   :  { %4344 = vmatpush2.bf16.msra.mxu0 %v6947_v7  ;;  %v8077_v7 = vpack.c.bf16 %v265_v2, %v265_v2 }
  0xab   :  { %4385 = vmatpush2.bf16.msra.mxu1 %v6948_v8  ;;  %4345 = vmatprep.subr.bf16.mxu0 %v6949_v10  ;;  %v7023_v8 = vld [vmem:[#allocation5 + $0x454] ss:$12 sps:$4 sm:$0xff]   ;;  %v8079_v10 = vpack.c.bf16 %v267_v3, %v267_v3 }
  0xac   :  { %4386 = vmatprep.subr.bf16.mxu1 %v6951_v11  ;;  %v7026_v11 = vld [vmem:[#allocation5 + $0x5d4] ss:$12 sps:$4 sm:$0xff]  }
  0xae   :  { %4346 = vmatpush2.bf16.msra.mxu0 %v6953_v12  ;;  %v7021_v12 = vld [vmem:[#allocation5 + $0x450] ss:$12 sps:$4 sm:$0xff]  }
  0xaf   :  { %4387 = vmatpush2.bf16.msra.mxu1 %v6954_v13  ;;  %4347 = vmatprep.subr.bf16.mxu0 %v6955_v14  ;;  %v7024_v13 = vld [vmem:[#allocation5 + $0x5d0] ss:$12 sps:$4 sm:$0xff]  }
  0xb0   :  { %4388 = vmatprep.subr.bf16.mxu1 %v6957_v15  ;;  %v7029_v14 = vld [vmem:[#allocation5 + $0x43c] ss:$12 sps:$4 sm:$0xff]  }
  0xb1   :  { %v7032_v15 = vld [vmem:[#allocation5 + $0x5bc] ss:$12 sps:$4 sm:$0xff]  }
  0xb2   :  { %4348 = vmatpush2.bf16.msra.mxu0 %v6959_v16  ;;  %v7027_v16 = vld [vmem:[#allocation5 + $0x438] ss:$12 sps:$4 sm:$0xff]  }
  0xb3   :  { %4389 = vmatpush2.bf16.msra.mxu1 %v6960_v17  ;;  %4399 = vmatprep.subr.bf16.mxu0 %v6969_v20  ;;  %v7030_v17 = vld [vmem:[#allocation5 + $0x5b8] ss:$12 sps:$4 sm:$0xff]   ;;  %v7033_v20 = vld [vmem:[#allocation5 + $0x420] ss:$12 sps:$4 sm:$0xff]  }
  0xb4   :  { %4440 = vmatprep.subr.bf16.mxu1 %v6972_v21  ;;  %v7036_v21 = vld [vmem:[#allocation5 + $0x5a0] ss:$12 sps:$4 sm:$0xff]  }
  0xb5   :  { %4350 = vmatmul.mubr.bf16.vlgmr.msra.gmra.mxu0 %v8055_v22 }
  0xb6   :  { %4391 = vmatmul.mubr.bf16.vlgmr.msra.gmra.mxu1 %v8057_v23  ;;  %4400 = vmatpush1.bf16.msra.mxu0 %v6967_v24  ;;  %v7041_v24 = vld [vmem:[#allocation5 + $0x40c] ss:$12 sps:$4 sm:$0xff]  }
  0xb7   :  { %4441 = vmatpush1.bf16.msra.mxu1 %v6970_v25  ;;  %4401 = vmatprep.subr.bf16.mxu0 %v6975_v26  ;;  %v7044_v25 = vld [vmem:[#allocation5 + $0x58c] ss:$12 sps:$4 sm:$0xff]   ;;  %v7039_v26 = vld [vmem:[#allocation5 + $0x408] ss:$12 sps:$4 sm:$0xff]  }
  0xb8   :  { %4442 = vmatprep.subr.bf16.mxu1 %v6978_v27  ;;  %4431 = vmatprep.mubr.bf16.mxu0 %v8077_v7  ;;  %v7042_v27 = vld [vmem:[#allocation5 + $0x588] ss:$12 sps:$4 sm:$0xff]  }
  0xb9   :  { %4472 = vmatprep.mubr.bf16.mxu1 %v8079_v10 }
  0xba   :  { %4402 = vmatpush1.bf16.msra.mxu0 %v6973_v28  ;;  %v7047_v28 = vld [vmem:[#allocation5 + $0x3f4] ss:$12 sps:$4 sm:$0xff]  }
  0xbb   :  { %4443 = vmatpush1.bf16.msra.mxu1 %v6976_v29  ;;  %4403 = vmatprep.subr.bf16.mxu0 %v6981_v30  ;;  %v7050_v29 = vld [vmem:[#allocation5 + $0x574] ss:$12 sps:$4 sm:$0xff]   ;;  %v7045_v30 = vld [vmem:[#allocation5 + $0x3f0] ss:$12 sps:$4 sm:$0xff]  }
  0xbc   :  { %4444 = vmatprep.subr.bf16.mxu1 %v6984_v31  ;;  %v7048_v31 = vld [vmem:[#allocation5 + $0x570] ss:$12 sps:$4 sm:$0xff]  }
  0xbe   :  { %4404 = vmatpush1.bf16.msra.mxu0 %v6979_v32  ;;  %v7053_v32 = vld [vmem:[#allocation5 + $0x3dc] ss:$12 sps:$4 sm:$0xff]  }
  0xbf   :  { %4445 = vmatpush1.bf16.msra.mxu1 %v6982_v33  ;;  %4405 = vmatprep.subr.bf16.mxu0 %v6987_v34  ;;  %v7056_v33 = vld [vmem:[#allocation5 + $0x55c] ss:$12 sps:$4 sm:$0xff]   ;;  %v7051_v34 = vld [vmem:[#allocation5 + $0x3d8] ss:$12 sps:$4 sm:$0xff]  }
  0xc0   :  { %4446 = vmatprep.subr.bf16.mxu1 %v6990_v35  ;;  %v7054_v35 = vld [vmem:[#allocation5 + $0x558] ss:$12 sps:$4 sm:$0xff]  }
  0xc2   :  { %4406 = vmatpush1.bf16.msra.mxu0 %v6985_v36  ;;  %v7059_v36 = vld [vmem:[#allocation5 + $0x3c4] ss:$12 sps:$4 sm:$0xff]  }
  0xc3   :  { %4447 = vmatpush1.bf16.msra.mxu1 %v6988_v37  ;;  %4407 = vmatprep.subr.bf16.mxu0 %v6993_v38  ;;  %v7062_v37 = vld [vmem:[#allocation5 + $0x544] ss:$12 sps:$4 sm:$0xff]   ;;  %v7057_v38 = vld [vmem:[#allocation5 + $0x3c0] ss:$12 sps:$4 sm:$0xff]  }
  0xc4   :  { %4448 = vmatprep.subr.bf16.mxu1 %v6996_v39  ;;  %v7060_v39 = vld [vmem:[#allocation5 + $0x540] ss:$12 sps:$4 sm:$0xff]  }
  0xc6   :  { %4408 = vmatpush1.bf16.msra.mxu0 %v6991_v40  ;;  %v264_v40 = vcombine.low %v8062_v60, %v8065_v61  ;;  %v7169_v60 = vld [vmem:[#allocation2 + $0x14] ss:$48 sps:$4 sm:$0xff]  }
  0xc7   :  { %4449 = vmatpush1.bf16.msra.mxu1 %v6994_v41  ;;  %4409 = vmatprep.subr.bf16.mxu0 %v6999_v42  ;;  %v266_v41 = vcombine.low %v8068_v63, %v8071_v0  ;;  %v7071_v42 = vld [vmem:[#allocation5 + $0x6ac] ss:$12 sps:$4 sm:$0xff]   ;;  %v7170_v61 = vld [vmem:[#allocation2 + $0x74] ss:$48 sps:$4 sm:$0xff]   ;;  %v8100_v2 = vrot.slane %v7169_v60, %v8043_v53  ;;  %v7155_v60 = vld [vmem:[#allocation5 + $0x6dc] ss:$12 sps:$4 sm:$0xff]  }
  0xc8   :  { %4450 = vmatprep.subr.bf16.mxu1 %v7002_v43  ;;  %v7074_v43 = vld [vmem:[#allocation5 + $0x82c] ss:$12 sps:$4 sm:$0xff]   ;;  %v7092_v0 = vld [vmem:[#allocation5 + $0x7e4] ss:$12 sps:$4 sm:$0xff]   ;;  %v8103_v3 = vrot.slane %v7170_v61, %v8043_v53  ;;  %v7158_v61 = vld [vmem:[#allocation5 + $0x85c] ss:$12 sps:$4 sm:$0xff]  }
  0xca   :  { %4410 = vmatpush1.bf16.msra.mxu0 %v6997_v44  ;;  %v8087_v44 = vpack.c.bf16 %v264_v40, %v264_v40  ;;  %v7131_v40 = vld [vmem:[#allocation5 + $0x73c] ss:$12 sps:$4 sm:$0xff]  }
  0xcb   :  { %4451 = vmatpush1.bf16.msra.mxu1 %v7000_v45  ;;  %4411 = vmatprep.subr.bf16.mxu0 %v7005_v47  ;;  %v8089_v45 = vpack.c.bf16 %v266_v41, %v266_v41  ;;  %v7069_v47 = vld [vmem:[#allocation5 + $0x6a8] ss:$12 sps:$4 sm:$0xff]  }
  0xcc   :  { %4452 = vmatprep.subr.bf16.mxu1 %v7008_v48  ;;  %v7072_v48 = vld [vmem:[#allocation5 + $0x828] ss:$12 sps:$4 sm:$0xff]  }
  0xcd   :  { %v7134_v41 = vld [vmem:[#allocation5 + $0x8bc] ss:$12 sps:$4 sm:$0xff]  }
  0xce   :  { %4412 = vmatpush1.bf16.msra.mxu0 %v7003_v49  ;;  %v7077_v49 = vld [vmem:[#allocation5 + $0x694] ss:$12 sps:$4 sm:$0xff]  }
  0xcf   :  { %4453 = vmatpush1.bf16.msra.mxu1 %v7006_v50  ;;  %4413 = vmatprep.subr.bf16.mxu0 %v7011_v51  ;;  %v7080_v50 = vld [vmem:[#allocation5 + $0x814] ss:$12 sps:$4 sm:$0xff]   ;;  %v7075_v51 = vld [vmem:[#allocation5 + $0x690] ss:$12 sps:$4 sm:$0xff]  }
  0xd0   :  { %4454 = vmatprep.subr.bf16.mxu1 %v7014_v52  ;;  %v7078_v52 = vld [vmem:[#allocation5 + $0x810] ss:$12 sps:$4 sm:$0xff]  }
  0xd2   :  { %4414 = vmatpush1.bf16.msra.mxu0 %v7009_v58  ;;  %v7165_v58 = vld [vmem:[#allocation2 + $0x10] ss:$48 sps:$4 sm:$0xff]  }
  0xd3   :  { %4455 = vmatpush1.bf16.msra.mxu1 %v7012_v59  ;;  %4415 = vmatprep.subr.bf16.mxu0 %v7017_v62  ;;  %v7167_v59 = vld [vmem:[#allocation2 + $0x70] ss:$48 sps:$4 sm:$0xff]   ;;  %v8094_v63 = vrot.slane %v7165_v58, %v8043_v53 }
  0xd4   :  { %4456 = vmatprep.subr.bf16.mxu1 %v7020_v1  ;;  %v7089_v62 = vld [vmem:[#allocation5 + $0x664] ss:$12 sps:$4 sm:$0xff]   ;;  %v8097_v1 = vrot.slane %v7167_v59, %v8043_v53 }
  0xd5   :  { %v7147_v58 = vld [vmem:[#allocation5 + $0x6f0] ss:$12 sps:$4 sm:$0xff]  }
  0xd6   :  { %4416 = vmatpush2.bf16.msra.mxu0 %v7015_v4  ;;  %v7087_v4 = vld [vmem:[#allocation5 + $0x660] ss:$12 sps:$4 sm:$0xff]   ;;  %v7150_v59 = vld [vmem:[#allocation5 + $0x870] ss:$12 sps:$4 sm:$0xff]  }
  0xd7   :  { %4457 = vmatpush2.bf16.msra.mxu1 %v7018_v5  ;;  %4417 = vmatprep.subr.bf16.mxu0 %v7023_v8  ;;  %v7090_v5 = vld [vmem:[#allocation5 + $0x7e0] ss:$12 sps:$4 sm:$0xff]   ;;  %v301_v8 = vcombine.high %v8094_v63, %v8097_v1 }
  0xd8   :  { %4458 = vmatprep.subr.bf16.mxu1 %v7026_v11  ;;  %v303_v11 = vcombine.high %v8100_v2, %v8103_v3 }
  0xda   :  { %4418 = vmatpush2.bf16.msra.mxu0 %v7021_v12  ;;  %v7095_v12 = vld [vmem:[#allocation5 + $0x64c] ss:$12 sps:$4 sm:$0xff]  }
  0xdb   :  { %4459 = vmatpush2.bf16.msra.mxu1 %v7024_v13  ;;  %4419 = vmatprep.subr.bf16.mxu0 %v7029_v14  ;;  %v7098_v13 = vld [vmem:[#allocation5 + $0x7cc] ss:$12 sps:$4 sm:$0xff]   ;;  %v8109_v14 = vpack.c.bf16 %v301_v8, %v301_v8 }
  0xdc   :  { %4460 = vmatprep.subr.bf16.mxu1 %v7032_v15  ;;  %v8111_v15 = vpack.c.bf16 %v303_v11, %v303_v11  ;;  %v7153_v8 = vld [vmem:[#allocation5 + $0x6d8] ss:$12 sps:$4 sm:$0xff]  }
  0xdd   :  { %v7156_v11 = vld [vmem:[#allocation5 + $0x858] ss:$12 sps:$4 sm:$0xff]  }
  0xde   :  { %4420 = vmatpush2.bf16.msra.mxu0 %v7027_v16  ;;  %v7093_v16 = vld [vmem:[#allocation5 + $0x648] ss:$12 sps:$4 sm:$0xff]  }
  0xdf   :  { %4461 = vmatpush2.bf16.msra.mxu1 %v7030_v17  ;;  %4421 = vmatprep.subr.bf16.mxu0 %v7035_v18  ;;  %v7096_v17 = vld [vmem:[#allocation5 + $0x7c8] ss:$12 sps:$4 sm:$0xff]  }
  0xe0   :  { %4462 = vmatprep.subr.bf16.mxu1 %v7038_v19  ;;  %v7101_v18 = vld [vmem:[#allocation5 + $0x634] ss:$12 sps:$4 sm:$0xff]  }
  0xe1   :  { %v7104_v19 = vld [vmem:[#allocation5 + $0x7b4] ss:$12 sps:$4 sm:$0xff]  }
  0xe2   :  { %4422 = vmatpush2.bf16.msra.mxu0 %v7033_v20  ;;  %v7099_v20 = vld [vmem:[#allocation5 + $0x630] ss:$12 sps:$4 sm:$0xff]  }
  0xe3   :  { %4463 = vmatpush2.bf16.msra.mxu1 %v7036_v21  ;;  %4423 = vmatprep.subr.bf16.mxu0 %v7041_v24  ;;  %v7102_v21 = vld [vmem:[#allocation5 + $0x7b0] ss:$12 sps:$4 sm:$0xff]  }
  0xe4   :  { %4464 = vmatprep.subr.bf16.mxu1 %v7044_v25  ;;  %v7107_v24 = vld [vmem:[#allocation5 + $0x61c] ss:$12 sps:$4 sm:$0xff]  }
  0xe5   :  { %v7110_v25 = vld [vmem:[#allocation5 + $0x79c] ss:$12 sps:$4 sm:$0xff]  }
  0xe6   :  { %4424 = vmatpush2.bf16.msra.mxu0 %v7039_v26  ;;  %v7105_v26 = vld [vmem:[#allocation5 + $0x618] ss:$12 sps:$4 sm:$0xff]  }
  0xe7   :  { %4465 = vmatpush2.bf16.msra.mxu1 %v7042_v27  ;;  %4425 = vmatprep.subr.bf16.mxu0 %v7047_v28  ;;  %v7108_v27 = vld [vmem:[#allocation5 + $0x798] ss:$12 sps:$4 sm:$0xff]  }
  0xe8   :  { %4466 = vmatprep.subr.bf16.mxu1 %v7050_v29  ;;  %v7113_v28 = vld [vmem:[#allocation5 + $0x604] ss:$12 sps:$4 sm:$0xff]  }
  0xe9   :  { %v7116_v29 = vld [vmem:[#allocation5 + $0x784] ss:$12 sps:$4 sm:$0xff]  }
  0xea   :  { %4426 = vmatpush2.bf16.msra.mxu0 %v7045_v30  ;;  %v7111_v30 = vld [vmem:[#allocation5 + $0x600] ss:$12 sps:$4 sm:$0xff]  }
  0xeb   :  { %4467 = vmatpush2.bf16.msra.mxu1 %v7048_v31  ;;  %4427 = vmatprep.subr.bf16.mxu0 %v7053_v32  ;;  %v7114_v31 = vld [vmem:[#allocation5 + $0x780] ss:$12 sps:$4 sm:$0xff]  }
  0xec   :  { %4468 = vmatprep.subr.bf16.mxu1 %v7056_v33  ;;  %v7119_v32 = vld [vmem:[#allocation5 + $0x76c] ss:$12 sps:$4 sm:$0xff]  }
  0xed   :  { %v7122_v33 = vld [vmem:[#allocation5 + $0x8ec] ss:$12 sps:$4 sm:$0xff]  }
  0xee   :  { %4428 = vmatpush2.bf16.msra.mxu0 %v7051_v34  ;;  %v7117_v34 = vld [vmem:[#allocation5 + $0x768] ss:$12 sps:$4 sm:$0xff]  }
  0xef   :  { %4469 = vmatpush2.bf16.msra.mxu1 %v7054_v35  ;;  %4429 = vmatprep.subr.bf16.mxu0 %v7059_v36  ;;  %v7120_v35 = vld [vmem:[#allocation5 + $0x8e8] ss:$12 sps:$4 sm:$0xff]  }
  0xf0   :  { %4470 = vmatprep.subr.bf16.mxu1 %v7062_v37  ;;  %v7125_v36 = vld [vmem:[#allocation5 + $0x754] ss:$12 sps:$4 sm:$0xff]  }
  0xf1   :  { %v7128_v37 = vld [vmem:[#allocation5 + $0x8d4] ss:$12 sps:$4 sm:$0xff]  }
  0xf2   :  { %4430 = vmatpush2.bf16.msra.mxu0 %v7057_v38  ;;  %v7123_v38 = vld [vmem:[#allocation5 + $0x750] ss:$12 sps:$4 sm:$0xff]  }
  0xf3   :  { %4471 = vmatpush2.bf16.msra.mxu1 %v7060_v39  ;;  %4481 = vmatprep.subr.bf16.mxu0 %v7071_v42  ;;  %v7126_v39 = vld [vmem:[#allocation5 + $0x8d0] ss:$12 sps:$4 sm:$0xff]   ;;  %v7129_v42 = vld [vmem:[#allocation5 + $0x738] ss:$12 sps:$4 sm:$0xff]  }
  0xf4   :  { %4522 = vmatprep.subr.bf16.mxu1 %v7074_v43  ;;  %v7132_v43 = vld [vmem:[#allocation5 + $0x8b8] ss:$12 sps:$4 sm:$0xff]  }
  0xf5   :  { %4432 = vmatmul.mubr.bf16.vlgmr.msra.gmra.mxu0 %v8087_v44 }
  0xf6   :  { %4473 = vmatmul.mubr.bf16.vlgmr.msra.gmra.mxu1 %v8089_v45  ;;  %4482 = vmatpush1.bf16.msra.mxu0 %v7069_v47  ;;  %v7137_v47 = vld [vmem:[#allocation5 + $0x724] ss:$12 sps:$4 sm:$0xff]  }
  0xf7   :  { %4523 = vmatpush1.bf16.msra.mxu1 %v7072_v48  ;;  %4483 = vmatprep.subr.bf16.mxu0 %v7077_v49  ;;  %v7140_v48 = vld [vmem:[#allocation5 + $0x8a4] ss:$12 sps:$4 sm:$0xff]   ;;  %v7135_v49 = vld [vmem:[#allocation5 + $0x720] ss:$12 sps:$4 sm:$0xff]  }
  0xf8   :  { %4524 = vmatprep.subr.bf16.mxu1 %v7080_v50  ;;  %4513 = vmatprep.mubr.bf16.mxu0 %v8109_v14  ;;  %v7138_v50 = vld [vmem:[#allocation5 + $0x8a0] ss:$12 sps:$4 sm:$0xff]  }
  0xf9   :  { %4554 = vmatprep.mubr.bf16.mxu1 %v8111_v15 }
  0xfa   :  { %4484 = vmatpush1.bf16.msra.mxu0 %v7075_v51  ;;  %v7143_v51 = vld [vmem:[#allocation5 + $0x70c] ss:$12 sps:$4 sm:$0xff]  }
  0xfb   :  { %4525 = vmatpush1.bf16.msra.mxu1 %v7078_v52  ;;  %4485 = vmatprep.subr.bf16.mxu0 %v7083_v54  ;;  %v7146_v52 = vld [vmem:[#allocation5 + $0x88c] ss:$12 sps:$4 sm:$0xff]   ;;  %v7141_v54 = vld [vmem:[#allocation5 + $0x708] ss:$12 sps:$4 sm:$0xff]  }
  0xfc   :  { %4526 = vmatprep.subr.bf16.mxu1 %v7086_v55  ;;  %v7144_v55 = vld [vmem:[#allocation5 + $0x888] ss:$12 sps:$4 sm:$0xff]  }
  0xfe   :  { %4486 = vmatpush1.bf16.msra.mxu0 %v7081_v56  ;;  %v7149_v56 = vld [vmem:[#allocation5 + $0x6f4] ss:$12 sps:$4 sm:$0xff]  }
  0xff   :  { %4527 = vmatpush1.bf16.msra.mxu1 %v7084_v57  ;;  %4487 = vmatprep.subr.bf16.mxu0 %v7089_v62  ;;  %v7152_v57 = vld [vmem:[#allocation5 + $0x874] ss:$12 sps:$4 sm:$0xff]   ;;  %v7267_v62 = vld [vmem:[#allocation2 + $0x18] ss:$48 sps:$4 sm:$0xff]  }
 0x100   :  { %4528 = vmatprep.subr.bf16.mxu1 %v7092_v0  ;;  %v7269_v0 = vld [vmem:[#allocation2 + $0x78] ss:$48 sps:$4 sm:$0xff]  }
 0x102   :  { %4488 = vmatpush1.bf16.msra.mxu0 %v7087_v4  ;;  %v7271_v4 = vld [vmem:[#allocation2 + $0x1c] ss:$48 sps:$4 sm:$0xff]  }
 0x103   :  { %4529 = vmatpush1.bf16.msra.mxu1 %v7090_v5  ;;  %4489 = vmatprep.subr.bf16.mxu0 %v7095_v12  ;;  %v7272_v5 = vld [vmem:[#allocation2 + $0x7c] ss:$48 sps:$4 sm:$0xff]   ;;  %v7161_v12 = vld [vmem:[#allocation5 + $0x6c4] ss:$12 sps:$4 sm:$0xff]  }
 0x104   :  { %4530 = vmatprep.subr.bf16.mxu1 %v7098_v13  ;;  %v7164_v13 = vld [vmem:[#allocation5 + $0x844] ss:$12 sps:$4 sm:$0xff]  }
 0x106   :  { %4490 = vmatpush1.bf16.msra.mxu0 %v7093_v16  ;;  %v8116_v16 = vrot.slane %v7267_v62, %v8043_v53  ;;  %v7213_v62 = vld [vmem:[#allocation5 + $0x900] ss:$12 sps:$4 sm:$0xff]  }
 0x107   :  { %4531 = vmatpush1.bf16.msra.mxu1 %v7096_v17  ;;  %4491 = vmatprep.subr.bf16.mxu0 %v7101_v18  ;;  %v8119_v17 = vrot.slane %v7269_v0, %v8043_v53  ;;  %v8122_v18 = vrot.slane %v7271_v4, %v8043_v53  ;;  %v7216_v0 = vld [vmem:[#allocation5 + $0xa80] ss:$12 sps:$4 sm:$0xff]  }
 0x108   :  { %4532 = vmatprep.subr.bf16.mxu1 %v7104_v19  ;;  %v8125_v19 = vrot.slane %v7272_v5, %v8043_v53  ;;  %v7221_v4 = vld [vmem:[#allocation5 + $0xa6c] ss:$12 sps:$4 sm:$0xff]  }
 0x109   :  { %v7224_v5 = vld [vmem:[#allocation5 + $0xbec] ss:$12 sps:$4 sm:$0xff]  }
 0x10a   :  { %4492 = vmatpush1.bf16.msra.mxu0 %v7099_v20  ;;  %v7159_v20 = vld [vmem:[#allocation5 + $0x6c0] ss:$12 sps:$4 sm:$0xff]  }
 0x10b   :  { %4533 = vmatpush1.bf16.msra.mxu1 %v7102_v21  ;;  %4493 = vmatprep.subr.bf16.mxu0 %v7107_v24  ;;  %v300_v21 = vcombine.low %v8094_v63, %v8097_v1  ;;  %v302_v24 = vcombine.low %v8100_v2, %v8103_v3  ;;  %v7171_v63 = vld [vmem:[#allocation5 + $0x9a8] ss:$12 sps:$4 sm:$0xff]  }
 0x10c   :  { %4534 = vmatprep.subr.bf16.mxu1 %v7110_v25  ;;  %v7162_v25 = vld [vmem:[#allocation5 + $0x840] ss:$12 sps:$4 sm:$0xff]   ;;  %v7174_v1 = vld [vmem:[#allocation5 + $0xb28] ss:$12 sps:$4 sm:$0xff]  }
 0x10d   :  { %v7179_v2 = vld [vmem:[#allocation5 + $0x994] ss:$12 sps:$4 sm:$0xff]  }
 0x10e   :  { %4494 = vmatpush1.bf16.msra.mxu0 %v7105_v26  ;;  %v7173_v26 = vld [vmem:[#allocation5 + $0x9ac] ss:$12 sps:$4 sm:$0xff]   ;;  %v7182_v3 = vld [vmem:[#allocation5 + $0xb14] ss:$12 sps:$4 sm:$0xff]  }
 0x10f   :  { %4535 = vmatpush1.bf16.msra.mxu1 %v7108_v27  ;;  %4495 = vmatprep.subr.bf16.mxu0 %v7113_v28  ;;  %v7176_v27 = vld [vmem:[#allocation5 + $0xb2c] ss:$12 sps:$4 sm:$0xff]   ;;  %v337_v28 = vcombine.high %v8116_v16, %v8119_v17 }
 0x110   :  { %4536 = vmatprep.subr.bf16.mxu1 %v7116_v29  ;;  %v339_v29 = vcombine.high %v8122_v18, %v8125_v19 }
 0x112   :  { %4496 = vmatpush1.bf16.msra.mxu0 %v7111_v30  ;;  %v8135_v30 = vpack.c.bf16 %v300_v21, %v300_v21  ;;  %v7228_v21 = vld [vmem:[#allocation5 + $0xbd0] ss:$12 sps:$4 sm:$0xff]  }
 0x113   :  { %4537 = vmatpush1.bf16.msra.mxu1 %v7114_v31  ;;  %4497 = vmatprep.subr.bf16.mxu0 %v7119_v32  ;;  %v8137_v31 = vpack.c.bf16 %v302_v24, %v302_v24  ;;  %v8139_v32 = vpack.c.bf16 %v337_v28, %v337_v28  ;;  %v7233_v24 = vld [vmem:[#allocation5 + $0xa3c] ss:$12 sps:$4 sm:$0xff]   ;;  %v7239_v28 = vld [vmem:[#allocation5 + $0xa24] ss:$12 sps:$4 sm:$0xff]  }
 0x114   :  { %4538 = vmatprep.subr.bf16.mxu1 %v7122_v33  ;;  %v8141_v33 = vpack.c.bf16 %v339_v29, %v339_v29  ;;  %v7242_v29 = vld [vmem:[#allocation5 + $0xba4] ss:$12 sps:$4 sm:$0xff]  }
 0x116   :  { %4498 = vmatpush2.bf16.msra.mxu0 %v7117_v34  ;;  %v7177_v34 = vld [vmem:[#allocation5 + $0x990] ss:$12 sps:$4 sm:$0xff]  }
 0x117   :  { %4539 = vmatpush2.bf16.msra.mxu1 %v7120_v35  ;;  %4499 = vmatprep.subr.bf16.mxu0 %v7125_v36  ;;  %v7180_v35 = vld [vmem:[#allocation5 + $0xb10] ss:$12 sps:$4 sm:$0xff]  }
 0x118   :  { %4540 = vmatprep.subr.bf16.mxu1 %v7128_v37  ;;  %v7185_v36 = vld [vmem:[#allocation5 + $0x97c] ss:$12 sps:$4 sm:$0xff]  }
 0x119   :  { %v7188_v37 = vld [vmem:[#allocation5 + $0xafc] ss:$12 sps:$4 sm:$0xff]  }
 0x11a   :  { %4500 = vmatpush2.bf16.msra.mxu0 %v7123_v38  ;;  %v7183_v38 = vld [vmem:[#allocation5 + $0x978] ss:$12 sps:$4 sm:$0xff]  }
 0x11b   :  { %4541 = vmatpush2.bf16.msra.mxu1 %v7126_v39  ;;  %4501 = vmatprep.subr.bf16.mxu0 %v7131_v40  ;;  %v7186_v39 = vld [vmem:[#allocation5 + $0xaf8] ss:$12 sps:$4 sm:$0xff]  }
 0x11c   :  { %4542 = vmatprep.subr.bf16.mxu1 %v7134_v41  ;;  %v7191_v40 = vld [vmem:[#allocation5 + $0x964] ss:$12 sps:$4 sm:$0xff]  }
 0x11d   :  { %v7194_v41 = vld [vmem:[#allocation5 + $0xae4] ss:$12 sps:$4 sm:$0xff]  }
 0x11e   :  { %4502 = vmatpush2.bf16.msra.mxu0 %v7129_v42  ;;  %v7189_v42 = vld [vmem:[#allocation5 + $0x960] ss:$12 sps:$4 sm:$0xff]  }
 0x11f   :  { %4543 = vmatpush2.bf16.msra.mxu1 %v7132_v43  ;;  %4503 = vmatprep.subr.bf16.mxu0 %v7137_v47  ;;  %v7192_v43 = vld [vmem:[#allocation5 + $0xae0] ss:$12 sps:$4 sm:$0xff]  }
 0x120   :  { %4544 = vmatprep.subr.bf16.mxu1 %v7140_v48  ;;  %v7197_v47 = vld [vmem:[#allocation5 + $0x94c] ss:$12 sps:$4 sm:$0xff]  }
 0x121   :  { %v7200_v48 = vld [vmem:[#allocation5 + $0xacc] ss:$12 sps:$4 sm:$0xff]  }
 0x122   :  { %4504 = vmatpush2.bf16.msra.mxu0 %v7135_v49  ;;  %v7195_v49 = vld [vmem:[#allocation5 + $0x948] ss:$12 sps:$4 sm:$0xff]  }
 0x123   :  { %4545 = vmatpush2.bf16.msra.mxu1 %v7138_v50  ;;  %4505 = vmatprep.subr.bf16.mxu0 %v7143_v51  ;;  %v7198_v50 = vld [vmem:[#allocation5 + $0xac8] ss:$12 sps:$4 sm:$0xff]  }
 0x124   :  { %4546 = vmatprep.subr.bf16.mxu1 %v7146_v52  ;;  %v7203_v51 = vld [vmem:[#allocation5 + $0x934] ss:$12 sps:$4 sm:$0xff]  }
 0x125   :  { %v7206_v52 = vld [vmem:[#allocation5 + $0xab4] ss:$12 sps:$4 sm:$0xff]  }
 0x126   :  { %4506 = vmatpush2.bf16.msra.mxu0 %v7141_v54  ;;  %v7201_v54 = vld [vmem:[#allocation5 + $0x930] ss:$12 sps:$4 sm:$0xff]  }
 0x127   :  { %4547 = vmatpush2.bf16.msra.mxu1 %v7144_v55  ;;  %4507 = vmatprep.subr.bf16.mxu0 %v7149_v56  ;;  %v7204_v55 = vld [vmem:[#allocation5 + $0xab0] ss:$12 sps:$4 sm:$0xff]  }
 0x128   :  { %4548 = vmatprep.subr.bf16.mxu1 %v7152_v57  ;;  %v7209_v56 = vld [vmem:[#allocation5 + $0x91c] ss:$12 sps:$4 sm:$0xff]  }
 0x129   :  { %v7212_v57 = vld [vmem:[#allocation5 + $0xa9c] ss:$12 sps:$4 sm:$0xff]  }
 0x12a   :  { %4508 = vmatpush2.bf16.msra.mxu0 %v7147_v58  ;;  %v7207_v58 = vld [vmem:[#allocation5 + $0x918] ss:$12 sps:$4 sm:$0xff]  }
 0x12b   :  { %4549 = vmatpush2.bf16.msra.mxu1 %v7150_v59  ;;  %4509 = vmatprep.subr.bf16.mxu0 %v7155_v60  ;;  %v7210_v59 = vld [vmem:[#allocation5 + $0xa98] ss:$12 sps:$4 sm:$0xff]  }
 0x12c   :  { %4550 = vmatprep.subr.bf16.mxu1 %v7158_v61  ;;  %v7215_v60 = vld [vmem:[#allocation5 + $0x904] ss:$12 sps:$4 sm:$0xff]  }
 0x12d   :  { %v7218_v61 = vld [vmem:[#allocation5 + $0xa84] ss:$12 sps:$4 sm:$0xff]  }
 0x12e   :  { %4510 = vmatpush2.bf16.msra.mxu0 %v7153_v8  ;;  %v7219_v8 = vld [vmem:[#allocation5 + $0xa68] ss:$12 sps:$4 sm:$0xff]  }
 0x12f   :  { %4551 = vmatpush2.bf16.msra.mxu1 %v7156_v11  ;;  %4511 = vmatprep.subr.bf16.mxu0 %v7161_v12  ;;  %v7222_v11 = vld [vmem:[#allocation5 + $0xbe8] ss:$12 sps:$4 sm:$0xff]  }
 0x130   :  { %4552 = vmatprep.subr.bf16.mxu1 %v7164_v13  ;;  %v7227_v12 = vld [vmem:[#allocation5 + $0xa54] ss:$12 sps:$4 sm:$0xff]  }
 0x131   :  { %v7230_v13 = vld [vmem:[#allocation5 + $0xbd4] ss:$12 sps:$4 sm:$0xff]  }
 0x132   :  { %4512 = vmatpush2.bf16.msra.mxu0 %v7159_v20  ;;  %v7225_v20 = vld [vmem:[#allocation5 + $0xa50] ss:$12 sps:$4 sm:$0xff]  }
 0x133   :  { %4553 = vmatpush2.bf16.msra.mxu1 %v7162_v25  ;;  %4563 = vmatprep.subr.bf16.mxu0 %v7173_v26  ;;  %v7236_v25 = vld [vmem:[#allocation5 + $0xbbc] ss:$12 sps:$4 sm:$0xff]   ;;  %v7231_v26 = vld [vmem:[#allocation5 + $0xa38] ss:$12 sps:$4 sm:$0xff]  }
 0x134   :  { %4604 = vmatprep.subr.bf16.mxu1 %v7176_v27  ;;  %v7234_v27 = vld [vmem:[#allocation5 + $0xbb8] ss:$12 sps:$4 sm:$0xff]  }
 0x135   :  { %4514 = vmatmul.mubr.bf16.vlgmr.msra.gmra.mxu0 %v8135_v30 }
 0x136   :  { %4555 = vmatmul.mubr.bf16.vlgmr.msra.gmra.mxu1 %v8137_v31  ;;  %4564 = vmatpush1.bf16.msra.mxu0 %v7171_v63  ;;  %v7237_v63 = vld [vmem:[#allocation5 + $0xa20] ss:$12 sps:$4 sm:$0xff]  }
 0x137   :  { %4605 = vmatpush1.bf16.msra.mxu1 %v7174_v1  ;;  %4565 = vmatprep.subr.bf16.mxu0 %v7179_v2  ;;  %v7240_v1 = vld [vmem:[#allocation5 + $0xba0] ss:$12 sps:$4 sm:$0xff]  }
 0x138   :  { %4606 = vmatprep.subr.bf16.mxu1 %v7182_v3  ;;  %4595 = vmatprep.mubr.bf16.mxu0 %v8139_v32  ;;  %v7245_v2 = vld [vmem:[#allocation5 + $0xa0c] ss:$12 sps:$4 sm:$0xff]  }
 0x139   :  { %4636 = vmatprep.mubr.bf16.mxu1 %v8141_v33  ;;  %v7248_v3 = vld [vmem:[#allocation5 + $0xb8c] ss:$12 sps:$4 sm:$0xff]  }
 0x13a   :  { %4566 = vmatpush1.bf16.msra.mxu0 %v7177_v34  ;;  %v7243_v34 = vld [vmem:[#allocation5 + $0xa08] ss:$12 sps:$4 sm:$0xff]  }
 0x13b   :  { %4607 = vmatpush1.bf16.msra.mxu1 %v7180_v35  ;;  %4567 = vmatprep.subr.bf16.mxu0 %v7185_v36  ;;  %v7246_v35 = vld [vmem:[#allocation5 + $0xb88] ss:$12 sps:$4 sm:$0xff]  }
 0x13c   :  { %4608 = vmatprep.subr.bf16.mxu1 %v7188_v37  ;;  %v7251_v36 = vld [vmem:[#allocation5 + $0x9f4] ss:$12 sps:$4 sm:$0xff]  }
 0x13d   :  { %v7254_v37 = vld [vmem:[#allocation5 + $0xb74] ss:$12 sps:$4 sm:$0xff]  }
 0x13e   :  { %4568 = vmatpush1.bf16.msra.mxu0 %v7183_v38  ;;  %v7249_v38 = vld [vmem:[#allocation5 + $0x9f0] ss:$12 sps:$4 sm:$0xff]  }
 0x13f   :  { %4609 = vmatpush1.bf16.msra.mxu1 %v7186_v39  ;;  %4569 = vmatprep.subr.bf16.mxu0 %v7191_v40  ;;  %v7252_v39 = vld [vmem:[#allocation5 + $0xb70] ss:$12 sps:$4 sm:$0xff]  }
 0x140   :  { %4610 = vmatprep.subr.bf16.mxu1 %v7194_v41  ;;  %v7257_v40 = vld [vmem:[#allocation5 + $0x9dc] ss:$12 sps:$4 sm:$0xff]  }
 0x141   :  { %v7260_v41 = vld [vmem:[#allocation5 + $0xb5c] ss:$12 sps:$4 sm:$0xff]  }
 0x142   :  { %4570 = vmatpush1.bf16.msra.mxu0 %v7189_v42  ;;  %v7369_v42 = vld [vmem:[#allocation2 + $0x20] ss:$48 sps:$4 sm:$0xff]  }
 0x143   :  { %4611 = vmatpush1.bf16.msra.mxu1 %v7192_v43  ;;  %4571 = vmatprep.subr.bf16.mxu0 %v7197_v47  ;;  %v7371_v43 = vld [vmem:[#allocation2 + $0x80] ss:$48 sps:$4 sm:$0xff]   ;;  %v7373_v47 = vld [vmem:[#allocation2 + $0x24] ss:$48 sps:$4 sm:$0xff]  }
 0x144   :  { %4612 = vmatprep.subr.bf16.mxu1 %v7200_v48  ;;  %v7374_v48 = vld [vmem:[#allocation2 + $0x84] ss:$48 sps:$4 sm:$0xff]  }
 0x146   :  { %4572 = vmatpush1.bf16.msra.mxu0 %v7195_v49  ;;  %v7255_v49 = vld [vmem:[#allocation5 + $0x9d8] ss:$12 sps:$4 sm:$0xff]  }
 0x147   :  { %4613 = vmatpush1.bf16.msra.mxu1 %v7198_v50  ;;  %4573 = vmatprep.subr.bf16.mxu0 %v7203_v51  ;;  %v7258_v50 = vld [vmem:[#allocation5 + $0xb58] ss:$12 sps:$4 sm:$0xff]  }
 0x148   :  { %4614 = vmatprep.subr.bf16.mxu1 %v7206_v52  ;;  %v7263_v51 = vld [vmem:[#allocation5 + $0x9c4] ss:$12 sps:$4 sm:$0xff]  }
 0x149   :  { %v7266_v52 = vld [vmem:[#allocation5 + $0xb44] ss:$12 sps:$4 sm:$0xff]  }
 0x14a   :  { %4574 = vmatpush1.bf16.msra.mxu0 %v7201_v54  ;;  %v7261_v54 = vld [vmem:[#allocation5 + $0x9c0] ss:$12 sps:$4 sm:$0xff]  }
 0x14b   :  { %4615 = vmatpush1.bf16.msra.mxu1 %v7204_v55  ;;  %4575 = vmatprep.subr.bf16.mxu0 %v7209_v56  ;;  %v8148_v55 = vrot.slane %v7369_v42, %v8043_v53  ;;  %v8151_v56 = vrot.slane %v7371_v43, %v8043_v53  ;;  %v7288_v42 = vld [vmem:[#allocation5 + $0xdf8] ss:$12 sps:$4 sm:$0xff]  }
 0x14c   :  { %4616 = vmatprep.subr.bf16.mxu1 %v7212_v57  ;;  %v8154_v57 = vrot.slane %v7373_v47, %v8043_v53 }
 0x14e   :  { %4576 = vmatpush1.bf16.msra.mxu0 %v7207_v58  ;;  %v8157_v58 = vrot.slane %v7374_v48, %v8043_v53  ;;  %v7293_v48 = vld [vmem:[#allocation5 + $0xc64] ss:$12 sps:$4 sm:$0xff]  }
 0x14f   :  { %4617 = vmatpush1.bf16.msra.mxu1 %v7210_v59  ;;  %4577 = vmatprep.subr.bf16.mxu0 %v7215_v60  ;;  %v7264_v59 = vld [vmem:[#allocation5 + $0xb40] ss:$12 sps:$4 sm:$0xff]   ;;  %v336_v60 = vcombine.low %v8116_v16, %v8119_v17 }
 0x150   :  { %4618 = vmatprep.subr.bf16.mxu1 %v7218_v61  ;;  %v338_v61 = vcombine.low %v8122_v18, %v8125_v19  ;;  %v375_v16 = vcombine.high %v8154_v57, %v8157_v58  ;;  %v7273_v19 = vld [vmem:[#allocation5 + $0xca8] ss:$12 sps:$4 sm:$0xff]  }
 0x151   :  { %v8169_v17 = vpack.c.bf16 %v336_v60, %v336_v60  ;;  %v7300_v60 = vld [vmem:[#allocation5 + $0xdc8] ss:$12 sps:$4 sm:$0xff]  }
 0x152   :  { %4578 = vmatpush1.bf16.msra.mxu0 %v7213_v62  ;;  %v1228_v62 = vld [vmem:[#allocation7] sm:$0x7]  ;;  %v8171_v18 = vpack.c.bf16 %v338_v61, %v338_v61 }
 0x153   :  { %4619 = vmatpush1.bf16.msra.mxu1 %v7216_v0  ;;  %4579 = vmatprep.subr.bf16.mxu0 %v7221_v4  ;;  %v1232_v0 = vsub.s32 0, %v8040_v46  ;;  %v7275_v4 = vld [vmem:[#allocation5 + $0xcac] ss:$12 sps:$4 sm:$0xff]   ;;  %v7305_v61 = vld [vmem:[#allocation5 + $0xc34] ss:$12 sps:$4 sm:$0xff]  }
 0x154   :  { %4620 = vmatprep.subr.bf16.mxu1 %v7224_v5  ;;  %v7278_v5 = vld [vmem:[#allocation5 + $0xe2c] ss:$12 sps:$4 sm:$0xff]  }
 0x156   :  { %4580 = vmatpush2.bf16.msra.mxu0 %v7219_v8  ;;  %v1236_v8 = vsub.s32 1, %v8040_v46 }
 0x157   :  { %4621 = vmatpush2.bf16.msra.mxu1 %v7222_v11  ;;  %4581 = vmatprep.subr.bf16.mxu0 %v7227_v12  ;;  %v373_v11 = vcombine.high %v8148_v55, %v8151_v56  ;;  %v1233_v12 = vrot.slane %v1228_v62, %v1232_v0  ;;  %v7303_v0 = vld [vmem:[#allocation5 + $0xc30] ss:$12 sps:$4 sm:$0xff]  }
 0x158   :  { %4622 = vmatprep.subr.bf16.mxu1 %v7230_v13  ;;  %v7276_v13 = vld [vmem:[#allocation5 + $0xe28] ss:$12 sps:$4 sm:$0xff]  }
 0x15a   :  { %4582 = vmatpush2.bf16.msra.mxu0 %v7225_v20  ;;  %v7281_v20 = vld [vmem:[#allocation5 + $0xc94] ss:$12 sps:$4 sm:$0xff]  }
 0x15b   :  { %4623 = vmatpush2.bf16.msra.mxu1 %v7228_v21  ;;  %4583 = vmatprep.subr.bf16.mxu0 %v7233_v24  ;;  %v7284_v21 = vld [vmem:[#allocation5 + $0xe14] ss:$12 sps:$4 sm:$0xff]   ;;  %v1237_v24 = vrot.slane %v1228_v62, %v1236_v8  ;;  %v7314_v8 = vld [vmem:[#allocation5 + $0xd9c] ss:$12 sps:$4 sm:$0xff]  }
 0x15c   :  { %4624 = vmatprep.subr.bf16.mxu1 %v7236_v25  ;;  %v8173_v25 = vpack.c.bf16 %v373_v11, %v373_v11  ;;  %v7308_v62 = vld [vmem:[#allocation5 + $0xdb4] ss:$12 sps:$4 sm:$0xff]   ;;  %v7309_v11 = vld [vmem:[#allocation5 + $0xc18] ss:$12 sps:$4 sm:$0xff]  }
 0x15e   :  { %4584 = vmatpush2.bf16.msra.mxu0 %v7231_v26  ;;  %v8175_v26 = vpack.c.bf16 %v375_v16, %v375_v16  ;;  %v7312_v16 = vld [vmem:[#allocation5 + $0xd98] ss:$12 sps:$4 sm:$0xff]  }
 0x15f   :  { %4625 = vmatpush2.bf16.msra.mxu1 %v7234_v27  ;;  %4585 = vmatprep.subr.bf16.mxu0 %v7239_v28 }
 0x160   :  { %4626 = vmatprep.subr.bf16.mxu1 %v7242_v29  ;;  %v7279_v29 = vld [vmem:[#allocation5 + $0xc90] ss:$12 sps:$4 sm:$0xff]  }
 0x162   :  { %4586 = vmatpush2.bf16.msra.mxu0 %v7237_v63 }
 0x163   :  { %4627 = vmatpush2.bf16.msra.mxu1 %v7240_v1  ;;  %4587 = vmatprep.subr.bf16.mxu0 %v7245_v2  ;;  %v7282_v1 = vld [vmem:[#allocation5 + $0xe10] ss:$12 sps:$4 sm:$0xff]  }
 0x164   :  { %4628 = vmatprep.subr.bf16.mxu1 %v7248_v3 }
 0x166   :  { %4588 = vmatpush2.bf16.msra.mxu0 %v7243_v34  ;;  %v7287_v34 = vld [vmem:[#allocation5 + $0xc7c] ss:$12 sps:$4 sm:$0xff]  }
 0x167   :  { %4629 = vmatpush2.bf16.msra.mxu1 %v7246_v35  ;;  %4589 = vmatprep.subr.bf16.mxu0 %v7251_v36  ;;  %v7290_v35 = vld [vmem:[#allocation5 + $0xdfc] ss:$12 sps:$4 sm:$0xff]  }
 0x168   :  { %4630 = vmatprep.subr.bf16.mxu1 %v7254_v37 }
 0x16a   :  { %4590 = vmatpush2.bf16.msra.mxu0 %v7249_v38 }
 0x16b   :  { %4631 = vmatpush2.bf16.msra.mxu1 %v7252_v39  ;;  %4591 = vmatprep.subr.bf16.mxu0 %v7257_v40  ;;  %v7285_v40 = vld [vmem:[#allocation5 + $0xc78] ss:$12 sps:$4 sm:$0xff]  }
 0x16c   :  { %4632 = vmatprep.subr.bf16.mxu1 %v7260_v41 }
 0x16e   :  { %4592 = vmatpush2.bf16.msra.mxu0 %v7255_v49  ;;  %v7296_v49 = vld [vmem:[#allocation5 + $0xde4] ss:$12 sps:$4 sm:$0xff]  }
 0x16f   :  { %4633 = vmatpush2.bf16.msra.mxu1 %v7258_v50  ;;  %4593 = vmatprep.subr.bf16.mxu0 %v7263_v51  ;;  %v7291_v50 = vld [vmem:[#allocation5 + $0xc60] ss:$12 sps:$4 sm:$0xff]  }
 0x170   :  { %4634 = vmatprep.subr.bf16.mxu1 %v7266_v52  ;;  %v7294_v51 = vld [vmem:[#allocation5 + $0xde0] ss:$12 sps:$4 sm:$0xff]  }
 0x171   :  { %v7299_v52 = vld [vmem:[#allocation5 + $0xc4c] ss:$12 sps:$4 sm:$0xff]  }
 0x172   :  { %4594 = vmatpush2.bf16.msra.mxu0 %v7261_v54  ;;  %v7302_v54 = vld [vmem:[#allocation5 + $0xdcc] ss:$12 sps:$4 sm:$0xff]  }
 0x173   :  { %4635 = vmatpush2.bf16.msra.mxu1 %v7264_v59  ;;  %4645 = vmatprep.subr.bf16.mxu0 %v7275_v4  ;;  %v7297_v59 = vld [vmem:[#allocation5 + $0xc48] ss:$12 sps:$4 sm:$0xff]   ;;  %v7306_v4 = vld [vmem:[#allocation5 + $0xdb0] ss:$12 sps:$4 sm:$0xff]  }
 0x174   :  { %4686 = vmatprep.subr.bf16.mxu1 %v7278_v5  ;;  %v7311_v5 = vld [vmem:[#allocation5 + $0xc1c] ss:$12 sps:$4 sm:$0xff]  }
 0x175   :  { %v4351_v27 = vpop.f32.mrf.mxu0  ;;  %4596 = vmatmul.mubr.bf16.vlgmr.msra.gmra.mxu0 %v8169_v17 }
 0x176   :  { %v4392_v28 = vpop.f32.mrf.mxu1  ;;  %4637 = vmatmul.mubr.bf16.vlgmr.msra.gmra.mxu1 %v8171_v18  ;;  %v4352_v63 = vadd.f32 %v4351_v27, %v1233_v12  ;;  %4646 = vmatpush1.bf16.msra.mxu0 %v7273_v19  ;;  %v7317_v19 = vld [vmem:[#allocation5 + $0xc04] ss:$12 sps:$4 sm:$0xff]   ;;  %v7321_v27 = vld [vmem:[#allocation5 + $0xd68] ss:$12 sps:$4 sm:$0xff]  }
 0x177   :  { %4687 = vmatpush1.bf16.msra.mxu1 %v7276_v13  ;;  %v4353_v2 = vpop.f32.mrf.mxu0  ;;  %4647 = vmatprep.subr.bf16.mxu0 %v7281_v20  ;;  %v7320_v12 = vld [vmem:[#allocation5 + $0xd84] ss:$12 sps:$4 sm:$0xff]   ;;  %v7315_v13 = vld [vmem:[#allocation5 + $0xc00] ss:$12 sps:$4 sm:$0xff]  }
 0x178   :  { %v4394_v3 = vpop.f32.mrf.mxu1  ;;  %4688 = vmatprep.subr.bf16.mxu1 %v7284_v21  ;;  %v8179_v36 = vadd.f32 %v4392_v28, %v4352_v63  ;;  %v4354_v37 = vadd.f32 %v4353_v2, %v1237_v24  ;;  %4677 = vmatprep.mubr.bf16.mxu0 %v8173_v25  ;;  %v7318_v20 = vld [vmem:[#allocation5 + $0xd80] ss:$12 sps:$4 sm:$0xff]   ;;  %v7324_v28 = vld [vmem:[#allocation5 + $0xee8] ss:$12 sps:$4 sm:$0xff]   ;;  %v7330_v2 = vld [vmem:[#allocation5 + $0xed0] ss:$12 sps:$4 sm:$0xff]  }
 0x179   :  { %4718 = vmatprep.mubr.bf16.mxu1 %v8175_v26  ;;  %v4355_v38 = vpop.f32.mrf.mxu0  ;;  %v7323_v21 = vld [vmem:[#allocation5 + $0xd6c] ss:$12 sps:$4 sm:$0xff]   ;;  %v7332_v63 = vld [vmem:[#allocation5 + $0xed4] ss:$12 sps:$4 sm:$0xff]  }
 0x17a   :  { %v4396_v39 = vpop.f32.mrf.mxu1  ;;  %v8183_v41 = vadd.f32 %v4394_v3, %v4354_v37  ;;  %4648 = vmatpush1.bf16.msra.mxu0 %v7279_v29  ;;  %v7326_v24 = vld [vmem:[#allocation5 + $0xeec] ss:$12 sps:$4 sm:$0xff]   ;;  %v7329_v29 = vld [vmem:[#allocation5 + $0xd54] ss:$12 sps:$4 sm:$0xff]   ;;  %v7335_v3 = vld [vmem:[#allocation5 + $0xd3c] ss:$12 sps:$4 sm:$0xff]  }
 0x17b   :  { %4689 = vmatpush1.bf16.msra.mxu1 %v7282_v1  ;;  %v4356_v43 = vpop.f32.mrf.mxu0  ;;  %4649 = vmatprep.subr.bf16.mxu0 %v7287_v34  ;;  %v7327_v1 = vld [vmem:[#allocation5 + $0xd50] ss:$12 sps:$4 sm:$0xff]   ;;  %v7336_v37 = vld [vmem:[#allocation5 + $0xeb8] ss:$12 sps:$4 sm:$0xff]  }
 0x17c   :  { %v4397_v47 = vpop.f32.mrf.mxu1  ;;  %4690 = vmatprep.subr.bf16.mxu1 %v7290_v35  ;;  %v7338_v34 = vld [vmem:[#allocation5 + $0xebc] ss:$12 sps:$4 sm:$0xff]   ;;  %v7333_v35 = vld [vmem:[#allocation5 + $0xd38] ss:$12 sps:$4 sm:$0xff]  }
 0x17d   :  { %v7341_v38 = vld [vmem:[#allocation5 + $0xd24] ss:$12 sps:$4 sm:$0xff]   ;;  %v7347_v43 = vld [vmem:[#allocation5 + $0xd0c] ss:$12 sps:$4 sm:$0xff]  }
 0x17e   :  { %4650 = vmatpush1.bf16.msra.mxu0 %v7285_v40  ;;  %v7344_v39 = vld [vmem:[#allocation5 + $0xea4] ss:$12 sps:$4 sm:$0xff]   ;;  %v7339_v40 = vld [vmem:[#allocation5 + $0xd20] ss:$12 sps:$4 sm:$0xff]  }
 0x17f   :  { %4691 = vmatpush1.bf16.msra.mxu1 %v7288_v42  ;;  %4651 = vmatprep.subr.bf16.mxu0 %v7293_v48  ;;  %v7342_v42 = vld [vmem:[#allocation5 + $0xea0] ss:$12 sps:$4 sm:$0xff]   ;;  %v7345_v48 = vld [vmem:[#allocation5 + $0xd08] ss:$12 sps:$4 sm:$0xff]  }
 0x180   :  { %4692 = vmatprep.subr.bf16.mxu1 %v7296_v49  ;;  %v7350_v47 = vld [vmem:[#allocation5 + $0xe8c] ss:$12 sps:$4 sm:$0xff]   ;;  %v7348_v49 = vld [vmem:[#allocation5 + $0xe88] ss:$12 sps:$4 sm:$0xff]  }
 0x182   :  { %4652 = vmatpush1.bf16.msra.mxu0 %v7291_v50  ;;  %v7353_v50 = vld [vmem:[#allocation5 + $0xcf4] ss:$12 sps:$4 sm:$0xff]  }
 0x183   :  { %4693 = vmatpush1.bf16.msra.mxu1 %v7294_v51  ;;  %4653 = vmatprep.subr.bf16.mxu0 %v7299_v52  ;;  %v7356_v51 = vld [vmem:[#allocation5 + $0xe74] ss:$12 sps:$4 sm:$0xff]   ;;  %v7351_v52 = vld [vmem:[#allocation5 + $0xcf0] ss:$12 sps:$4 sm:$0xff]  }
 0x184   :  { %4694 = vmatprep.subr.bf16.mxu1 %v7302_v54  ;;  %v7354_v54 = vld [vmem:[#allocation5 + $0xe70] ss:$12 sps:$4 sm:$0xff]  }
 0x186   :  { %4654 = vmatpush1.bf16.msra.mxu0 %v7297_v59  ;;  %v7359_v59 = vld [vmem:[#allocation5 + $0xcdc] ss:$12 sps:$4 sm:$0xff]  }
 0x187   :  { %4695 = vmatpush1.bf16.msra.mxu1 %v7300_v60  ;;  %4655 = vmatprep.subr.bf16.mxu0 %v7305_v61  ;;  %v7362_v60 = vld [vmem:[#allocation5 + $0xe5c] ss:$12 sps:$4 sm:$0xff]  }
 0x188   :  { %4696 = vmatprep.subr.bf16.mxu1 %v7308_v62  ;;  %v7471_v61 = vld [vmem:[#allocation2 + $0x28] ss:$48 sps:$4 sm:$0xff]  }
 0x189   :  { %v7473_v62 = vld [vmem:[#allocation2 + $0x88] ss:$48 sps:$4 sm:$0xff]  }
 0x18a   :  { %4656 = vmatpush1.bf16.msra.mxu0 %v7303_v0  ;;  %v7475_v0 = vld [vmem:[#allocation2 + $0x2c] ss:$48 sps:$4 sm:$0xff]  }
 0x18b   :  { %4697 = vmatpush1.bf16.msra.mxu1 %v7306_v4  ;;  %4657 = vmatprep.subr.bf16.mxu0 %v7311_v5  ;;  %v7357_v4 = vld [vmem:[#allocation5 + $0xcd8] ss:$12 sps:$4 sm:$0xff]   ;;  %v7476_v5 = vld [vmem:[#allocation2 + $0x8c] ss:$48 sps:$4 sm:$0xff]  }
 0x18c   :  { %4698 = vmatprep.subr.bf16.mxu1 %v7314_v8  ;;  %v7360_v8 = vld [vmem:[#allocation5 + $0xe58] ss:$12 sps:$4 sm:$0xff]  }
 0x18e   :  { %4658 = vmatpush1.bf16.msra.mxu0 %v7309_v11  ;;  %v7365_v11 = vld [vmem:[#allocation5 + $0xcc4] ss:$12 sps:$4 sm:$0xff]  }
 0x18f   :  { %4699 = vmatpush1.bf16.msra.mxu1 %v7312_v16  ;;  %4659 = vmatprep.subr.bf16.mxu0 %v7317_v19  ;;  %v7368_v16 = vld [vmem:[#allocation5 + $0xe44] ss:$12 sps:$4 sm:$0xff]   ;;  %v7363_v19 = vld [vmem:[#allocation5 + $0xcc0] ss:$12 sps:$4 sm:$0xff]  }
 0x190   :  { %4700 = vmatprep.subr.bf16.mxu1 %v7320_v12  ;;  %v8186_v12 = vrot.slane %v7471_v61, %v8043_v53  ;;  %v7395_v61 = vld [vmem:[#allocation5 + $0xf64] ss:$12 sps:$4 sm:$0xff]  }
 0x192   :  { %4660 = vmatpush1.bf16.msra.mxu0 %v7315_v13  ;;  %v8189_v13 = vrot.slane %v7473_v62, %v8043_v53 }
 0x193   :  { %4701 = vmatpush1.bf16.msra.mxu1 %v7318_v20  ;;  %4661 = vmatprep.subr.bf16.mxu0 %v7323_v21  ;;  %v8192_v20 = vrot.slane %v7475_v0, %v8043_v53  ;;  %v8195_v21 = vrot.slane %v7476_v5, %v8043_v53  ;;  %v7393_v5 = vld [vmem:[#allocation5 + $0xf60] ss:$12 sps:$4 sm:$0xff]  }
 0x194   :  { %4702 = vmatprep.subr.bf16.mxu1 %v7326_v24  ;;  %v7366_v24 = vld [vmem:[#allocation5 + $0xe40] ss:$12 sps:$4 sm:$0xff]  }
 0x195   :  { %v411_v53 = vcombine.high %v8192_v20, %v8195_v21 }
 0x196   :  { %4662 = vmatpush2.bf16.msra.mxu0 %v7321_v27  ;;  %v372_v27 = vcombine.low %v8148_v55, %v8151_v56  ;;  %v7378_v55 = vld [vmem:[#allocation5 + $0x1128] ss:$12 sps:$4 sm:$0xff]  }
 0x197   :  { %4703 = vmatpush2.bf16.msra.mxu1 %v7324_v28  ;;  %4663 = vmatprep.subr.bf16.mxu0 %v7329_v29  ;;  %v374_v28 = vcombine.low %v8154_v57, %v8157_v58  ;;  %v7377_v29 = vld [vmem:[#allocation5 + $0xfac] ss:$12 sps:$4 sm:$0xff]   ;;  %v7383_v56 = vld [vmem:[#allocation5 + $0xf94] ss:$12 sps:$4 sm:$0xff]   ;;  %v7381_v58 = vld [vmem:[#allocation5 + $0xf90] ss:$12 sps:$4 sm:$0xff]  }
 0x198   :  { %4704 = vmatprep.subr.bf16.mxu1 %v7332_v63  ;;  %v7380_v63 = vld [vmem:[#allocation5 + $0x112c] ss:$12 sps:$4 sm:$0xff]   ;;  %v7386_v57 = vld [vmem:[#allocation5 + $0x1114] ss:$12 sps:$4 sm:$0xff]  }
 0x19a   :  { %4664 = vmatpush2.bf16.msra.mxu0 %v7327_v1  ;;  %v7375_v1 = vld [vmem:[#allocation5 + $0xfa8] ss:$12 sps:$4 sm:$0xff]  }
 0x19b   :  { %4705 = vmatpush2.bf16.msra.mxu1 %v7330_v2  ;;  %4665 = vmatprep.subr.bf16.mxu0 %v7335_v3  ;;  %v409_v2 = vcombine.high %v8186_v12, %v8189_v13  ;;  %v8205_v3 = vpack.c.bf16 %v372_v27, %v372_v27  ;;  %v7410_v27 = vld [vmem:[#allocation5 + $0x10b4] ss:$12 sps:$4 sm:$0xff]  }
 0x19c   :  { %4706 = vmatprep.subr.bf16.mxu1 %v7338_v34  ;;  %v8207_v34 = vpack.c.bf16 %v374_v28, %v374_v28  ;;  %v7405_v28 = vld [vmem:[#allocation5 + $0xf30] ss:$12 sps:$4 sm:$0xff]  }
 0x19e   :  { %4666 = vmatpush2.bf16.msra.mxu0 %v7333_v35  ;;  %v8209_v35 = vpack.c.bf16 %v409_v2, %v409_v2  ;;  %v7411_v2 = vld [vmem:[#allocation5 + $0xf18] ss:$12 sps:$4 sm:$0xff]  }
 0x19f   :  { %4707 = vmatpush2.bf16.msra.mxu1 %v7336_v37  ;;  %4667 = vmatprep.subr.bf16.mxu0 %v7341_v38  ;;  %v8211_v37 = vpack.c.bf16 %v411_v53, %v411_v53  ;;  %v7414_v53 = vld [vmem:[#allocation5 + $0x1098] ss:$12 sps:$4 sm:$0xff]  }
 0x1a0   :  { %4708 = vmatprep.subr.bf16.mxu1 %v7344_v39 }
 0x1a2   :  { %4668 = vmatpush2.bf16.msra.mxu0 %v7339_v40  ;;  %v7384_v40 = vld [vmem:[#allocation5 + $0x1110] ss:$12 sps:$4 sm:$0xff]  }
 0x1a3   :  { %4709 = vmatpush2.bf16.msra.mxu1 %v7342_v42  ;;  %4669 = vmatprep.subr.bf16.mxu0 %v7347_v43  ;;  %v7389_v43 = vld [vmem:[#allocation5 + $0xf7c] ss:$12 sps:$4 sm:$0xff]  }
 0x1a4   :  { %4710 = vmatprep.subr.bf16.mxu1 %v7350_v47 }
 0x1a6   :  { %4670 = vmatpush2.bf16.msra.mxu0 %v7345_v48 }
 0x1a7   :  { %4711 = vmatpush2.bf16.msra.mxu1 %v7348_v49  ;;  %4671 = vmatprep.subr.bf16.mxu0 %v7353_v50  ;;  %v7392_v49 = vld [vmem:[#allocation5 + $0x10fc] ss:$12 sps:$4 sm:$0xff]  }
 0x1a8   :  { %4712 = vmatprep.subr.bf16.mxu1 %v7356_v51 }
 0x1aa   :  { %4672 = vmatpush2.bf16.msra.mxu0 %v7351_v52  ;;  %v7387_v52 = vld [vmem:[#allocation5 + $0xf78] ss:$12 sps:$4 sm:$0xff]  }
 0x1ab   :  { %4713 = vmatpush2.bf16.msra.mxu1 %v7354_v54  ;;  %4673 = vmatprep.subr.bf16.mxu0 %v7359_v59 }
 0x1ac   :  { %4714 = vmatprep.subr.bf16.mxu1 %v7362_v60 }
 0x1ae   :  { %4674 = vmatpush2.bf16.msra.mxu0 %v7357_v4  ;;  %v7398_v4 = vld [vmem:[#allocation5 + $0x10e4] ss:$12 sps:$4 sm:$0xff]  }
 0x1af   :  { %4715 = vmatpush2.bf16.msra.mxu1 %v7360_v8  ;;  %4675 = vmatprep.subr.bf16.mxu0 %v7365_v11  ;;  %v7401_v8 = vld [vmem:[#allocation5 + $0xf4c] ss:$12 sps:$4 sm:$0xff]  }
 0x1b0   :  { %4716 = vmatprep.subr.bf16.mxu1 %v7368_v16  ;;  %v7404_v11 = vld [vmem:[#allocation5 + $0x10cc] ss:$12 sps:$4 sm:$0xff]   ;;  %v7399_v16 = vld [vmem:[#allocation5 + $0xf48] ss:$12 sps:$4 sm:$0xff]  }
 0x1b2   :  { %4676 = vmatpush2.bf16.msra.mxu0 %v7363_v19  ;;  %v7402_v19 = vld [vmem:[#allocation5 + $0x10c8] ss:$12 sps:$4 sm:$0xff]  }
 0x1b3   :  { %4717 = vmatpush2.bf16.msra.mxu1 %v7366_v24  ;;  %4727 = vmatprep.subr.bf16.mxu0 %v7377_v29  ;;  %v7407_v24 = vld [vmem:[#allocation5 + $0xf34] ss:$12 sps:$4 sm:$0xff]   ;;  %v7408_v29 = vld [vmem:[#allocation5 + $0x10b0] ss:$12 sps:$4 sm:$0xff]  }
 0x1b4   :  { %4768 = vmatprep.subr.bf16.mxu1 %v7380_v63  ;;  %v7413_v63 = vld [vmem:[#allocation5 + $0xf1c] ss:$12 sps:$4 sm:$0xff]  }
 0x1b5   :  { %v4433_v38 = vpop.f32.mrf.mxu0  ;;  %4678 = vmatmul.mubr.bf16.vlgmr.msra.gmra.mxu0 %v8205_v3 }
 0x1b6   :  { %v4474_v39 = vpop.f32.mrf.mxu1  ;;  %4719 = vmatmul.mubr.bf16.vlgmr.msra.gmra.mxu1 %v8207_v34  ;;  %v4434_v42 = vadd.f32 %v4433_v38, %v8179_v36  ;;  %4728 = vmatpush1.bf16.msra.mxu0 %v7375_v1  ;;  %v7390_v36 = vld [vmem:[#allocation5 + $0x10f8] ss:$12 sps:$4 sm:$0xff]   ;;  %v7416_v1 = vld [vmem:[#allocation5 + $0x109c] ss:$12 sps:$4 sm:$0xff]  }
 0x1b7   :  { %4769 = vmatpush1.bf16.msra.mxu1 %v7378_v55  ;;  %v4435_v47 = vpop.f32.mrf.mxu0  ;;  %4729 = vmatprep.subr.bf16.mxu0 %v7383_v56  ;;  %v7419_v55 = vld [vmem:[#allocation5 + $0xf04] ss:$12 sps:$4 sm:$0xff]   ;;  %v7425_v38 = vld [vmem:[#allocation5 + $0x106c] ss:$12 sps:$4 sm:$0xff]  }
 0x1b8   :  { %v4476_v48 = vpop.f32.mrf.mxu1  ;;  %4770 = vmatprep.subr.bf16.mxu1 %v7386_v57  ;;  %v8216_v50 = vadd.f32 %v4474_v39, %v4434_v42  ;;  %v4436_v51 = vadd.f32 %v4435_v47, %v8183_v41  ;;  %4759 = vmatprep.mubr.bf16.mxu0 %v8209_v35  ;;  %v7396_v41 = vld [vmem:[#allocation5 + $0x10e0] ss:$12 sps:$4 sm:$0xff]   ;;  %v7422_v56 = vld [vmem:[#allocation5 + $0x1084] ss:$12 sps:$4 sm:$0xff]   ;;  %v7426_v42 = vld [vmem:[#allocation5 + $0x11e8] ss:$12 sps:$4 sm:$0xff]  }
 0x1b9   :  { %4800 = vmatprep.mubr.bf16.mxu1 %v8211_v37  ;;  %v4437_v54 = vpop.f32.mrf.mxu0  ;;  %v7417_v57 = vld [vmem:[#allocation5 + $0xf00] ss:$12 sps:$4 sm:$0xff]  }
 0x1ba   :  { %v4478_v59 = vpop.f32.mrf.mxu1  ;;  %v8221_v60 = vadd.f32 %v4476_v48, %v4436_v51  ;;  %4730 = vmatpush1.bf16.msra.mxu0 %v7381_v58  ;;  %v7420_v58 = vld [vmem:[#allocation5 + $0x1080] ss:$12 sps:$4 sm:$0xff]   ;;  %v7429_v48 = vld [vmem:[#allocation5 + $0x1050] ss:$12 sps:$4 sm:$0xff]   ;;  %v7435_v54 = vld [vmem:[#allocation5 + $0x1038] ss:$12 sps:$4 sm:$0xff]  }
 0x1bb   :  { %4771 = vmatpush1.bf16.msra.mxu1 %v7384_v40  ;;  %v4438_v62 = vpop.f32.mrf.mxu0  ;;  %4731 = vmatprep.subr.bf16.mxu0 %v7389_v43  ;;  %v7428_v39 = vld [vmem:[#allocation5 + $0x11ec] ss:$12 sps:$4 sm:$0xff]   ;;  %v7423_v40 = vld [vmem:[#allocation5 + $0x1068] ss:$12 sps:$4 sm:$0xff]  }
 0x1bc   :  { %v4479_v0 = vpop.f32.mrf.mxu1  ;;  %4772 = vmatprep.subr.bf16.mxu1 %v7392_v49  ;;  %v7431_v43 = vld [vmem:[#allocation5 + $0x1054] ss:$12 sps:$4 sm:$0xff]   ;;  %v7432_v49 = vld [vmem:[#allocation5 + $0x11d0] ss:$12 sps:$4 sm:$0xff]   ;;  %v7438_v59 = vld [vmem:[#allocation5 + $0x11b8] ss:$12 sps:$4 sm:$0xff]  }
 0x1bd   :  { %v7434_v47 = vld [vmem:[#allocation5 + $0x11d4] ss:$12 sps:$4 sm:$0xff]   ;;  %v7437_v51 = vld [vmem:[#allocation5 + $0x103c] ss:$12 sps:$4 sm:$0xff]  }
 0x1be   :  { %4732 = vmatpush1.bf16.msra.mxu0 %v7387_v52  ;;  %v7440_v52 = vld [vmem:[#allocation5 + $0x11bc] ss:$12 sps:$4 sm:$0xff]   ;;  %v7441_v62 = vld [vmem:[#allocation5 + $0x1020] ss:$12 sps:$4 sm:$0xff]  }
 0x1bf   :  { %4773 = vmatpush1.bf16.msra.mxu1 %v7390_v36  ;;  %4733 = vmatprep.subr.bf16.mxu0 %v7395_v61  ;;  %v7443_v36 = vld [vmem:[#allocation5 + $0x1024] ss:$12 sps:$4 sm:$0xff]   ;;  %v7444_v0 = vld [vmem:[#allocation5 + $0x11a0] ss:$12 sps:$4 sm:$0xff]  }
 0x1c0   :  { %4774 = vmatprep.subr.bf16.mxu1 %v7398_v4  ;;  %v7446_v61 = vld [vmem:[#allocation5 + $0x11a4] ss:$12 sps:$4 sm:$0xff]   ;;  %v7449_v4 = vld [vmem:[#allocation5 + $0x100c] ss:$12 sps:$4 sm:$0xff]  }
 0x1c2   :  { %4734 = vmatpush1.bf16.msra.mxu0 %v7393_v5  ;;  %v7452_v5 = vld [vmem:[#allocation5 + $0x118c] ss:$12 sps:$4 sm:$0xff]  }
 0x1c3   :  { %4775 = vmatpush1.bf16.msra.mxu1 %v7396_v41  ;;  %4735 = vmatprep.subr.bf16.mxu0 %v7401_v8  ;;  %v7447_v41 = vld [vmem:[#allocation5 + $0x1008] ss:$12 sps:$4 sm:$0xff]  }
 0x1c4   :  { %4776 = vmatprep.subr.bf16.mxu1 %v7404_v11  ;;  %v7450_v8 = vld [vmem:[#allocation5 + $0x1188] ss:$12 sps:$4 sm:$0xff]  }
 0x1c5   :  { %v7455_v11 = vld [vmem:[#allocation5 + $0xff4] ss:$12 sps:$4 sm:$0xff]  }
 0x1c6   :  { %4736 = vmatpush1.bf16.msra.mxu0 %v7399_v16  ;;  %v7458_v16 = vld [vmem:[#allocation5 + $0x1174] ss:$12 sps:$4 sm:$0xff]  }
 0x1c7   :  { %4777 = vmatpush1.bf16.msra.mxu1 %v7402_v19  ;;  %4737 = vmatprep.subr.bf16.mxu0 %v7407_v24  ;;  %v7453_v19 = vld [vmem:[#allocation5 + $0xff0] ss:$12 sps:$4 sm:$0xff]  }
 0x1c8   :  { %4778 = vmatprep.subr.bf16.mxu1 %v7410_v27  ;;  %v7456_v24 = vld [vmem:[#allocation5 + $0x1170] ss:$12 sps:$4 sm:$0xff]  }
 0x1c9   :  { %v7461_v27 = vld [vmem:[#allocation5 + $0xfdc] ss:$12 sps:$4 sm:$0xff]  }
 0x1ca   :  { %4738 = vmatpush1.bf16.msra.mxu0 %v7405_v28  ;;  %v7464_v28 = vld [vmem:[#allocation5 + $0x115c] ss:$12 sps:$4 sm:$0xff]  }
 0x1cb   :  { %4779 = vmatpush1.bf16.msra.mxu1 %v7408_v29  ;;  %4739 = vmatprep.subr.bf16.mxu0 %v7413_v63  ;;  %v7459_v29 = vld [vmem:[#allocation5 + $0xfd8] ss:$12 sps:$4 sm:$0xff]  }
 0x1cc   :  { %4780 = vmatprep.subr.bf16.mxu1 %v7416_v1  ;;  %v7462_v63 = vld [vmem:[#allocation5 + $0x1158] ss:$12 sps:$4 sm:$0xff]  }
 0x1cd   :  { %v7467_v1 = vld [vmem:[#allocation5 + $0xfc4] ss:$12 sps:$4 sm:$0xff]  }
 0x1ce   :  { %4740 = vmatpush1.bf16.msra.mxu0 %v7411_v2  ;;  %v7470_v2 = vld [vmem:[#allocation5 + $0x1144] ss:$12 sps:$4 sm:$0xff]  }
 0x1cf   :  { %4781 = vmatpush1.bf16.msra.mxu1 %v7414_v53  ;;  %4741 = vmatprep.subr.bf16.mxu0 %v7419_v55  ;;  %v7465_v53 = vld [vmem:[#allocation5 + $0xfc0] ss:$12 sps:$4 sm:$0xff]  }
 0x1d0   :  { %4782 = vmatprep.subr.bf16.mxu1 %v7422_v56  ;;  %v7468_v55 = vld [vmem:[#allocation5 + $0x1140] ss:$12 sps:$4 sm:$0xff]   ;;  %v408_v56 = vcombine.low %v8186_v12, %v8189_v13  ;;  %v7482_v12 = vld [vmem:[#allocation5 + $0x2d8] ss:$12 sps:$4 sm:$0xff]  }
 0x1d1   :  { %v7483_v13 = vld [vmem:[#allocation5 + $0x98] ss:$12 sps:$4 sm:$0xff]  }
 0x1d2   :  { %4742 = vmatpush1.bf16.msra.mxu0 %v7417_v57  ;;  %v410_v57 = vcombine.low %v8192_v20, %v8195_v21 }
 0x1d3   :  { %4783 = vmatpush1.bf16.msra.mxu1 %v7420_v58  ;;  %4743 = vmatprep.subr.bf16.mxu0 %v7425_v38  ;;  %v7477_v58 = vld [vmem:[#allocation5 + $0x170] ss:$12 sps:$4 sm:$0xff]  }
 0x1d4   :  { %4784 = vmatprep.subr.bf16.mxu1 %v7428_v39  ;;  %v7478_v38 = vld [vmem:[#allocation5 + $0x2f0] ss:$12 sps:$4 sm:$0xff]  }
 0x1d5   :  { %v7479_v39 = vld [vmem:[#allocation5 + $0xb0] ss:$12 sps:$4 sm:$0xff]  }
 0x1d6   :  { %4744 = vmatpush2.bf16.msra.mxu0 %v7423_v40  ;;  %v8227_v40 = vpack.c.bf16 %v408_v56, %v408_v56  ;;  %v7504_v56 = vld [vmem:[#allocation5 + $0x1a0] ss:$12 sps:$4 sm:$0xff]  }
 0x1d7   :  { %4785 = vmatpush2.bf16.msra.mxu1 %v7426_v42  ;;  %4745 = vmatprep.subr.bf16.mxu0 %v7431_v43  ;;  %v8229_v42 = vpack.c.bf16 %v410_v57, %v410_v57  ;;  %v7480_v43 = vld [vmem:[#allocation5 + $0x230] ss:$12 sps:$4 sm:$0xff]   ;;  %v7505_v57 = vld [vmem:[#allocation5 + $0xc8] ss:$12 sps:$4 sm:$0xff]  }
 0x1d8   :  { %4786 = vmatprep.subr.bf16.mxu1 %v7434_v47  ;;  %v7481_v47 = vld [vmem:[#allocation5 + $0x158] ss:$12 sps:$4 sm:$0xff]  }
 0x1da   :  { %4746 = vmatpush2.bf16.msra.mxu0 %v7429_v48  ;;  %v7484_v48 = vld [vmem:[#allocation5 + $0x218] ss:$12 sps:$4 sm:$0xff]  }
 0x1db   :  { %4787 = vmatpush2.bf16.msra.mxu1 %v7432_v49  ;;  %4747 = vmatprep.subr.bf16.mxu0 %v7437_v51  ;;  %v7485_v51 = vld [vmem:[#allocation5 + $0x140] ss:$12 sps:$4 sm:$0xff]  }
 0x1dc   :  { %4788 = vmatprep.subr.bf16.mxu1 %v7440_v52 }
 0x1de   :  { %4748 = vmatpush2.bf16.msra.mxu0 %v7435_v54 }
 0x1df   :  { %4789 = vmatpush2.bf16.msra.mxu1 %v7438_v59  ;;  %4749 = vmatprep.subr.bf16.mxu0 %v7443_v36  ;;  %v7486_v59 = vld [vmem:[#allocation5 + $0x2c0] ss:$12 sps:$4 sm:$0xff]  }
 0x1e0   :  { %4790 = vmatprep.subr.bf16.mxu1 %v7446_v61 }
 0x1e2   :  { %4750 = vmatpush2.bf16.msra.mxu0 %v7441_v62  ;;  %v7487_v62 = vld [vmem:[#allocation5 + $0x80] ss:$12 sps:$4 sm:$0xff]  }
 0x1e3   :  { %4791 = vmatpush2.bf16.msra.mxu1 %v7444_v0  ;;  %4751 = vmatprep.subr.bf16.mxu0 %v7449_v4 }
 0x1e4   :  { %4792 = vmatprep.subr.bf16.mxu1 %v7452_v5 }
 0x1e6   :  { %4752 = vmatpush2.bf16.msra.mxu0 %v7447_v41  ;;  %v7489_v41 = vld [vmem:[#allocation5 + $0x128] ss:$12 sps:$4 sm:$0xff]  }
 0x1e7   :  { %4793 = vmatpush2.bf16.msra.mxu1 %v7450_v8  ;;  %4753 = vmatprep.subr.bf16.mxu0 %v7455_v11 }
 0x1e8   :  { %4794 = vmatprep.subr.bf16.mxu1 %v7458_v16  ;;  %v7490_v16 = vld [vmem:[#allocation5 + $0x2a8] ss:$12 sps:$4 sm:$0xff]  }
 0x1ea   :  { %4754 = vmatpush2.bf16.msra.mxu0 %v7453_v19  ;;  %v7491_v19 = vld [vmem:[#allocation5 + $0x68] ss:$12 sps:$4 sm:$0xff]  }
 0x1eb   :  { %4795 = vmatpush2.bf16.msra.mxu1 %v7456_v24  ;;  %4755 = vmatprep.subr.bf16.mxu0 %v7461_v27  ;;  %v7495_v24 = vld [vmem:[#allocation5 + $0x50] ss:$12 sps:$4 sm:$0xff]  }
 0x1ec   :  { %4796 = vmatprep.subr.bf16.mxu1 %v7464_v28  ;;  %v7496_v27 = vld [vmem:[#allocation5 + $0x1d0] ss:$12 sps:$4 sm:$0xff]   ;;  %v7497_v28 = vld [vmem:[#allocation5 + $0xf8] ss:$12 sps:$4 sm:$0xff]  }
 0x1ee   :  { %4756 = vmatpush2.bf16.msra.mxu0 %v7459_v29  ;;  %v7498_v29 = vld [vmem:[#allocation5 + $0x278] ss:$12 sps:$4 sm:$0xff]  }
 0x1ef   :  { %4797 = vmatpush2.bf16.msra.mxu1 %v7462_v63  ;;  %4757 = vmatprep.subr.bf16.mxu0 %v7467_v1  ;;  %v7499_v63 = vld [vmem:[#allocation5 + $0x38] ss:$12 sps:$4 sm:$0xff]  }
 0x1f0   :  { %4798 = vmatprep.subr.bf16.mxu1 %v7470_v2  ;;  %v7500_v1 = vld [vmem:[#allocation5 + $0x1b8] ss:$12 sps:$4 sm:$0xff]   ;;  %v7501_v2 = vld [vmem:[#allocation5 + $0xe0] ss:$12 sps:$4 sm:$0xff]  }
 0x1f2   :  { %4758 = vmatpush2.bf16.msra.mxu0 %v7465_v53  ;;  %v7502_v53 = vld [vmem:[#allocation5 + $0x260] ss:$12 sps:$4 sm:$0xff]  }
 0x1f3   :  { %4799 = vmatpush2.bf16.msra.mxu1 %v7468_v55  ;;  %6471 = vmatprep.subr.bf16.mxu0 %v7477_v58  ;;  %v7503_v55 = vld [vmem:[#allocation5 + $0x20] ss:$12 sps:$4 sm:$0xff]   ;;  %v7506_v58 = vld [vmem:[#allocation5 + $0x248] ss:$12 sps:$4 sm:$0xff]  }
 0x1f4   :  { %6493 = vmatprep.subr.bf16.mxu1 %v7478_v38  ;;  %v7507_v38 = vld [vmem:[#allocation5 + $0x8] ss:$12 sps:$4 sm:$0xff]  }
 0x1f5   :  { %v4515_v20 = vpop.f32.mrf.mxu0  ;;  %4760 = vmatmul.mubr.bf16.vlgmr.msra.gmra.mxu0 %v8227_v40 }
 0x1f6   :  { %v4556_v21 = vpop.f32.mrf.mxu1  ;;  %4801 = vmatmul.mubr.bf16.vlgmr.msra.gmra.mxu1 %v8229_v42  ;;  %v4516_v49 = vadd.f32 %v4515_v20, %v8216_v50  ;;  %6472 = vmatpush3.bf16.msra.mxu0 %v7479_v39  ;;  %v7488_v50 = vld [vmem:[#allocation5 + $0x200] ss:$12 sps:$4 sm:$0xff]   ;;  %v7508_v39 = vld [vmem:[#allocation5 + $0x188] ss:$12 sps:$4 sm:$0xff]   ;;  %v7513_v20 = vld [vmem:[#allocation5 + $0x458] ss:$12 sps:$4 sm:$0xff]  }
 0x1f7   :  { %6494 = vmatpush3.bf16.msra.mxu1 %v7480_v43  ;;  %v4517_v52 = vpop.f32.mrf.mxu0  ;;  %6473 = vmatprep.subr.bf16.mxu0 %v7481_v47  ;;  %v7509_v43 = vld [vmem:[#allocation5 + $0x470] ss:$12 sps:$4 sm:$0xff]  }
 0x1f8   :  { %v4558_v54 = vpop.f32.mrf.mxu1  ;;  %6495 = vmatprep.subr.bf16.mxu1 %v7482_v12  ;;  %v8234_v36 = vadd.f32 %v4556_v21, %v4516_v49  ;;  %v4518_v61 = vadd.f32 %v4517_v52, %v8221_v60  ;;  %4841 = vmatprep.mubr.bf16.mxu0 %v8049_v6  ;;  %v7492_v60 = vld [vmem:[#allocation5 + $0x1e8] ss:$12 sps:$4 sm:$0xff]   ;;  %v7493_v6 = vld [vmem:[#allocation5 + $0x110] ss:$12 sps:$4 sm:$0xff]   ;;  %v7514_v21 = vld [vmem:[#allocation5 + $0x5d8] ss:$12 sps:$4 sm:$0xff]  }
 0x1f9   :  { %4881 = vmatprep.mubr.bf16.mxu1 %v8051_v9  ;;  %v4519_v0 = vpop.f32.mrf.mxu0  ;;  %v7494_v9 = vld [vmem:[#allocation5 + $0x290] ss:$12 sps:$4 sm:$0xff]   ;;  %v7516_v49 = vld [vmem:[#allocation5 + $0x518] ss:$12 sps:$4 sm:$0xff]   ;;  %v7518_v52 = vld [vmem:[#allocation5 + $0x5c0] ss:$12 sps:$4 sm:$0xff]  }
 0x1fa   :  { %v4560_v4 = vpop.f32.mrf.mxu1  ;;  %v8239_v5 = vadd.f32 %v4558_v54, %v4518_v61  ;;  %6474 = vmatpush3.bf16.msra.mxu0 %v7483_v13  ;;  %v7510_v47 = vld [vmem:[#allocation5 + $0x5f0] ss:$12 sps:$4 sm:$0xff]   ;;  %v7519_v54 = vld [vmem:[#allocation5 + $0x380] ss:$12 sps:$4 sm:$0xff]   ;;  %v7521_v61 = vld [vmem:[#allocation5 + $0x428] ss:$12 sps:$4 sm:$0xff]  }
 0x1fb   :  { %6496 = vmatpush3.bf16.msra.mxu1 %v7484_v48  ;;  %v4520_v8 = vpop.f32.mrf.mxu0  ;;  %6475 = vmatprep.subr.bf16.mxu0 %v7485_v51  ;;  %v7511_v12 = vld [vmem:[#allocation5 + $0x3b0] ss:$12 sps:$4 sm:$0xff]   ;;  %v7515_v48 = vld [vmem:[#allocation5 + $0x398] ss:$12 sps:$4 sm:$0xff]   ;;  %v7517_v51 = vld [vmem:[#allocation5 + $0x440] ss:$12 sps:$4 sm:$0xff]  }
 0x1fc   :  { %v4561_v11 = vpop.f32.mrf.mxu1  ;;  %6497 = vmatprep.subr.bf16.mxu1 %v7486_v59  ;;  %v7512_v13 = vld [vmem:[#allocation5 + $0x530] ss:$12 sps:$4 sm:$0xff]   ;;  %v7520_v59 = vld [vmem:[#allocation5 + $0x500] ss:$12 sps:$4 sm:$0xff]   ;;  %v7531_v8 = vld [vmem:[#allocation5 + $0x338] ss:$12 sps:$4 sm:$0xff]  }
 0x1fd   :  { %v7525_v0 = vld [vmem:[#allocation5 + $0x410] ss:$12 sps:$4 sm:$0xff]   ;;  %v7532_v11 = vld [vmem:[#allocation5 + $0x4b8] ss:$12 sps:$4 sm:$0xff]  }
 0x1fe   :  { %6476 = vmatpush3.bf16.msra.mxu0 %v7487_v62  ;;  %v7524_v62 = vld [vmem:[#allocation5 + $0x4e8] ss:$12 sps:$4 sm:$0xff]   ;;  %v7526_v4 = vld [vmem:[#allocation5 + $0x590] ss:$12 sps:$4 sm:$0xff]  }
 0x1ff   :  { %6498 = vmatpush3.bf16.msra.mxu1 %v7488_v50  ;;  %6477 = vmatprep.subr.bf16.mxu0 %v7489_v41  ;;  %v7527_v50 = vld [vmem:[#allocation5 + $0x350] ss:$12 sps:$4 sm:$0xff]  }
 0x200   :  { %6499 = vmatprep.subr.bf16.mxu1 %v7490_v16  ;;  %v7528_v41 = vld [vmem:[#allocation5 + $0x4d0] ss:$12 sps:$4 sm:$0xff]   ;;  %v7533_v16 = vld [vmem:[#allocation5 + $0x3e0] ss:$12 sps:$4 sm:$0xff]  }
 0x202   :  { %6478 = vmatpush3.bf16.msra.mxu0 %v7491_v19  ;;  %v7534_v19 = vld [vmem:[#allocation5 + $0x560] ss:$12 sps:$4 sm:$0xff]  }
 0x203   :  { %6500 = vmatpush3.bf16.msra.mxu1 %v7492_v60  ;;  %6479 = vmatprep.subr.bf16.mxu0 %v7493_v6  ;;  %v7535_v60 = vld [vmem:[#allocation5 + $0x320] ss:$12 sps:$4 sm:$0xff]  }
 0x204   :  { %6501 = vmatprep.subr.bf16.mxu1 %v7494_v9  ;;  %v7536_v6 = vld [vmem:[#allocation5 + $0x4a0] ss:$12 sps:$4 sm:$0xff]   ;;  %v7537_v9 = vld [vmem:[#allocation5 + $0x3c8] ss:$12 sps:$4 sm:$0xff]  }
 0x206   :  { %6480 = vmatpush3.bf16.msra.mxu0 %v7495_v24  ;;  %v7538_v24 = vld [vmem:[#allocation5 + $0x548] ss:$12 sps:$4 sm:$0xff]  }
 0x207   :  { %6502 = vmatpush3.bf16.msra.mxu1 %v7496_v27  ;;  %6481 = vmatprep.subr.bf16.mxu0 %v7497_v28  ;;  %v7539_v27 = vld [vmem:[#allocation5 + $0x308] ss:$12 sps:$4 sm:$0xff]  }
 0x208   :  { %6503 = vmatprep.subr.bf16.mxu1 %v7498_v29  ;;  %v7540_v28 = vld [vmem:[#allocation5 + $0x488] ss:$12 sps:$4 sm:$0xff]   ;;  %v7541_v29 = vld [vmem:[#allocation5 + $0x770] ss:$12 sps:$4 sm:$0xff]  }
 0x20a   :  { %6482 = vmatpush3.bf16.msra.mxu0 %v7499_v63  ;;  %v7542_v63 = vld [vmem:[#allocation5 + $0x8f0] ss:$12 sps:$4 sm:$0xff]  }
 0x20b   :  { %6504 = vmatpush3.bf16.msra.mxu1 %v7500_v1  ;;  %6483 = vmatprep.subr.bf16.mxu0 %v7501_v2  ;;  %v7543_v1 = vld [vmem:[#allocation5 + $0x6b0] ss:$12 sps:$4 sm:$0xff]  }
 0x20c   :  { %6505 = vmatprep.subr.bf16.mxu1 %v7502_v53  ;;  %v7544_v2 = vld [vmem:[#allocation5 + $0x830] ss:$12 sps:$4 sm:$0xff]   ;;  %v7545_v53 = vld [vmem:[#allocation5 + $0x758] ss:$12 sps:$4 sm:$0xff]  }
 0x20e   :  { %6484 = vmatpush3.bf16.msra.mxu0 %v7503_v55  ;;  %v7546_v55 = vld [vmem:[#allocation5 + $0x8d8] ss:$12 sps:$4 sm:$0xff]  }
 0x20f   :  { %6506 = vmatpush3.bf16.msra.mxu1 %v7504_v56  ;;  %6485 = vmatprep.subr.bf16.mxu0 %v7505_v57  ;;  %v7547_v56 = vld [vmem:[#allocation5 + $0x698] ss:$12 sps:$4 sm:$0xff]  }
 0x210   :  { %6507 = vmatprep.subr.bf16.mxu1 %v7506_v58 }
 0x212   :  { %6486 = vmatpush3.bf16.msra.mxu0 %v7507_v38  ;;  %v7548_v38 = vld [vmem:[#allocation5 + $0x818] ss:$12 sps:$4 sm:$0xff]  }
 0x213   :  { %6508 = vmatpush3.bf16.msra.mxu1 %v7508_v39  ;;  %6515 = vmatprep.subr.bf16.mxu0 %v7509_v43  ;;  %v7549_v43 = vld [vmem:[#allocation5 + $0x740] ss:$12 sps:$4 sm:$0xff]  }
 0x214   :  { %6537 = vmatprep.subr.bf16.mxu1 %v7510_v47 }
 0x215   :  { %4842 = vmatmul.mubr.bf16.vlgmr.msra.gmra.mxu0 %v8055_v22  ;;  %v7522_v22 = vld [vmem:[#allocation5 + $0x5a8] ss:$12 sps:$4 sm:$0xff]  }
 0x216   :  { %4882 = vmatmul.mubr.bf16.vlgmr.msra.gmra.mxu1 %v8057_v23  ;;  %6516 = vmatpush3.bf16.msra.mxu0 %v7511_v12  ;;  %v7523_v23 = vld [vmem:[#allocation5 + $0x368] ss:$12 sps:$4 sm:$0xff]  }
 0x217   :  { %6538 = vmatpush3.bf16.msra.mxu1 %v7512_v13  ;;  %6517 = vmatprep.subr.bf16.mxu0 %v7513_v20  ;;  %v7550_v13 = vld [vmem:[#allocation5 + $0x8c0] ss:$12 sps:$4 sm:$0xff]  }
 0x218   :  { %6539 = vmatprep.subr.bf16.mxu1 %v7514_v21  ;;  %4921 = vmatprep.mubr.bf16.mxu0 %v8077_v7  ;;  %v7529_v7 = vld [vmem:[#allocation5 + $0x3f8] ss:$12 sps:$4 sm:$0xff]  }
 0x219   :  { %4961 = vmatprep.mubr.bf16.mxu1 %v8079_v10  ;;  %v7530_v10 = vld [vmem:[#allocation5 + $0x578] ss:$12 sps:$4 sm:$0xff]  }
 0x21a   :  { %6518 = vmatpush3.bf16.msra.mxu0 %v7515_v48  ;;  %v7551_v48 = vld [vmem:[#allocation5 + $0x680] ss:$12 sps:$4 sm:$0xff]  }
 0x21b   :  { %6540 = vmatpush3.bf16.msra.mxu1 %v7516_v49  ;;  %6519 = vmatprep.subr.bf16.mxu0 %v7517_v51  ;;  %v7553_v51 = vld [vmem:[#allocation5 + $0x728] ss:$12 sps:$4 sm:$0xff]  }
 0x21c   :  { %6541 = vmatprep.subr.bf16.mxu1 %v7518_v52 }
 0x21e   :  { %6520 = vmatpush3.bf16.msra.mxu0 %v7519_v54 }
 0x21f   :  { %6542 = vmatpush3.bf16.msra.mxu1 %v7520_v59  ;;  %6521 = vmatprep.subr.bf16.mxu0 %v7521_v61  ;;  %v7554_v59 = vld [vmem:[#allocation5 + $0x8a8] ss:$12 sps:$4 sm:$0xff]  }
 0x220   :  { %6543 = vmatprep.subr.bf16.mxu1 %v7522_v22  ;;  %v7555_v61 = vld [vmem:[#allocation5 + $0x668] ss:$12 sps:$4 sm:$0xff]   ;;  %v7559_v22 = vld [vmem:[#allocation5 + $0x650] ss:$12 sps:$4 sm:$0xff]  }
 0x222   :  { %6522 = vmatpush3.bf16.msra.mxu0 %v7523_v23  ;;  %v7560_v23 = vld [vmem:[#allocation5 + $0x7d0] ss:$12 sps:$4 sm:$0xff]  }
 0x223   :  { %6544 = vmatpush3.bf16.msra.mxu1 %v7524_v62  ;;  %6523 = vmatprep.subr.bf16.mxu0 %v7525_v0  ;;  %v7561_v62 = vld [vmem:[#allocation5 + $0x6f8] ss:$12 sps:$4 sm:$0xff]  }
 0x224   :  { %6545 = vmatprep.subr.bf16.mxu1 %v7526_v4  ;;  %v7562_v0 = vld [vmem:[#allocation5 + $0x878] ss:$12 sps:$4 sm:$0xff]  }
 0x225   :  { %v7563_v4 = vld [vmem:[#allocation5 + $0x638] ss:$12 sps:$4 sm:$0xff]  }
 0x226   :  { %6524 = vmatpush3.bf16.msra.mxu0 %v7527_v50  ;;  %v7564_v50 = vld [vmem:[#allocation5 + $0x7b8] ss:$12 sps:$4 sm:$0xff]  }
 0x227   :  { %6546 = vmatpush3.bf16.msra.mxu1 %v7528_v41  ;;  %6525 = vmatprep.subr.bf16.mxu0 %v7529_v7  ;;  %v7565_v41 = vld [vmem:[#allocation5 + $0x6e0] ss:$12 sps:$4 sm:$0xff]  }
 0x228   :  { %6547 = vmatprep.subr.bf16.mxu1 %v7530_v10  ;;  %v7566_v7 = vld [vmem:[#allocation5 + $0x860] ss:$12 sps:$4 sm:$0xff]  }
 0x229   :  { %v7567_v10 = vld [vmem:[#allocation5 + $0x620] ss:$12 sps:$4 sm:$0xff]  }
 0x22a   :  { %6526 = vmatpush3.bf16.msra.mxu0 %v7531_v8  ;;  %v7568_v8 = vld [vmem:[#allocation5 + $0x7a0] ss:$12 sps:$4 sm:$0xff]  }
 0x22b   :  { %6548 = vmatpush3.bf16.msra.mxu1 %v7532_v11  ;;  %6527 = vmatprep.subr.bf16.mxu0 %v7533_v16  ;;  %v7569_v11 = vld [vmem:[#allocation5 + $0x6c8] ss:$12 sps:$4 sm:$0xff]  }
 0x22c   :  { %6549 = vmatprep.subr.bf16.mxu1 %v7534_v19  ;;  %v7570_v16 = vld [vmem:[#allocation5 + $0x848] ss:$12 sps:$4 sm:$0xff]  }
 0x22d   :  { %v7571_v19 = vld [vmem:[#allocation5 + $0x608] ss:$12 sps:$4 sm:$0xff]  }
 0x22e   :  { %6528 = vmatpush3.bf16.msra.mxu0 %v7535_v60  ;;  %v7572_v60 = vld [vmem:[#allocation5 + $0x788] ss:$12 sps:$4 sm:$0xff]  }
 0x22f   :  { %6550 = vmatpush3.bf16.msra.mxu1 %v7536_v6  ;;  %6529 = vmatprep.subr.bf16.mxu0 %v7537_v9  ;;  %v7573_v6 = vld [vmem:[#allocation5 + $0xa70] ss:$12 sps:$4 sm:$0xff]  }
 0x230   :  { %6551 = vmatprep.subr.bf16.mxu1 %v7538_v24  ;;  %v7574_v9 = vld [vmem:[#allocation5 + $0xbf0] ss:$12 sps:$4 sm:$0xff]  }
 0x231   :  { %v7575_v24 = vld [vmem:[#allocation5 + $0x9b0] ss:$12 sps:$4 sm:$0xff]  }
 0x232   :  { %6530 = vmatpush3.bf16.msra.mxu0 %v7539_v27  ;;  %v7576_v27 = vld [vmem:[#allocation5 + $0xb30] ss:$12 sps:$4 sm:$0xff]  }
 0x233   :  { %6552 = vmatpush3.bf16.msra.mxu1 %v7540_v28  ;;  %6559 = vmatprep.subr.bf16.mxu0 %v7541_v29  ;;  %v7577_v28 = vld [vmem:[#allocation5 + $0xa58] ss:$12 sps:$4 sm:$0xff]  }
 0x234   :  { %6581 = vmatprep.subr.bf16.mxu1 %v7542_v63  ;;  %v7578_v29 = vld [vmem:[#allocation5 + $0xbd8] ss:$12 sps:$4 sm:$0xff]  }
 0x235   :  { %v4597_v57 = vpop.f32.mrf.mxu0  ;;  %4922 = vmatmul.mubr.bf16.vlgmr.msra.gmra.mxu0 %v8087_v44  ;;  %v7579_v63 = vld [vmem:[#allocation5 + $0x998] ss:$12 sps:$4 sm:$0xff]  }
 0x236   :  { %v4638_v58 = vpop.f32.mrf.mxu1  ;;  %4962 = vmatmul.mubr.bf16.vlgmr.msra.gmra.mxu1 %v8089_v45  ;;  %v4598_v39 = vadd.f32 %v4597_v57, %v8234_v36  ;;  %6560 = vmatpush3.bf16.msra.mxu0 %v7543_v1  ;;  %v7552_v36 = vld [vmem:[#allocation5 + $0x800] ss:$12 sps:$4 sm:$0xff]   ;;  %v7580_v1 = vld [vmem:[#allocation5 + $0xb18] ss:$12 sps:$4 sm:$0xff]   ;;  %v7585_v57 = vld [vmem:[#allocation5 + $0xa28] ss:$12 sps:$4 sm:$0xff]  }
 0x237   :  { %6582 = vmatpush3.bf16.msra.mxu1 %v7544_v2  ;;  %v4599_v47 = vpop.f32.mrf.mxu0  ;;  %6561 = vmatprep.subr.bf16.mxu0 %v7545_v53  ;;  %v7581_v2 = vld [vmem:[#allocation5 + $0xa40] ss:$12 sps:$4 sm:$0xff]  }
 0x238   :  { %v4640_v12 = vpop.f32.mrf.mxu1  ;;  %6583 = vmatprep.subr.bf16.mxu1 %v7546_v55  ;;  %v8248_v20 = vadd.f32 %v4638_v58, %v4598_v39  ;;  %v4600_v21 = vadd.f32 %v4599_v47, %v8239_v5  ;;  %5001 = vmatprep.mubr.bf16.mxu0 %v8109_v14  ;;  %v7556_v5 = vld [vmem:[#allocation5 + $0x7e8] ss:$12 sps:$4 sm:$0xff]   ;;  %v7557_v14 = vld [vmem:[#allocation5 + $0x710] ss:$12 sps:$4 sm:$0xff]   ;;  %v7582_v53 = vld [vmem:[#allocation5 + $0xbc0] ss:$12 sps:$4 sm:$0xff]  }
 0x239   :  { %5041 = vmatprep.mubr.bf16.mxu1 %v8111_v15  ;;  %v4601_v44 = vpop.f32.mrf.mxu0  ;;  %v7558_v15 = vld [vmem:[#allocation5 + $0x890] ss:$12 sps:$4 sm:$0xff]   ;;  %v7583_v55 = vld [vmem:[#allocation5 + $0x980] ss:$12 sps:$4 sm:$0xff]   ;;  %v7586_v58 = vld [vmem:[#allocation5 + $0xba8] ss:$12 sps:$4 sm:$0xff]  }
 0x23a   :  { %v4642_v45 = vpop.f32.mrf.mxu1  ;;  %v8253_v49 = vadd.f32 %v4640_v12, %v4600_v21  ;;  %6562 = vmatpush3.bf16.msra.mxu0 %v7547_v56  ;;  %v7584_v56 = vld [vmem:[#allocation5 + $0xb00] ss:$12 sps:$4 sm:$0xff]   ;;  %v7590_v39 = vld [vmem:[#allocation5 + $0xb90] ss:$12 sps:$4 sm:$0xff]   ;;  %v7594_v47 = vld [vmem:[#allocation5 + $0xb78] ss:$12 sps:$4 sm:$0xff]  }
 0x23b   :  { %6584 = vmatpush3.bf16.msra.mxu1 %v7548_v38  ;;  %v4602_v52 = vpop.f32.mrf.mxu0  ;;  %6563 = vmatprep.subr.bf16.mxu0 %v7549_v43  ;;  %v7589_v38 = vld [vmem:[#allocation5 + $0xa10] ss:$12 sps:$4 sm:$0xff]   ;;  %v7595_v12 = vld [vmem:[#allocation5 + $0x938] ss:$12 sps:$4 sm:$0xff]   ;;  %v7597_v21 = vld [vmem:[#allocation5 + $0x9e0] ss:$12 sps:$4 sm:$0xff]  }
 0x23c   :  { %v4643_v54 = vpop.f32.mrf.mxu1  ;;  %6585 = vmatprep.subr.bf16.mxu1 %v7550_v13  ;;  %v7591_v43 = vld [vmem:[#allocation5 + $0x950] ss:$12 sps:$4 sm:$0xff]   ;;  %v7596_v13 = vld [vmem:[#allocation5 + $0xab8] ss:$12 sps:$4 sm:$0xff]   ;;  %v7599_v44 = vld [vmem:[#allocation5 + $0x920] ss:$12 sps:$4 sm:$0xff]  }
 0x23d   :  { %v7600_v45 = vld [vmem:[#allocation5 + $0xaa0] ss:$12 sps:$4 sm:$0xff]   ;;  %v7603_v52 = vld [vmem:[#allocation5 + $0x908] ss:$12 sps:$4 sm:$0xff]  }
 0x23e   :  { %6564 = vmatpush3.bf16.msra.mxu0 %v7551_v48  ;;  %v7598_v48 = vld [vmem:[#allocation5 + $0xb60] ss:$12 sps:$4 sm:$0xff]   ;;  %v7604_v54 = vld [vmem:[#allocation5 + $0xa88] ss:$12 sps:$4 sm:$0xff]  }
 0x23f   :  { %6586 = vmatpush3.bf16.msra.mxu1 %v7552_v36  ;;  %6565 = vmatprep.subr.bf16.mxu0 %v7553_v51  ;;  %v7601_v36 = vld [vmem:[#allocation5 + $0x9c8] ss:$12 sps:$4 sm:$0xff]  }
 0x240   :  { %6587 = vmatprep.subr.bf16.mxu1 %v7554_v59  ;;  %v7602_v51 = vld [vmem:[#allocation5 + $0xb48] ss:$12 sps:$4 sm:$0xff]   ;;  %v7605_v59 = vld [vmem:[#allocation5 + $0xd70] ss:$12 sps:$4 sm:$0xff]  }
 0x242   :  { %6566 = vmatpush3.bf16.msra.mxu0 %v7555_v61  ;;  %v7606_v61 = vld [vmem:[#allocation5 + $0xef0] ss:$12 sps:$4 sm:$0xff]  }
 0x243   :  { %6588 = vmatpush3.bf16.msra.mxu1 %v7556_v5  ;;  %6567 = vmatprep.subr.bf16.mxu0 %v7557_v14  ;;  %v7607_v5 = vld [vmem:[#allocation5 + $0xcb0] ss:$12 sps:$4 sm:$0xff]  }
 0x244   :  { %6589 = vmatprep.subr.bf16.mxu1 %v7558_v15  ;;  %v7608_v14 = vld [vmem:[#allocation5 + $0xe30] ss:$12 sps:$4 sm:$0xff]   ;;  %v7609_v15 = vld [vmem:[#allocation5 + $0xd58] ss:$12 sps:$4 sm:$0xff]  }
 0x246   :  { %6568 = vmatpush3.bf16.msra.mxu0 %v7559_v22  ;;  %v7610_v22 = vld [vmem:[#allocation5 + $0xed8] ss:$12 sps:$4 sm:$0xff]  }
 0x247   :  { %6590 = vmatpush3.bf16.msra.mxu1 %v7560_v23  ;;  %6569 = vmatprep.subr.bf16.mxu0 %v7561_v62 }
 0x248   :  { %6591 = vmatprep.subr.bf16.mxu1 %v7562_v0 }
 0x24a   :  { %6570 = vmatpush3.bf16.msra.mxu0 %v7563_v4  ;;  %v7611_v4 = vld [vmem:[#allocation5 + $0xc98] ss:$12 sps:$4 sm:$0xff]  }
 0x24b   :  { %6592 = vmatpush3.bf16.msra.mxu1 %v7564_v50  ;;  %6571 = vmatprep.subr.bf16.mxu0 %v7565_v41  ;;  %v7612_v50 = vld [vmem:[#allocation5 + $0xe18] ss:$12 sps:$4 sm:$0xff]  }
 0x24c   :  { %6593 = vmatprep.subr.bf16.mxu1 %v7566_v7 }
 0x24e   :  { %6572 = vmatpush3.bf16.msra.mxu0 %v7567_v10  ;;  %v7613_v10 = vld [vmem:[#allocation5 + $0xd40] ss:$12 sps:$4 sm:$0xff]  }
 0x24f   :  { %6594 = vmatpush3.bf16.msra.mxu1 %v7568_v8  ;;  %6573 = vmatprep.subr.bf16.mxu0 %v7569_v11  ;;  %v7614_v8 = vld [vmem:[#allocation5 + $0xec0] ss:$12 sps:$4 sm:$0xff]  }
 0x250   :  { %6595 = vmatprep.subr.bf16.mxu1 %v7570_v16  ;;  %v7616_v16 = vld [vmem:[#allocation5 + $0xe00] ss:$12 sps:$4 sm:$0xff]  }
 0x252   :  { %6574 = vmatpush3.bf16.msra.mxu0 %v7571_v19 }
 0x253   :  { %6596 = vmatpush3.bf16.msra.mxu1 %v7572_v60  ;;  %6603 = vmatprep.subr.bf16.mxu0 %v7573_v6  ;;  %v7617_v6 = vld [vmem:[#allocation5 + $0xd28] ss:$12 sps:$4 sm:$0xff]  }
 0x254   :  { %6625 = vmatprep.subr.bf16.mxu1 %v7574_v9  ;;  %v7618_v9 = vld [vmem:[#allocation5 + $0xea8] ss:$12 sps:$4 sm:$0xff]  }
 0x255   :  { %5002 = vmatmul.mubr.bf16.vlgmr.msra.gmra.mxu0 %v8135_v30  ;;  %v7587_v30 = vld [vmem:[#allocation5 + $0x968] ss:$12 sps:$4 sm:$0xff]  }
 0x256   :  { %5042 = vmatmul.mubr.bf16.vlgmr.msra.gmra.mxu1 %v8137_v31  ;;  %6604 = vmatpush3.bf16.msra.mxu0 %v7575_v24  ;;  %v7588_v31 = vld [vmem:[#allocation5 + $0xae8] ss:$12 sps:$4 sm:$0xff]  }
 0x257   :  { %6626 = vmatpush3.bf16.msra.mxu1 %v7576_v27  ;;  %6605 = vmatprep.subr.bf16.mxu0 %v7577_v28  ;;  %v7619_v24 = vld [vmem:[#allocation5 + $0xc68] ss:$12 sps:$4 sm:$0xff]   ;;  %v7623_v28 = vld [vmem:[#allocation5 + $0xc50] ss:$12 sps:$4 sm:$0xff]  }
 0x258   :  { %6627 = vmatprep.subr.bf16.mxu1 %v7578_v29  ;;  %5081 = vmatprep.mubr.bf16.mxu0 %v8139_v32  ;;  %v7592_v32 = vld [vmem:[#allocation5 + $0xad0] ss:$12 sps:$4 sm:$0xff]   ;;  %v7620_v27 = vld [vmem:[#allocation5 + $0xde8] ss:$12 sps:$4 sm:$0xff]  }
 0x259   :  { %5121 = vmatprep.mubr.bf16.mxu1 %v8141_v33  ;;  %v7593_v33 = vld [vmem:[#allocation5 + $0x9f8] ss:$12 sps:$4 sm:$0xff]   ;;  %v7624_v29 = vld [vmem:[#allocation5 + $0xdd0] ss:$12 sps:$4 sm:$0xff]  }
 0x25a   :  { %6606 = vmatpush3.bf16.msra.mxu0 %v7579_v63  ;;  %v7625_v63 = vld [vmem:[#allocation5 + $0xcf8] ss:$12 sps:$4 sm:$0xff]  }
 0x25b   :  { %6628 = vmatpush3.bf16.msra.mxu1 %v7580_v1  ;;  %6607 = vmatprep.subr.bf16.mxu0 %v7581_v2  ;;  %v7626_v1 = vld [vmem:[#allocation5 + $0xe78] ss:$12 sps:$4 sm:$0xff]  }
 0x25c   :  { %6629 = vmatprep.subr.bf16.mxu1 %v7582_v53  ;;  %v7627_v2 = vld [vmem:[#allocation5 + $0xc38] ss:$12 sps:$4 sm:$0xff]  }
 0x25d   :  { %v7628_v53 = vld [vmem:[#allocation5 + $0xdb8] ss:$12 sps:$4 sm:$0xff]  }
 0x25e   :  { %6608 = vmatpush3.bf16.msra.mxu0 %v7583_v55  ;;  %v7629_v55 = vld [vmem:[#allocation5 + $0xce0] ss:$12 sps:$4 sm:$0xff]  }
 0x25f   :  { %6630 = vmatpush3.bf16.msra.mxu1 %v7584_v56  ;;  %6609 = vmatprep.subr.bf16.mxu0 %v7585_v57  ;;  %v7630_v56 = vld [vmem:[#allocation5 + $0xe60] ss:$12 sps:$4 sm:$0xff]  }
 0x260   :  { %6631 = vmatprep.subr.bf16.mxu1 %v7586_v58  ;;  %v7631_v57 = vld [vmem:[#allocation5 + $0xc20] ss:$12 sps:$4 sm:$0xff]  }
 0x261   :  { %v7632_v58 = vld [vmem:[#allocation5 + $0xda0] ss:$12 sps:$4 sm:$0xff]  }
 0x262   :  { %6610 = vmatpush3.bf16.msra.mxu0 %v7587_v30  ;;  %v7633_v30 = vld [vmem:[#allocation5 + $0xcc8] ss:$12 sps:$4 sm:$0xff]  }
 0x263   :  { %6632 = vmatpush3.bf16.msra.mxu1 %v7588_v31  ;;  %6611 = vmatprep.subr.bf16.mxu0 %v7589_v38  ;;  %v7634_v31 = vld [vmem:[#allocation5 + $0xe48] ss:$12 sps:$4 sm:$0xff]  }
 0x264   :  { %6633 = vmatprep.subr.bf16.mxu1 %v7590_v39  ;;  %v7635_v38 = vld [vmem:[#allocation5 + $0xc08] ss:$12 sps:$4 sm:$0xff]  }
 0x265   :  { %v7636_v39 = vld [vmem:[#allocation5 + $0xd88] ss:$12 sps:$4 sm:$0xff]  }
 0x266   :  { %6612 = vmatpush3.bf16.msra.mxu0 %v7591_v43  ;;  %v7637_v43 = vld [vmem:[#allocation5 + $0x1070] ss:$12 sps:$4 sm:$0xff]  }
 0x267   :  { %6634 = vmatpush3.bf16.msra.mxu1 %v7592_v32  ;;  %6613 = vmatprep.subr.bf16.mxu0 %v7593_v33  ;;  %v7638_v32 = vld [vmem:[#allocation5 + $0x11f0] ss:$12 sps:$4 sm:$0xff]  }
 0x268   :  { %6635 = vmatprep.subr.bf16.mxu1 %v7594_v47  ;;  %v7639_v33 = vld [vmem:[#allocation5 + $0xfb0] ss:$12 sps:$4 sm:$0xff]  }
 0x269   :  { %v7640_v47 = vld [vmem:[#allocation5 + $0x1130] ss:$12 sps:$4 sm:$0xff]  }
 0x26a   :  { %6614 = vmatpush3.bf16.msra.mxu0 %v7595_v12  ;;  %v7641_v12 = vld [vmem:[#allocation5 + $0x1058] ss:$12 sps:$4 sm:$0xff]  }
 0x26b   :  { %6636 = vmatpush3.bf16.msra.mxu1 %v7596_v13  ;;  %6615 = vmatprep.subr.bf16.mxu0 %v7597_v21  ;;  %v7642_v13 = vld [vmem:[#allocation5 + $0x11d8] ss:$12 sps:$4 sm:$0xff]  }
 0x26c   :  { %6637 = vmatprep.subr.bf16.mxu1 %v7598_v48  ;;  %v7643_v21 = vld [vmem:[#allocation5 + $0xf98] ss:$12 sps:$4 sm:$0xff]  }
 0x26d   :  { %v7644_v48 = vld [vmem:[#allocation5 + $0x1118] ss:$12 sps:$4 sm:$0xff]  }
 0x26e   :  { %6616 = vmatpush3.bf16.msra.mxu0 %v7599_v44  ;;  %v7645_v44 = vld [vmem:[#allocation5 + $0x1040] ss:$12 sps:$4 sm:$0xff]  }
 0x26f   :  { %6638 = vmatpush3.bf16.msra.mxu1 %v7600_v45  ;;  %6617 = vmatprep.subr.bf16.mxu0 %v7601_v36  ;;  %v7646_v45 = vld [vmem:[#allocation5 + $0x11c0] ss:$12 sps:$4 sm:$0xff]  }
 0x270   :  { %6639 = vmatprep.subr.bf16.mxu1 %v7602_v51  ;;  %v7647_v36 = vld [vmem:[#allocation5 + $0xf80] ss:$12 sps:$4 sm:$0xff]  }
 0x271   :  { %v7648_v51 = vld [vmem:[#allocation5 + $0x1100] ss:$12 sps:$4 sm:$0xff]  }
 0x272   :  { %6618 = vmatpush3.bf16.msra.mxu0 %v7603_v52  ;;  %v7651_v52 = vld [vmem:[#allocation5 + $0xf68] ss:$12 sps:$4 sm:$0xff]  }
 0x273   :  { %6640 = vmatpush3.bf16.msra.mxu1 %v7604_v54  ;;  %6647 = vmatprep.subr.bf16.mxu0 %v7605_v59  ;;  %v7652_v54 = vld [vmem:[#allocation5 + $0x10e8] ss:$12 sps:$4 sm:$0xff]   ;;  %v7653_v59 = vld [vmem:[#allocation5 + $0x1010] ss:$12 sps:$4 sm:$0xff]  }
 0x274   :  { %6669 = vmatprep.subr.bf16.mxu1 %v7606_v61  ;;  %v7654_v61 = vld [vmem:[#allocation5 + $0x1190] ss:$12 sps:$4 sm:$0xff]  }
 0x275   :  { %v4679_v23 = vpop.f32.mrf.mxu0  ;;  %5082 = vmatmul.mubr.bf16.vlgmr.msra.gmra.mxu0 %v8169_v17 }
 0x276   :  { %v4720_v62 = vpop.f32.mrf.mxu1  ;;  %5122 = vmatmul.mubr.bf16.vlgmr.msra.gmra.mxu1 %v8171_v18  ;;  %v4680_v0 = vadd.f32 %v4679_v23, %v8248_v20  ;;  %6648 = vmatpush3.bf16.msra.mxu0 %v7607_v5  ;;  %v7615_v20 = vld [vmem:[#allocation5 + $0xc80] ss:$12 sps:$4 sm:$0xff]   ;;  %v7657_v5 = vld [vmem:[#allocation5 + $0xff8] ss:$12 sps:$4 sm:$0xff]  }
 0x277   :  { %6670 = vmatpush3.bf16.msra.mxu1 %v7608_v14  ;;  %v8262_v41 = vpop.f32.mrf.mxu0  ;;  %6649 = vmatprep.subr.bf16.mxu0 %v7609_v15  ;;  %v7658_v14 = vld [vmem:[#allocation5 + $0x1178] ss:$12 sps:$4 sm:$0xff]   ;;  %v7661_v23 = vld [vmem:[#allocation5 + $0xfe0] ss:$12 sps:$4 sm:$0xff]  }
 0x278   :  { %v8264_v7 = vpop.f32.mrf.mxu1  ;;  %6671 = vmatprep.subr.bf16.mxu1 %v7610_v22  ;;  %v8266_v11 = vadd.f32 %v4720_v62, %v4680_v0  ;;  %5161 = vmatprep.mubr.bf16.mxu0 %v8173_v25  ;;  %v7621_v25 = vld [vmem:[#allocation5 + $0xd10] ss:$12 sps:$4 sm:$0xff]   ;;  %v7659_v15 = vld [vmem:[#allocation5 + $0xf38] ss:$12 sps:$4 sm:$0xff]   ;;  %v7662_v62 = vld [vmem:[#allocation5 + $0x1160] ss:$12 sps:$4 sm:$0xff]  }
 0x279   :  { %5201 = vmatprep.mubr.bf16.mxu1 %v8175_v26  ;;  %v4683_v17 = vpop.f32.mrf.mxu0  ;;  %v7622_v26 = vld [vmem:[#allocation5 + $0xe90] ss:$12 sps:$4 sm:$0xff]   ;;  %v7660_v22 = vld [vmem:[#allocation5 + $0x10b8] ss:$12 sps:$4 sm:$0xff]   ;;  %v7663_v0 = vld [vmem:[#allocation5 + $0xf20] ss:$12 sps:$4 sm:$0xff]  }
 0x27a   :  { %v4724_v18 = vpop.f32.mrf.mxu1  ;;  %6650 = vmatpush3.bf16.msra.mxu0 %v7611_v4  ;;  %v7664_v4 = vld [vmem:[#allocation5 + $0x10a0] ss:$12 sps:$4 sm:$0xff]   ;;  %v7668_v17 = vld [vmem:[#allocation5 + $0x1088] ss:$12 sps:$4 sm:$0xff]  }
 0x27b   :  { %6672 = vmatpush3.bf16.msra.mxu1 %v7612_v50  ;;  %v4684_v19 = vpop.f32.mrf.mxu0  ;;  %6651 = vmatprep.subr.bf16.mxu0 %v7613_v10  ;;  %v7665_v50 = vld [vmem:[#allocation5 + $0xfc8] ss:$12 sps:$4 sm:$0xff]   ;;  %v7669_v18 = vld [vmem:[#allocation8 + $0x78] sm:$0xff]  }
 0x27c   :  { %v4725_v60 = vpop.f32.mrf.mxu1  ;;  %6673 = vmatprep.subr.bf16.mxu1 %v7614_v8  ;;  %v7666_v10 = vld [vmem:[#allocation5 + $0x1148] ss:$12 sps:$4 sm:$0xff]  }
 0x27d   :  { %v7667_v8 = vld [vmem:[#allocation5 + $0xf08] ss:$12 sps:$4 sm:$0xff]  }
 0x27e   :  { %6652 = vmatpush3.bf16.msra.mxu0 %v7615_v20  ;;  %v4682_v20 = vadd.f32 %v8262_v41, %v8253_v49  ;;  %v7671_v19 = vld [vmem:[#allocation8 + $0x70] sm:$0xff]   ;;  %v7673_v49 = vld [vmem:[#allocation8 + $0x68] sm:$0xff]  }
 0x27f   :  { %6674 = vmatpush3.bf16.msra.mxu1 %v7616_v16  ;;  %6653 = vmatprep.subr.bf16.mxu0 %v7617_v6  ;;  %v7670_v16 = vld [vmem:[#allocation8 + $0x38] sm:$0xff]  }
 0x280   :  { %6675 = vmatprep.subr.bf16.mxu1 %v7618_v9  ;;  %v4723_v9 = vadd.f32 %v8264_v7, %v4682_v20  ;;  %v7675_v7 = vld [vmem:[#allocation8 + $0x60] sm:$0xff]  }
 0x282   :  { %6654 = vmatpush3.bf16.msra.mxu0 %v7619_v24 }
 0x283   :  { %6676 = vmatpush3.bf16.msra.mxu1 %v7620_v27  ;;  %6655 = vmatprep.subr.bf16.mxu0 %v7621_v25  ;;  %v7672_v27 = vld [vmem:[#allocation8 + $0x30] sm:$0xff]  }
 0x284   :  { %6677 = vmatprep.subr.bf16.mxu1 %v7622_v26 }
 0x286   :  { %6656 = vmatpush3.bf16.msra.mxu0 %v7623_v28 }
 0x287   :  { %6678 = vmatpush3.bf16.msra.mxu1 %v7624_v29  ;;  %6657 = vmatprep.subr.bf16.mxu0 %v7625_v63 }
 0x288   :  { %6679 = vmatprep.subr.bf16.mxu1 %v7626_v1 }
 0x28a   :  { %6658 = vmatpush3.bf16.msra.mxu0 %v7627_v2 }
 0x28b   :  { %6680 = vmatpush3.bf16.msra.mxu1 %v7628_v53  ;;  %6659 = vmatprep.subr.bf16.mxu0 %v7629_v55  ;;  %v7676_v55 = vld [vmem:[#allocation8 + $0x20] sm:$0xff]  }
 0x28c   :  { %6681 = vmatprep.subr.bf16.mxu1 %v7630_v56  ;;  %v7677_v56 = vld [vmem:[#allocation8 + $0x58] sm:$0xff]  }
 0x28e   :  { %6660 = vmatpush3.bf16.msra.mxu0 %v7631_v57  ;;  %v7678_v57 = vld [vmem:[#allocation8 + $0x18] sm:$0xff]  }
 0x28f   :  { %6682 = vmatpush3.bf16.msra.mxu1 %v7632_v58  ;;  %6661 = vmatprep.subr.bf16.mxu0 %v7633_v30  ;;  %v7679_v58 = vld [vmem:[#allocation8 + $0x50] sm:$0xff]  }
 0x290   :  { %6683 = vmatprep.subr.bf16.mxu1 %v7634_v31  ;;  %v7680_v30 = vld [vmem:[#allocation8 + $0x10] sm:$0xff]   ;;  %v7681_v31 = vld [vmem:[#allocation8 + $0x48] sm:$0xff]  }
 0x292   :  { %6662 = vmatpush3.bf16.msra.mxu0 %v7635_v38 }
 0x293   :  { %6684 = vmatpush3.bf16.msra.mxu1 %v7636_v39  ;;  %6691 = vmatprep.subr.bf16.mxu0 %v7637_v43  ;;  %v7682_v43 = vld [vmem:[#allocation8 + $0x8] sm:$0xff]  }
 0x294   :  { %6713 = vmatprep.subr.bf16.mxu1 %v7638_v32 }
 0x295   :  { %5162 = vmatmul.mubr.bf16.vlgmr.msra.gmra.mxu0 %v8205_v3  ;;  %v7649_v3 = vld [vmem:[#allocation5 + $0x1028] ss:$12 sps:$4 sm:$0xff]  }
 0x296   :  { %5202 = vmatmul.mubr.bf16.vlgmr.msra.gmra.mxu1 %v8207_v34  ;;  %6692 = vmatpush3.bf16.msra.mxu0 %v7639_v33  ;;  %v7650_v34 = vld [vmem:[#allocation5 + $0x11a8] ss:$12 sps:$4 sm:$0xff]  }
 0x297   :  { %6714 = vmatpush3.bf16.msra.mxu1 %v7640_v47  ;;  %6693 = vmatprep.subr.bf16.mxu0 %v7641_v12  ;;  %v7683_v33 = vld [vmem:[#allocation8 + $0x40] sm:$0xff]  }
 0x298   :  { %6715 = vmatprep.subr.bf16.mxu1 %v7642_v13  ;;  %5241 = vmatprep.mubr.bf16.mxu0 %v8209_v35  ;;  %v7655_v35 = vld [vmem:[#allocation5 + $0xf50] ss:$12 sps:$4 sm:$0xff]   ;;  %v7684_v12 = vld [vmem:[#allocation8] sm:$0xff]   ;;  %v1240_v13 = vsub.s32 2, %v8040_v46 }
 0x299   :  { %5281 = vmatprep.mubr.bf16.mxu1 %v8211_v37  ;;  %v7656_v37 = vld [vmem:[#allocation5 + $0x10d0] ss:$12 sps:$4 sm:$0xff]  }
 0x29a   :  { %6694 = vmatpush3.bf16.msra.mxu0 %v7643_v21 }
 0x29b   :  { %6716 = vmatpush3.bf16.msra.mxu1 %v7644_v48  ;;  %6695 = vmatprep.subr.bf16.mxu0 %v7645_v44  ;;  %v7729_v44 = vld [vmem:[#allocation7] sm:$0x7] }
 0x29c   :  { %6717 = vmatprep.subr.bf16.mxu1 %v7646_v45  ;;  %v1241_v45 = vrot.slane %v7729_v44, %v1240_v13 }
 0x29e   :  { %6696 = vmatpush3.bf16.msra.mxu0 %v7647_v36 }
 0x29f   :  { %6718 = vmatpush3.bf16.msra.mxu1 %v7648_v51  ;;  %6697 = vmatprep.subr.bf16.mxu0 %v7649_v3 }
 0x2a0   :  { %6719 = vmatprep.subr.bf16.mxu1 %v7650_v34 }
 0x2a2   :  { %6698 = vmatpush3.bf16.msra.mxu0 %v7651_v52 }
 0x2a3   :  { %6720 = vmatpush3.bf16.msra.mxu1 %v7652_v54  ;;  %6699 = vmatprep.subr.bf16.mxu0 %v7653_v59 }
 0x2a4   :  { %6721 = vmatprep.subr.bf16.mxu1 %v7654_v61 }
 0x2a6   :  { %6700 = vmatpush3.bf16.msra.mxu0 %v7655_v35 }
 0x2a7   :  { %6722 = vmatpush3.bf16.msra.mxu1 %v7656_v37  ;;  %6701 = vmatprep.subr.bf16.mxu0 %v7657_v5 }
 0x2a8   :  { %6723 = vmatprep.subr.bf16.mxu1 %v7658_v14 }
 0x2aa   :  { %6702 = vmatpush3.bf16.msra.mxu0 %v7659_v15 }
 0x2ab   :  { %6724 = vmatpush3.bf16.msra.mxu1 %v7660_v22  ;;  %6703 = vmatprep.subr.bf16.mxu0 %v7661_v23 }
 0x2ac   :  { %6725 = vmatprep.subr.bf16.mxu1 %v7662_v62 }
 0x2ae   :  { %6704 = vmatpush3.bf16.msra.mxu0 %v7663_v0 }
 0x2af   :  { %6726 = vmatpush3.bf16.msra.mxu1 %v7664_v4  ;;  %6705 = vmatprep.subr.bf16.mxu0 %v7665_v50 }
 0x2b0   :  { %6727 = vmatprep.subr.bf16.mxu1 %v7666_v10 }
 0x2b2   :  { %6706 = vmatpush3.bf16.msra.mxu0 %v7667_v8 }
 0x2b3   :  { %6728 = vmatpush3.bf16.msra.mxu1 %v7668_v17  ;;  %6735 = vmatprep.subr.bf16.mxu0 %v7669_v18 }
 0x2b5   :  { %v4761_v60 = vpop.f32.mrf.mxu0  ;;  %5242 = vmatmul.mubr.bf16.vlgmr.msra.gmra.mxu0 %v8227_v40  ;;  %v7674_v40 = vld [vmem:[#allocation8 + $0x28] sm:$0xff]  }
 0x2b6   :  { %v4802_v6 = vpop.f32.mrf.mxu1  ;;  %5282 = vmatmul.mubr.bf16.vlgmr.msra.gmra.mxu1 %v8229_v42  ;;  %v4762_v24 = vadd.f32 %v4761_v60, %v8266_v11  ;;  %6736 = vmatpush3.bf16.msra.mxu0 %v7670_v16  ;;  %v7958_v60 = vmov 0.0  }
 0x2b7   :  { %v4763_v25 = vpop.f32.mrf.mxu0  ;;  %6737 = vmatprep.subr.bf16.mxu0 %v7671_v19  ;;  %v7685_v19 = vld [vmem:[#allocation8 + $0xb8] sm:$0xff]   ;;  %6784 = vmatprep.subr.bf16.mxu1 %v7958_v60 }
 0x2b8   :  { %v4804_v26 = vpop.f32.mrf.mxu1  ;;  %v4803_v41 = vadd.f32 %v4802_v6, %v4762_v24  ;;  %v4764_v28 = vadd.f32 %v4763_v25, %v4723_v9  ;;  %6785 = vmatpush3.bf16.msra.mxu1 %v7685_v19  ;;  %v7686_v6 = vld [vmem:[#allocation8 + $0xb0] sm:$0xff]   ;;  %v7687_v9 = vld [vmem:[#allocation8 + $0xa8] sm:$0xff]   ;;  %v7688_v24 = vld [vmem:[#allocation8 + $0xa0] sm:$0xff]   ;;  %6800 = vmatprep.mubr.msk.bf16.mxu1 %vm7959_vm0, %v7958_v60 }
 0x2b9   :  { %v4765_v29 = vpop.f32.mrf.mxu0  ;;  %6786 = vmatprep.subr.bf16.mxu1 %v7958_v60  ;;  %v7690_v25 = vld [vmem:[#allocation8 + $0x90] sm:$0xff]  }
 0x2ba   :  { %v4806_v63 = vpop.f32.mrf.mxu1  ;;  %v6423_v1 = vmul.f32 -1.442695, %v4803_v41  ;;  %v4805_v2 = vadd.f32 %v4804_v26, %v4764_v28  ;;  %6738 = vmatpush3.bf16.msra.mxu0 %v7672_v27  ;;  %v7689_v27 = vld [vmem:[#allocation8 + $0x98] sm:$0xff]   ;;  %v7691_v41 = vld [vmem:[#allocation8 + $0x88] sm:$0xff]  }
 0x2bb   :  { %v4766_v53 = vpop.f32.mrf.mxu0  ;;  %6739 = vmatprep.subr.bf16.mxu0 %v7673_v49 }
 0x2bc   :  { %v4807_v42 = vpop.f32.mrf.mxu1  ;;  %7709 = vpow2.f32 %v6423_v1  ;;  %v6424_v11 = vmul.f32 -1.442695, %v4805_v2  ;;  %6787 = vmatpush3.bf16.msra.mxu1 %v7686_v6  ;;  %v7692_v53 = vld [vmem:[#allocation8 + $0x80] sm:$0xff]  }
 0x2bd   :  { %6788 = vmatprep.subr.bf16.mxu1 %v7958_v60 }
 0x2be   :  { %7711 = vpow2.f32 %v6424_v11  ;;  %6740 = vmatpush3.bf16.msra.mxu0 %v7674_v40 }
 0x2bf   :  { %6741 = vmatprep.subr.bf16.mxu0 %v7675_v7 }
 0x2c0   :  { %6789 = vmatpush3.bf16.msra.mxu1 %v7687_v9 }
 0x2c1   :  { %6790 = vmatprep.subr.bf16.mxu1 %v7958_v60 }
 0x2c2   :  { %6742 = vmatpush3.bf16.msra.mxu0 %v7676_v55 }
 0x2c3   :  { %6743 = vmatprep.subr.bf16.mxu0 %v7677_v56 }
 0x2c4   :  { %6791 = vmatpush3.bf16.msra.mxu1 %v7688_v24  ;;  %v7693_v24 = vld [vmem:[#allocation11 + $0x38] sm:$0xff]  }
 0x2c5   :  { %6792 = vmatprep.subr.bf16.mxu1 %v7958_v60 }
 0x2c6   :  { %6744 = vmatpush3.bf16.msra.mxu0 %v7678_v57 }
 0x2c7   :  { %6745 = vmatprep.subr.bf16.mxu0 %v7679_v58 }
 0x2c8   :  { %6793 = vmatpush3.bf16.msra.mxu1 %v7689_v27  ;;  %v7694_v27 = vld [vmem:[#allocation11 + $0x30] sm:$0xff]  }
 0x2c9   :  { %v7710_v38 = vpop.eup %7709  ;;  %6794 = vmatprep.subr.bf16.mxu1 %v7958_v60 }
 0x2ca   :  { %v5298_v39 = vadd.f32 1.0, %v7710_v38  ;;  %6746 = vmatpush3.bf16.msra.mxu0 %v7680_v30 }
 0x2cb   :  { %v7712_v32 = vpop.eup %7711  ;;  %6747 = vmatprep.subr.bf16.mxu0 %v7681_v31 }
 0x2cc   :  { %v5299_v47 = vadd.f32 1.0, %v7712_v32  ;;  %7713 = vrcp.f32 %v5298_v39  ;;  %6795 = vmatpush3.bf16.msra.mxu1 %v7690_v25  ;;  %v7695_v25 = vld [vmem:[#allocation11 + $0x28] sm:$0xff]  }
 0x2cd   :  { %6796 = vmatprep.subr.bf16.mxu1 %v7958_v60 }
 0x2ce   :  { %7715 = vrcp.f32 %v5299_v47  ;;  %6748 = vmatpush3.bf16.msra.mxu0 %v7682_v43 }
 0x2cf   :  { %6749 = vmatprep.subr.bf16.mxu0 %v7683_v33 }
 0x2d0   :  { %6797 = vmatpush3.bf16.msra.mxu1 %v7691_v41  ;;  %v7698_v41 = vld [vmem:[#allocation11 + $0x10] sm:$0xff]  }
 0x2d1   :  { %6798 = vmatprep.subr.bf16.mxu1 %v7958_v60 }
 0x2d2   :  { %6750 = vmatpush3.bf16.msra.mxu0 %v7684_v12 }
 0x2d3   :  { %6804 = vmatprep.subr.bf16.mxu0 %v7958_v60 }
 0x2d4   :  { %6799 = vmatpush3.bf16.msra.mxu1 %v7692_v53 }
 0x2d5   :  { %v6487_v21 = vpop.f32.mrf.mxu0  ;;  %6824 = vmatprep.subr.bf16.mxu1 %v7958_v60 }
 0x2d6   :  { %v6509_v48 = vpop.f32.mrf.mxu1 }
 0x2d7   :  { %v6488_v36 = vpop.f32.mrf.mxu0 }
 0x2d8   :  { %v6510_v51 = vpop.f32.mrf.mxu1  ;;  %v6489_v3 = vadd.f32 %v6488_v36, %v6487_v21 }
 0x2d9   :  { %v6511_v34 = vadd.f32 %v6510_v51, %v6509_v48  ;;  %v6490_v52 = vpop.f32.mrf.mxu0  ;;  %v7714_v59 = vpop.eup %7713 }
 0x2da   :  { %v6512_v54 = vpop.f32.mrf.mxu1  ;;  %v4844_v61 = vadd.f32 %v6489_v3, %v1241_v45  ;;  %v5307_v22 = vpack.c.bf16 %v7714_v59, %v7714_v59 }
 0x2db   :  { %v7716_v35 = vpop.eup %7715  ;;  %v6491_v37 = vpop.f32.mrf.mxu0 }
 0x2dc   :  { %v6513_v5 = vpop.f32.mrf.mxu1  ;;  %v4884_v14 = vadd.f32 %v6511_v34, %v4844_v61  ;;  %v5308_v15 = vpack.c.bf16 %v7716_v35, %v7716_v35 }
 0x2de   :  { %5541 = vmatprep.mubr.bf16.mxu0 %v5308_v15 }
 0x2df   :  { %5542 = vmatmul.mubr.bf16.vlgmr.msra.gmra.mxu0 %v5307_v22 }
 0x2e0   :  { %6820 = vmatprep.mubr.msk.bf16.mxu0 %vm7959_vm0, %v7958_v60  ;;  %6805 = vmatpush3.bf16.msra.mxu0 %v7693_v24 }
 0x2e1   :  { %6806 = vmatprep.subr.bf16.mxu0 %v7958_v60 }
 0x2e4   :  { %6807 = vmatpush3.bf16.msra.mxu0 %v7694_v27 }
 0x2e5   :  { %6808 = vmatprep.subr.bf16.mxu0 %v7958_v60 }
 0x2e8   :  { %6809 = vmatpush3.bf16.msra.mxu0 %v7695_v25 }
 0x2e9   :  { %6810 = vmatprep.subr.bf16.mxu0 %v7958_v60 }
 0x2f5   :  { %v6531_v46 = vpop.f32.mrf.mxu0 }
 0x2f6   :  { %v6553_v23 = vpop.f32.mrf.mxu1 }
 0x2f7   :  { %v6532_v62 = vpop.f32.mrf.mxu0 }
 0x2f8   :  { %v6554_v0 = vpop.f32.mrf.mxu1  ;;  %v6533_v4 = vadd.f32 %v6532_v62, %v6531_v46 }
 0x2f9   :  { %v6555_v50 = vadd.f32 %v6554_v0, %v6553_v23  ;;  %v6534_v10 = vpop.f32.mrf.mxu0 }
 0x2fa   :  { %v6556_v8 = vpop.f32.mrf.mxu1  ;;  %v4924_v17 = vadd.f32 %v6533_v4, %v4884_v14 }
 0x2fb   :  { %v6535_v18 = vpop.f32.mrf.mxu0 }
 0x2fc   :  { %v6557_v20 = vpop.f32.mrf.mxu1  ;;  %v4964_v16 = vadd.f32 %v6555_v50, %v4924_v17 }
 0x315   :  { %v6575_v26 = vpop.f32.mrf.mxu0 }
 0x316   :  { %v6597_v49 = vpop.f32.mrf.mxu1 }
 0x317   :  { %v6576_v28 = vpop.f32.mrf.mxu0 }
 0x318   :  { %v6598_v29 = vpop.f32.mrf.mxu1  ;;  %v6577_v63 = vadd.f32 %v6576_v28, %v6575_v26  ;;  %v7696_v26 = vld [vmem:[#allocation11 + $0x20] sm:$0xff]   ;;  %v7699_v28 = vld [vmem:[#allocation11 + $0x8] sm:$0xff]  }
 0x319   :  { %v6599_v1 = vadd.f32 %v6598_v29, %v6597_v49  ;;  %v6578_v2 = vpop.f32.mrf.mxu0  ;;  %6811 = vmatpush3.bf16.msra.mxu0 %v7696_v26  ;;  %v7697_v49 = vld [vmem:[#allocation11 + $0x18] sm:$0xff]   ;;  %v7700_v29 = vld [vmem:[#allocation11] sm:$0xff]  }
 0x31a   :  { %v6600_v40 = vpop.f32.mrf.mxu1  ;;  %v5004_v42 = vadd.f32 %v6577_v63, %v4964_v16  ;;  %6812 = vmatprep.subr.bf16.mxu0 %v7958_v60  ;;  %v6426_v63 = vld [vmem:[#allocation10] ss:$0 sm:$0xff] }
 0x31b   :  { %v6579_v7 = vpop.f32.mrf.mxu0 }
 0x31c   :  { %v6601_v11 = vpop.f32.mrf.mxu1  ;;  %v5044_v55 = vadd.f32 %v6599_v1, %v5004_v42 }
 0x31d   :  { %6813 = vmatpush3.bf16.msra.mxu0 %v7697_v49 }
 0x31e   :  { %6814 = vmatprep.subr.bf16.mxu0 %v7958_v60 }
 0x321   :  { %6815 = vmatpush3.bf16.msra.mxu0 %v7698_v41 }
 0x322   :  { %6816 = vmatprep.subr.bf16.mxu0 %v7958_v60 }
 0x325   :  { %6817 = vmatpush3.bf16.msra.mxu0 %v7699_v28 }
 0x326   :  { %6818 = vmatprep.subr.bf16.mxu0 %v7958_v60 }
 0x329   :  { %6819 = vmatpush3.bf16.msra.mxu0 %v7700_v29 }
 0x335   :  { %v6619_v56 = vpop.f32.mrf.mxu0 }
 0x336   :  { %v6641_v57 = vpop.f32.mrf.mxu1 }
 0x337   :  { %v6620_v58 = vpop.f32.mrf.mxu0 }
 0x338   :  { %v6642_v30 = vpop.f32.mrf.mxu1  ;;  %v6621_v45 = vadd.f32 %v6620_v58, %v6619_v56 }
 0x339   :  { %v6622_v31 = vpop.f32.mrf.mxu0  ;;  %v6643_v51 = vadd.f32 %v6642_v30, %v6641_v57  ;;  %v7701_v30 = vld [vmem:[#allocation14 + $0x38] sm:$0xff]  }
 0x33a   :  { %v6644_v38 = vpop.f32.mrf.mxu1  ;;  %v5084_v36 = vadd.f32 %v6621_v45, %v5044_v55  ;;  %v7702_v31 = vld [vmem:[#allocation14 + $0x30] sm:$0xff]  }
 0x33b   :  { %v6623_v39 = vpop.f32.mrf.mxu0  ;;  %v7703_v38 = vld [vmem:[#allocation14 + $0x28] sm:$0xff]  }
 0x33c   :  { %v6645_v43 = vpop.f32.mrf.mxu1  ;;  %v5124_v34 = vadd.f32 %v6643_v51, %v5084_v36  ;;  %v7704_v39 = vld [vmem:[#allocation14 + $0x20] sm:$0xff]  }
 0x33d   :  { %v7705_v43 = vld [vmem:[#allocation14 + $0x18] sm:$0xff]  }
 0x355   :  { %v6663_v32 = vpop.f32.mrf.mxu0 }
 0x356   :  { %v6685_v33 = vpop.f32.mrf.mxu1 }
 0x357   :  { %v6664_v47 = vpop.f32.mrf.mxu0 }
 0x358   :  { %v6686_v12 = vpop.f32.mrf.mxu1  ;;  %v6665_v3 = vadd.f32 %v6664_v47, %v6663_v32  ;;  %v7706_v32 = vld [vmem:[#allocation14 + $0x10] sm:$0xff]   ;;  %v7708_v47 = vld [vmem:[#allocation14] sm:$0xff]  }
 0x359   :  { %v6666_v13 = vpop.f32.mrf.mxu0  ;;  %v6687_v54 = vadd.f32 %v6686_v12, %v6685_v33  ;;  %v7707_v33 = vld [vmem:[#allocation14 + $0x8] sm:$0xff]   ;;  %v6452_v12 = vld [vmem:[#allocation13] ss:$0 sm:$0xff] }
 0x35a   :  { %v6688_v21 = vpop.f32.mrf.mxu1  ;;  %v5164_v52 = vadd.f32 %v6665_v3, %v5124_v34 }
 0x35b   :  { %v6667_v48 = vpop.f32.mrf.mxu0 }
 0x35c   :  { %v6689_v44 = vpop.f32.mrf.mxu1  ;;  %v5204_v5 = vadd.f32 %v6687_v54, %v5164_v52  ;;  %v6462_v54 = vld [vmem:[#allocation16] ss:$0 sm:$0xff] }
 0x375   :  { %v6707_v59 = vpop.f32.mrf.mxu0 }
 0x376   :  { %v6729_v61 = vpop.f32.mrf.mxu1 }
 0x377   :  { %v6708_v35 = vpop.f32.mrf.mxu0 }
 0x378   :  { %v6730_v37 = vpop.f32.mrf.mxu1  ;;  %v6709_v14 = vadd.f32 %v6708_v35, %v6707_v59 }
 0x379   :  { %v6710_v15 = vpop.f32.mrf.mxu0  ;;  %v6731_v23 = vadd.f32 %v6730_v37, %v6729_v61 }
 0x37a   :  { %v6732_v22 = vpop.f32.mrf.mxu1  ;;  %v5244_v46 = vadd.f32 %v6709_v14, %v5204_v5 }
 0x37b   :  { %v6711_v62 = vpop.f32.mrf.mxu0 }
 0x37c   :  { %v6733_v0 = vpop.f32.mrf.mxu1  ;;  %v5284_v4 = vadd.f32 %v6731_v23, %v5244_v46 }
 0x37e   :  { %v6425_v50 = vmul.f32 -1.442695, %v5284_v4 }
 0x380   :  { %7717 = vpow2.f32 %v6425_v50 }
 0x38d   :  { %v7718_v10 = vpop.eup %7717 }
 0x38e   :  { %v5300_v8 = vadd.f32 1.0, %v7718_v10 }
 0x390   :  { %7719 = vrcp.f32 %v5300_v8 }
 0x39d   :  { %v7720_v17 = vpop.eup %7719 }
 0x39e   :  { %v5309_v18 = vpack.c.bf16 %v7720_v17, %v7720_v17 }
 0x39f   :  { %v6751_v20 = vpop.f32.mrf.mxu0 }
 0x3a0   :  { %6801 = vmatmul.mubr.bf16.vlgmr.msra.gmra.mxu1 %v5309_v18 }
 0x3a1   :  { %v6752_v16 = vpop.f32.mrf.mxu0  ;;  %6840 = vmatprep.mubr.msk.bf16.mxu1 %vm7959_vm0, %v7958_v60  ;;  %6825 = vmatpush3.bf16.msra.mxu1 %v7701_v30 }
 0x3a2   :  { %v6753_v19 = vadd.f32 %v6752_v16, %v6751_v20  ;;  %6826 = vmatprep.subr.bf16.mxu1 %v7958_v60 }
 0x3a3   :  { %v6754_v6 = vpop.f32.mrf.mxu0 }
 0x3a4   :  { %v5544_v1 = vadd.f32 %v6753_v19, %v6426_v63 }
 0x3a5   :  { %v6755_v9 = vpop.f32.mrf.mxu0  ;;  %6827 = vmatpush3.bf16.msra.mxu1 %v7702_v31 }
 0x3a6   :  { %6828 = vmatprep.subr.bf16.mxu1 %v7958_v60 }
 0x3a9   :  { %6829 = vmatpush3.bf16.msra.mxu1 %v7703_v38 }
 0x3aa   :  { %6830 = vmatprep.subr.bf16.mxu1 %v7958_v60 }
 0x3ad   :  { %6831 = vmatpush3.bf16.msra.mxu1 %v7704_v39 }
 0x3ae   :  { %6832 = vmatprep.subr.bf16.mxu1 %v7958_v60 }
 0x3b1   :  { %6833 = vmatpush3.bf16.msra.mxu1 %v7705_v43 }
 0x3b2   :  { %6834 = vmatprep.subr.bf16.mxu1 %v7958_v60 }
 0x3b5   :  { %6835 = vmatpush3.bf16.msra.mxu1 %v7706_v32 }
 0x3b6   :  { %6836 = vmatprep.subr.bf16.mxu1 %v7958_v60 }
 0x3b9   :  { %6837 = vmatpush3.bf16.msra.mxu1 %v7707_v33 }
 0x3ba   :  { %6838 = vmatprep.subr.bf16.mxu1 %v7958_v60 }
 0x3bd   :  { %6839 = vmatpush3.bf16.msra.mxu1 %v7708_v47 }
 0x460   :  { %v5583_v2 = vpop.f32.mrf.mxu1 }
 0x461   :  { %v5584_v40 = vadd.f32 %v5583_v2, %v5544_v1 }
 0x462   :  { %v6802_v53 = vpop.f32.mrf.mxu1 }
 0x463   :  { %v6451_v42 = vmul.f32 -1.442695, %v5584_v40 }
 0x464   :  { %v5586_v7 = vpop.f32.mrf.mxu1 }
 0x465   :  { %7721 = vpow2.f32 %v6451_v42 }
 0x466   :  { %v6803_v11 = vpop.f32.mrf.mxu1 }
 0x472   :  { %v7722_v55 = vpop.eup %7721 }
 0x473   :  { %v5592_v56 = vadd.f32 1.0, %v7722_v55 }
 0x475   :  { %7723 = vrcp.f32 %v5592_v56 }
 0x482   :  { %v7724_v57 = vpop.eup %7723 }
 0x483   :  { %v5595_v58 = vpack.c.bf16 %v7724_v57, %v7724_v57 }
 0x485   :  { %6821 = vmatmul.mubr.bf16.vlgmr.msra.gmra.mxu0 %v5595_v58 }
 0x545   :  { %v5701_v13 = vpop.f32.mrf.mxu0 }
 0x546   :  { %v5702_v21 = vadd.f32 %v6452_v12, %v5701_v13 }
 0x547   :  { %v6822_v48 = vpop.f32.mrf.mxu0 }
 0x548   :  { %v6461_v44 = vmul.f32 -1.442695, %v5702_v21 }
 0x549   :  { %v5704_v45 = vpop.f32.mrf.mxu0 }
 0x54a   :  { %7725 = vpow2.f32 %v6461_v44 }
 0x54b   :  { %v6823_v36 = vpop.f32.mrf.mxu0 }
 0x557   :  { %v7726_v51 = vpop.eup %7725 }
 0x558   :  { %v5710_v3 = vadd.f32 1.0, %v7726_v51 }
 0x55a   :  { %7727 = vrcp.f32 %v5710_v3 }
 0x567   :  { %v7728_v34 = vpop.eup %7727 }
 0x568   :  { %v5713_v52 = vpack.c.bf16 %v7728_v34, %v7728_v34 }
 0x56a   :  { %6841 = vmatmul.mubr.bf16.vlgmr.msra.gmra.mxu1 %v5713_v52 }
 0x62a   :  { %v5819_v59 = vpop.f32.mrf.mxu1 }
 0x62b   :  { %v5820_v61 = vadd.f32 %v6462_v54, %v5819_v59 }
 0x62c   :  { %v6842_v35 = vpop.f32.mrf.mxu1 }
 0x62d   :  { %5825 = vst [vmem:[#allocation17] sm:$0xff] %v5820_v61 }
 0x62e   :  { %v5822_v60 = vpop.f32.mrf.mxu1 }
 0x630   :  { %v6843_v37 = vpop.f32.mrf.mxu1 }
 0x631   :  { %5830 = vsyncadd [#allocation4], 96  ;;  %s7960_s6 = smov [#allocation17]  }
 0x632   :  { %s5831_s8 = sshll.u32 %s7960_s6, 4  ;;  %s5832_s8 = int_to_ptr.vmem [resolvable:$true] %s5831_s8 }
 0x633   :  { %s7910_s5 = scalar_lea.vmem %s5832_s8, 32  ;;  %s7914_s14 = scalar_lea.vmem %s5832_s8, 128 }
 0x634   :  { %p7911_p3 = scmp.ne.s32.totalorder %s5832_s8, %s7910_s5  ;;  %p7915_p4 = scmp.lt.s32.totalorder %s5832_s8, %s5832_s8 }
 0x635   :  { %p7916_p5 = scmp.lt.s32.totalorder %s7914_s14, %s7910_s5 }
 0x637   :  { %p7917_p6 = por %p7916_p5, %p7915_p4 }
 0x639   :  { %p7918_p7 = pnand %p7917_p6, %p7911_p3 }
 0x63b   :  { %7921 = shalt.err (!%p7918_p7)
}
 0x63c   :  { %s7961_s15 = smov 32   ;;  %s7962_s16 = smov 2  }
 0x63d   :  { %5837 = dma.vmem_to_hbm [thread:$0]  %s5832_s8, 32, %s8323_s9, [#allocation4], %s7961_s15, %s7961_s15, %s7962_s16  }
 0x63e   :  { %7940 = dma.done.wait [#allocation4], 128  }
 0x63f   :  { %7941 = vsyncadd [#allocation4], 4294967168 }
 0x640   :  { %5841 = vsyncpa [#allocation3], 1 }
 0x641   :  { %5842 = vsyncpa [#allocation6], 1 }
 0x642   :  { %5843 = vsyncpa [#allocation9], 1 }
 0x643   :  { %5844 = vsyncpa [#allocation12], 1 }
 0x644   :  { %5845 = vsyncpa [#allocation15], 1 }
 0x645   :  { %5846 = vsyncpa [#allocation4], 1 }

</bundles_post_ra>
